<compile_context>
chip_gen: v7x
topology: tpu7x:2x2x1
jax: 0.10.0
libtpu: 0.0.40
codegen_flags: <defaults>
</compile_context>

<pallas_src>
import functools

import jax
import jax.numpy as jnp
import numpy as np
from jax import lax
from jax.experimental import pallas as pl
from jax.experimental.pallas import tpu as pltpu


# -----------------------------------------------------------------------------
# Fused per-sentence forward kernel
# -----------------------------------------------------------------------------
def _morse_fused_kernel(x_ref, y_ref, tgt_ref,            # activations / targets
                        wa_ref, wb_ref, lb_ref,            # packed weight slabs
                        out_ref,                           # (1, W*Ty, Vp) f32
                        s_we, s_ce, s_dec,                 # VMEM head scratch
                        *, num_heads, num_words, out_vocab):
    f32, bf16 = jnp.float32, jnp.bfloat16
    H = num_heads
    W = num_words
    NTx, E = x_ref.shape[1], x_ref.shape[2]
    NTy, E2 = y_ref.shape[1], y_ref.shape[2]
    Tx, Ty = NTx // W, NTy // W
    Vp = out_ref.shape[2]
    Vo = out_vocab

    def wdot(x2, w):
        """2-D activation @ bf16 weight-slab slice, f32 accumulation (MXU)."""
        return jnp.dot(x2.astype(bf16), w, preferred_element_type=f32)

    def attn(q, k, v, scratch, bias=None):
        """Block MHA.  q/k/v: (nb, tq|tk, D) batched over attention blocks, or
        (tq|tk, D) for a single block.  Head outputs land in lane slices of
        `scratch` (rows, D); caller does ONE Wo matmul + residual add."""
        D = q.shape[-1]
        dh = D // H
        if q.ndim == 2:
            dn_s = (((1,), (1,)), ((), ()))
            dn_pv = (((1,), (0,)), ((), ()))
            rows = q.shape[0]
        else:
            dn_s = (((2,), (2,)), ((0,), (0,)))
            dn_pv = (((2,), (1,)), ((0,), (0,)))
            rows = q.shape[0] * q.shape[1]
        for h in range(H):                                   # H small & static
            lo = h * dh
            s = lax.dot_general(q[..., lo:lo + dh].astype(bf16),
                                k[..., lo:lo + dh].astype(bf16),
                                dn_s, preferred_element_type=f32)
            if bias is not None:
                s = s + bias
            m = jnp.max(s, axis=-1, keepdims=True)
            p = jnp.exp(s - m)
            inv = pl.reciprocal(jnp.sum(p, axis=-1, keepdims=True), approx=True)
            p = (p * inv).astype(bf16)
            o = lax.dot_general(p, v[..., lo:lo + dh].astype(bf16),
                                dn_pv, preferred_element_type=f32)
            scratch[:, lo:lo + dh] = o.reshape(rows, dh).astype(bf16)

    # ---------------- WordEncoder: per-word char self-attention --------------
    x = x_ref[0].astype(f32)                                  # (W*Tx, E)
    qkv = wdot(x, wa_ref[:, 0:3 * E])                         # (W*Tx, 3E)
    attn(qkv[:, 0:E].reshape(W, Tx, E),
         qkv[:, E:2 * E].reshape(W, Tx, E),
         qkv[:, 2 * E:3 * E].reshape(W, Tx, E), s_we)
    we_out = x + wdot(s_we[...], wa_ref[:, 3 * E:4 * E])      # (W*Tx, E)

    # mean over the char axis -> per-word representations
    we_avg = jnp.sum(we_out.reshape(W, Tx, E), axis=1) * f32(1.0 / Tx)  # (W, E)

    # ---------------- ContextEncoder: word self-attn within this sentence ----
    qkv_c = wdot(we_avg, wa_ref[:, 4 * E:7 * E])              # (W, 3E)
    attn(qkv_c[:, 0:E], qkv_c[:, E:2 * E], qkv_c[:, 2 * E:3 * E], s_ce)
    ce_out = we_avg + wdot(s_ce[...], wa_ref[:, 7 * E:8 * E])  # (W, E)

    # ---------------- WordDecoder: causal self-attn + cross-attn -------------
    y = y_ref[0].astype(f32)                                  # (W*Ty, 2E)
    r = lax.broadcasted_iota(jnp.int32, (Ty, Ty), 0)
    c = lax.broadcasted_iota(jnp.int32, (Ty, Ty), 1)
    causal = jnp.where(r >= c, f32(0.0), f32(-1e30))[None, :, :]   # (1,Ty,Ty)

    qkv_d = wdot(y, wb_ref[:, 0:6 * E])                       # (W*Ty, 6E)
    attn(qkv_d[:, 0:E2].reshape(W, Ty, E2),
         qkv_d[:, E2:2 * E2].reshape(W, Ty, E2),
         qkv_d[:, 2 * E2:3 * E2].reshape(W, Ty, E2), s_dec, bias=causal)
    h1 = y + wdot(s_dec[...], wb_ref[:, 6 * E:8 * E])         # (W*Ty, 2E)

    # cross K/V of concat(we_out, broadcast(ce_out)) WITHOUT the concat:
    #   KV = we_out @ Wkv_top + per-word-broadcast(ce_out @ Wkv_bot)
    kv = (wdot(we_out, wa_ref[:, 8 * E:12 * E]).reshape(W, Tx, 4 * E)
          + wdot(ce_out, wa_ref[:, 12 * E:16 * E])[:, None, :])     # (W,Tx,4E)
    qx = wdot(h1, wb_ref[:, 8 * E:10 * E]).reshape(W, Ty, E2)
    attn(qx, kv[..., 0:E2], kv[..., E2:2 * E2], s_dec)        # reuse scratch
    dec = h1 + wdot(s_dec[...], wb_ref[:, 10 * E:12 * E])     # (W*Ty, 2E)

    # ---------------- Linear head + CE(ignore_index=0) + argmax --------------
    # lin_w is pre-transposed & zero-padded to Vp lanes; padded bias cols hold
    # -1e30 so they never win the max / contribute to logsumexp.
    logits = wdot(dec, wb_ref[:, 12 * E:12 * E + Vp]) + lb_ref[...]   # (NTy,Vp)
    cols = lax.broadcasted_iota(jnp.int32, (NTy, Vp), 1)
    tgt = tgt_ref[0]                                                   # (NTy,1)
    m = jnp.max(logits, axis=-1, keepdims=True)
    lse = m + jnp.log(jnp.sum(jnp.exp(logits - m), axis=-1, keepdims=True))
    tgt_logit = jnp.sum(jnp.where(cols == tgt, logits, f32(0.0)),
                        axis=-1, keepdims=True)
    loss = jnp.where(tgt != 0, lse - tgt_logit, f32(0.0))              # (NTy,1)
    # first-occurrence argmax; f32 round-trip exact while Vp <= 2**24
    pred = jnp.min(jnp.where(logits >= m, cols.astype(f32), f32(Vp)),
                   axis=-1, keepdims=True)                             # (NTy,1)

    # pack loss / pred into two padded columns -> one lane-dense 128-wide store
    slab = jnp.where(cols == Vo, loss, logits)
    slab = jnp.where(cols == Vo + 1, pred, slab)
    out_ref[0] = slab


# -----------------------------------------------------------------------------
# Device-side forward (jitted; embedding gathers in XLA, one pallas_call)
# -----------------------------------------------------------------------------
@functools.partial(jax.jit, static_argnames=("num_heads", "num_words"))
def _morse_device_forward(input_ids, target_in, target_out, params, *,
                          num_heads, num_words):
    BW, Tx = input_ids.shape
    _, Ty = target_in.shape
    W = num_words
    B = BW // W
    E = params["we_embed"].shape[1]
    E2 = params["wd_embed"].shape[1]
    Vo = params["wd_embed"].shape[0]
    Vp = params["lin_b"].shape[1]

    ids = input_ids.astype(jnp.int32)
    tin = target_in.astype(jnp.int32)
    tout = target_out.astype(jnp.int32)

    # Embedding gathers happen in XLA; kernel receives bf16 activations.
    x_emb = jnp.take(params["we_embed"], ids, axis=0).reshape(B, W * Tx, E)
    y_emb = jnp.take(params["wd_embed"], tin, axis=0).reshape(B, W * Ty, E2)
    tgt = tout.reshape(B, W * Ty, 1)

    kernel = functools.partial(_morse_fused_kernel, num_heads=num_heads,
                               num_words=W, out_vocab=Vo)

    # VMEM footprint estimate (bytes): double-buffered per-step blocks +
    # resident weight slabs + scratch, generous headroom, capped for v7x.
    per_step = ((W * Tx * E + W * Ty * E2) * 2 + W * Ty * 4 + W * Ty * Vp * 4)
    weights = (E * 16 * E + E2 * (12 * E + Vp)) * 2 + Vp * 4
    scratch = (W * Tx * E + W * E + W * Ty * E2) * 2
    vmem_limit = int(min(64 * 1024 * 1024,
                         max(16 * 1024 * 1024,
                             8 * (2 * per_step + weights + scratch))))

    slab = pl.pallas_call(
        kernel,
        grid=(B,),
        in_specs=[
            pl.BlockSpec((1, W * Tx, E), lambda b: (b, 0, 0)),
            pl.BlockSpec((1, W * Ty, E2), lambda b: (b, 0, 0)),
            pl.BlockSpec((1, W * Ty, 1), lambda b: (b, 0, 0)),
            pl.BlockSpec((E, 16 * E), lambda b: (0, 0)),          # resident
            pl.BlockSpec((E2, 12 * E + Vp), lambda b: (0, 0)),    # resident
            pl.BlockSpec((1, Vp), lambda b: (0, 0)),              # resident
        ],
        out_specs=pl.BlockSpec((1, W * Ty, Vp), lambda b: (b, 0, 0)),
        out_shape=jax.ShapeDtypeStruct((B, W * Ty, Vp), jnp.float32),
        scratch_shapes=[
            pltpu.VMEM((W * Tx, E), jnp.bfloat16),     # word-enc head concat
            pltpu.VMEM((W, E), jnp.bfloat16),          # ctx-enc head concat
            pltpu.VMEM((W * Ty, E2), jnp.bfloat16),    # decoder head concat
        ],
        compiler_params=pltpu.CompilerParams(
            dimension_semantics=("parallel",),
            vmem_limit_bytes=vmem_limit),
    )(x_emb, y_emb, tgt, params["slab_a"], params["slab_b"], params["lin_b"])

    logits = slab[:, :, :Vo].reshape(BW, Ty, Vo)
    loss = slab[:, :, Vo].reshape(BW * Ty)
    pred = slab[:, :, Vo + 1].astype(jnp.int32).reshape(BW, Ty)

    valid = tout != 0
    num_correct = jnp.sum((pred == tout) & valid).astype(jnp.int32)
    num_total = jnp.sum(valid).astype(jnp.int32)
    return loss, logits, pred, num_correct, num_total


# -----------------------------------------------------------------------------
# Morse model (JAX / Pallas)
# -----------------------------------------------------------------------------
class MorsePallas:
    def __init__(self, input_vocab, output_vocab, embed_dim=32, num_heads=4):
        self.surf = input_vocab
        self.feat = output_vocab
        self.E = E = embed_dim
        self.H = num_heads
        E2 = 2 * E
        Vi, Vo = len(input_vocab), len(output_vocab)
        assert E % num_heads == 0 and E2 % num_heads == 0
        Vp = max(128, ((Vo + 2 + 127) // 128) * 128)   # lane-dense padded vocab
        dh, dh2 = E // num_heads, E2 // num_heads

        key = jax.random.PRNGKey(42)
        ks = jax.random.split(key, 20)
        n = lambda k, shape: (0.02 * jax.random.normal(k, shape)).astype(jnp.float32)

        def fused_qkv(kq, kk, kv, d, dh_):
            # 1/sqrt(dh) folded into the Q columns (no per-score scale in-kernel)
            wq = n(kq, (d, d)) * np.float32(1.0 / np.sqrt(dh_))
            return jnp.concatenate([wq, n(kk, (d, d)), n(kv, (d, d))], axis=1)

        we_wqkv = fused_qkv(ks[0], ks[1], ks[2], E, dh)        # (E, 3E)
        we_wo = n(ks[3], (E, E))
        ce_wqkv = fused_qkv(ks[4], ks[5], ks[6], E, dh)        # (E, 3E)
        ce_wo = n(ks[7], (E, E))
        wd_sqkv = fused_qkv(ks[8], ks[9], ks[10], E2, dh2)     # (2E, 6E)
        wd_so = n(ks[11], (E2, E2))
        wd_cq = n(ks[12], (E2, E2)) * np.float32(1.0 / np.sqrt(dh2))
        wd_ck = n(ks[13], (E2, E2))
        wd_cv = n(ks[14], (E2, E2))
        wd_co = n(ks[15], (E2, E2))
        lin_w = n(ks[16], (Vo, E2))
        lin_b = n(ks[17], (Vo,))
        we_embed = n(ks[18], (Vi, E))
        wd_embed = n(ks[19], (Vo, E2))

        # split cross-attn K/V weights so the kernel never concatenates we/ce
        ckv_top = jnp.concatenate([wd_ck[:E, :], wd_cv[:E, :]], axis=1)  # (E,4E)
        ckv_bot = jnp.concatenate([wd_ck[E:, :], wd_cv[E:, :]], axis=1)  # (E,4E)

        # final linear: pre-transposed + padded to Vp lanes (-1e30 bias in pads)
        lin_w_pad = jnp.zeros((E2, Vp), jnp.float32).at[:, :Vo].set(lin_w.T)
        lin_b_pad = jnp.full((1, Vp), -1e30, jnp.float32).at[0, :Vo].set(lin_b)

        # two packed bf16 weight slabs (few DMA descriptors, half the bytes)
        slab_a = jnp.concatenate(
            [we_wqkv, we_wo, ce_wqkv, ce_wo, ckv_top, ckv_bot],
            axis=1).astype(jnp.bfloat16)                       # (E, 16E)
        slab_b = jnp.concatenate(
            [wd_sqkv, wd_so, wd_cq, wd_co, lin_w_pad],
            axis=1).astype(jnp.bfloat16)                       # (2E, 12E+Vp)

        self.params = {
            "we_embed": we_embed.astype(jnp.bfloat16),
            "wd_embed": wd_embed.astype(jnp.bfloat16),
            "slab_a": slab_a,
            "slab_b": slab_b,
            "lin_b": lin_b_pad,
        }

    def forward(self, input_ids, target_in, target_out, we_reshape, epoch):
        batchsize, word, txchar = we_reshape.shape
        del batchsize, txchar
        loss, logits, pred, num_correct, num_total = _morse_device_forward(
            input_ids, target_in, target_out, self.params,
            num_heads=self.H, num_words=word)
        acc = self.accuracy(pred, target_out, num_correct, num_total, epoch)
        return loss, acc, logits

    def accuracy(self, pred_tokens, targets, num_correct, num_total, epoch):
        # token counts come from two on-device scalars; only the (rare) string
        # branch pulls the full prediction / target tensors to the host.
        num_correct = int(num_correct)
        num_total = int(num_total)
        num_wrong = num_total - num_correct
        correct_predictions, wrong_predictions = [], []
        if epoch % 20 == 0:
            targets_np = np.asarray(jax.device_get(targets))
            preds_np = np.asarray(jax.device_get(pred_tokens))
            for i in range(targets_np.shape[0]):
                target = ''.join(self.feat[int(s)] for s in targets_np[i])
                pred = ''.join(self.feat[int(s)] for s in preds_np[i])
                if '</s>' not in target:
                    continue
                target = target[:target.index('</s>') + 4]
                pred = pred[:len(target)]
                if target != pred:
                    wrong_predictions.append('target: %s pred: %s' % (target, pred))
                else:
                    correct_predictions.append('target: %s pred: %s' % (target, pred))
        return (num_correct, num_total, num_wrong,
                wrong_predictions, correct_predictions)


# -----------------------------------------------------------------------------
if __name__ == "__main__":
    input_vocab = ['<pad>', '<s>', '</s>'] + list('abcdefghijklm')        # 16
    output_vocab = ['<pad>', '<s>', '</s>', 'Noun', 'Verb', 'Adj', 'A3sg',
                    'P3sg', 'Nom', 'Acc', 'Dat', 'Pos', 'Past', 'Pres',
                    'Fut', '1sg']                                          # 16

    batchsize, word, txchar, tychar = 2, 3, 8, 8
    embed_dim, num_heads = 32, 4

    key = jax.random.PRNGKey(0)
    k1, k2, k3 = jax.random.split(key, 3)
    input_ids = jax.random.randint(k1, (batchsize * word, txchar),
                                   0, len(input_vocab), dtype=jnp.int32)
    we_reshape = input_ids.reshape(batchsize, word, txchar)
    target_in = jax.random.randint(k2, (batchsize * word, tychar),
                                   0, len(output_vocab), dtype=jnp.int32)
    target_out = jax.random.randint(k3, (batchsize * word, tychar),
                                    0, len(output_vocab), dtype=jnp.int32)
    epoch = 1

    model = MorsePallas(input_vocab, output_vocab,
                        embed_dim=embed_dim, num_heads=num_heads)
    loss, acc, output = model.forward(input_ids, target_in, target_out,
                                      we_reshape, epoch)
    jax.block_until_ready(loss)
    jax.block_until_ready(output)

    assert loss.shape == (batchsize * word * tychar,)
    assert output.shape == (batchsize * word, tychar, len(output_vocab))
    assert isinstance(acc, tuple) and len(acc) == 5
    assert bool(jnp.all(jnp.isfinite(loss)))
    print("KERNEL_OK")
</pallas_src>

<mosaic_0001>
module attributes {stable_mosaic.version = 11 : i64} {
  func.func @_morse_fused_kernel(%arg0: i32, %arg1: memref<1x24x32xbf16, #tpu.memory_space<vmem>>, %arg2: memref<1x24x64xbf16, #tpu.memory_space<vmem>>, %arg3: memref<1x24x1xi32, #tpu.memory_space<vmem>>, %arg4: memref<32x512xbf16, #tpu.memory_space<vmem>>, %arg5: memref<64x512xbf16, #tpu.memory_space<vmem>>, %arg6: memref<1x128xf32, #tpu.memory_space<vmem>>, %arg7: memref<1x24x128xf32, #tpu.memory_space<vmem>>, %arg8: memref<24x32xbf16, #tpu.memory_space<vmem>>, %arg9: memref<3x32xbf16, #tpu.memory_space<vmem>>, %arg10: memref<24x64xbf16, #tpu.memory_space<vmem>>) attributes {dimension_semantics = [#tpu.dimension_semantics<parallel>], iteration_bounds = array<i64: 2>, scalar_prefetch = 0 : i64, scratch_operands = 3 : i64, tpu.core_type = #tpu.core_type<tc>, window_params = [{transform_indices = @transform_0, window_bounds = array<i64: 1, 24, 32>}, {transform_indices = @transform_1, window_bounds = array<i64: 1, 24, 64>}, {transform_indices = @transform_2, window_bounds = array<i64: 1, 24, 1>}, {pipeline_mode = #tpu.pipeline_mode<synchronous>, transform_indices = @transform_3, window_bounds = array<i64: 32, 512>}, {pipeline_mode = #tpu.pipeline_mode<synchronous>, transform_indices = @transform_4, window_bounds = array<i64: 64, 512>}, {pipeline_mode = #tpu.pipeline_mode<synchronous>, transform_indices = @transform_5, window_bounds = array<i64: 1, 128>}, {transform_indices = @transform_6, window_bounds = array<i64: 1, 24, 128>}]} {
    %c0 = arith.constant 0 : index
    %c0_0 = arith.constant 0 : index
    %c0_1 = arith.constant 0 : index
    %0 = vector.load %arg1[%c0, %c0_0, %c0_1] : memref<1x24x32xbf16, #tpu.memory_space<vmem>>, vector<1x24x32xbf16>
    %1 = vector.shape_cast %0 : vector<1x24x32xbf16> to vector<24x32xbf16>
    %2 = arith.extf %1 : vector<24x32xbf16> to vector<24x32xf32>
    %c0_2 = arith.constant 0 : index
    %c0_3 = arith.constant 0 : index
    %3 = vector.load %arg4[%c0_2, %c0_3] : memref<32x512xbf16, #tpu.memory_space<vmem>>, vector<32x96xbf16>
    %4 = arith.truncf %2 : vector<24x32xf32> to vector<24x32xbf16>
    %cst = arith.constant dense<0.000000e+00> : vector<24x96xf32>
    %5 = tpu.matmul %4, %3, %cst {dimension_numbers = #tpu.dot_dimension_numbers<[1], [0], [0], [1], [0, 0, 1, 1], [], []>} : vector<24x32xbf16>, vector<32x96xbf16>, vector<24x96xf32> -> vector<24x96xf32>
    %6 = vector.extract_strided_slice %5 {offsets = [0, 0], sizes = [24, 32], strides = [1, 1]} : vector<24x96xf32> to vector<24x32xf32>
    %7 = vector.shape_cast %6 : vector<24x32xf32> to vector<3x8x32xf32>
    %8 = vector.extract_strided_slice %5 {offsets = [0, 32], sizes = [24, 32], strides = [1, 1]} : vector<24x96xf32> to vector<24x32xf32>
    %9 = vector.shape_cast %8 : vector<24x32xf32> to vector<3x8x32xf32>
    %10 = vector.extract_strided_slice %5 {offsets = [0, 64], sizes = [24, 32], strides = [1, 1]} : vector<24x96xf32> to vector<24x32xf32>
    %11 = vector.shape_cast %10 : vector<24x32xf32> to vector<3x8x32xf32>
    %12 = vector.extract_strided_slice %7 {offsets = [0, 0, 0], sizes = [3, 8, 8], strides = [1, 1, 1]} : vector<3x8x32xf32> to vector<3x8x8xf32>
    %13 = arith.truncf %12 : vector<3x8x8xf32> to vector<3x8x8xbf16>
    %14 = vector.extract_strided_slice %9 {offsets = [0, 0, 0], sizes = [3, 8, 8], strides = [1, 1, 1]} : vector<3x8x32xf32> to vector<3x8x8xf32>
    %15 = arith.truncf %14 : vector<3x8x8xf32> to vector<3x8x8xbf16>
    %cst_4 = arith.constant dense<0.000000e+00> : vector<3x8x8xf32>
    %16 = tpu.matmul %13, %15, %cst_4 {dimension_numbers = #tpu.dot_dimension_numbers<[2], [2], [1], [1], [0, 0, 0, 1, 1, 1], [0], [0]>} : vector<3x8x8xbf16>, vector<3x8x8xbf16>, vector<3x8x8xf32> -> vector<3x8x8xf32>
    %cst_5 = arith.constant dense<0xFF800000> : vector<3x8xf32>
    %17 = vector.multi_reduction <maximumf>, %16, %cst_5 [2] : vector<3x8x8xf32> to vector<3x8xf32>
    %18 = vector.shape_cast %17 : vector<3x8xf32> to vector<3x8x1xf32>
    %19 = vector.broadcast %18 : vector<3x8x1xf32> to vector<3x8x8xf32>
    %20 = arith.subf %16, %19 : vector<3x8x8xf32>
    %21 = math.exp %20 : vector<3x8x8xf32>
    %cst_6 = arith.constant dense<0.000000e+00> : vector<3x8xf32>
    %22 = vector.multi_reduction <add>, %21, %cst_6 [2] : vector<3x8x8xf32> to vector<3x8xf32>
    %23 = vector.shape_cast %22 : vector<3x8xf32> to vector<3x8x1xf32>
    %24 = tpu.reciprocal %23 {approx = true} : vector<3x8x1xf32> -> vector<3x8x1xf32>
    %25 = vector.broadcast %24 : vector<3x8x1xf32> to vector<3x8x8xf32>
    %26 = arith.mulf %21, %25 : vector<3x8x8xf32>
    %27 = arith.truncf %26 : vector<3x8x8xf32> to vector<3x8x8xbf16>
    %28 = vector.extract_strided_slice %11 {offsets = [0, 0, 0], sizes = [3, 8, 8], strides = [1, 1, 1]} : vector<3x8x32xf32> to vector<3x8x8xf32>
    %29 = arith.truncf %28 : vector<3x8x8xf32> to vector<3x8x8xbf16>
    %cst_7 = arith.constant dense<0.000000e+00> : vector<3x8x8xf32>
    %30 = tpu.matmul %27, %29, %cst_7 {dimension_numbers = #tpu.dot_dimension_numbers<[2], [1], [1], [2], [0, 0, 0, 1, 1, 2], [0], [0]>} : vector<3x8x8xbf16>, vector<3x8x8xbf16>, vector<3x8x8xf32> -> vector<3x8x8xf32>
    %31 = vector.shape_cast %30 : vector<3x8x8xf32> to vector<24x8xf32>
    %32 = arith.truncf %31 : vector<24x8xf32> to vector<24x8xbf16>
    %c0_8 = arith.constant 0 : index
    %c0_9 = arith.constant 0 : index
    %33 = vector.load %arg8[%c0_8, %c0_9] : memref<24x32xbf16, #tpu.memory_space<vmem>>, vector<24x8xbf16>
    tpu.vector_store %arg8[%c0_8, %c0_9], %32 {strides = array<i32>} : memref<24x32xbf16, #tpu.memory_space<vmem>>, vector<24x8xbf16>,
    %34 = vector.extract_strided_slice %7 {offsets = [0, 0, 8], sizes = [3, 8, 8], strides = [1, 1, 1]} : vector<3x8x32xf32> to vector<3x8x8xf32>
    %35 = arith.truncf %34 : vector<3x8x8xf32> to vector<3x8x8xbf16>
    %36 = vector.extract_strided_slice %9 {offsets = [0, 0, 8], sizes = [3, 8, 8], strides = [1, 1, 1]} : vector<3x8x32xf32> to vector<3x8x8xf32>
    %37 = arith.truncf %36 : vector<3x8x8xf32> to vector<3x8x8xbf16>
    %cst_10 = arith.constant dense<0.000000e+00> : vector<3x8x8xf32>
    %38 = tpu.matmul %35, %37, %cst_10 {dimension_numbers = #tpu.dot_dimension_numbers<[2], [2], [1], [1], [0, 0, 0, 1, 1, 1], [0], [0]>} : vector<3x8x8xbf16>, vector<3x8x8xbf16>, vector<3x8x8xf32> -> vector<3x8x8xf32>
    %cst_11 = arith.constant dense<0xFF800000> : vector<3x8xf32>
    %39 = vector.multi_reduction <maximumf>, %38, %cst_11 [2] : vector<3x8x8xf32> to vector<3x8xf32>
    %40 = vector.shape_cast %39 : vector<3x8xf32> to vector<3x8x1xf32>
    %41 = vector.broadcast %40 : vector<3x8x1xf32> to vector<3x8x8xf32>
    %42 = arith.subf %38, %41 : vector<3x8x8xf32>
    %43 = math.exp %42 : vector<3x8x8xf32>
    %cst_12 = arith.constant dense<0.000000e+00> : vector<3x8xf32>
    %44 = vector.multi_reduction <add>, %43, %cst_12 [2] : vector<3x8x8xf32> to vector<3x8xf32>
    %45 = vector.shape_cast %44 : vector<3x8xf32> to vector<3x8x1xf32>
    %46 = tpu.reciprocal %45 {approx = true} : vector<3x8x1xf32> -> vector<3x8x1xf32>
    %47 = vector.broadcast %46 : vector<3x8x1xf32> to vector<3x8x8xf32>
    %48 = arith.mulf %43, %47 : vector<3x8x8xf32>
    %49 = arith.truncf %48 : vector<3x8x8xf32> to vector<3x8x8xbf16>
    %50 = vector.extract_strided_slice %11 {offsets = [0, 0, 8], sizes = [3, 8, 8], strides = [1, 1, 1]} : vector<3x8x32xf32> to vector<3x8x8xf32>
    %51 = arith.truncf %50 : vector<3x8x8xf32> to vector<3x8x8xbf16>
    %cst_13 = arith.constant dense<0.000000e+00> : vector<3x8x8xf32>
    %52 = tpu.matmul %49, %51, %cst_13 {dimension_numbers = #tpu.dot_dimension_numbers<[2], [1], [1], [2], [0, 0, 0, 1, 1, 2], [0], [0]>} : vector<3x8x8xbf16>, vector<3x8x8xbf16>, vector<3x8x8xf32> -> vector<3x8x8xf32>
    %53 = vector.shape_cast %52 : vector<3x8x8xf32> to vector<24x8xf32>
    %54 = arith.truncf %53 : vector<24x8xf32> to vector<24x8xbf16>
    %c0_14 = arith.constant 0 : index
    %c8 = arith.constant 8 : index
    %55 = vector.load %arg8[%c0_14, %c8] : memref<24x32xbf16, #tpu.memory_space<vmem>>, vector<24x8xbf16>
    tpu.vector_store %arg8[%c0_14, %c8], %54 {strides = array<i32>} : memref<24x32xbf16, #tpu.memory_space<vmem>>, vector<24x8xbf16>,
    %56 = vector.extract_strided_slice %7 {offsets = [0, 0, 16], sizes = [3, 8, 8], strides = [1, 1, 1]} : vector<3x8x32xf32> to vector<3x8x8xf32>
    %57 = arith.truncf %56 : vector<3x8x8xf32> to vector<3x8x8xbf16>
    %58 = vector.extract_strided_slice %9 {offsets = [0, 0, 16], sizes = [3, 8, 8], strides = [1, 1, 1]} : vector<3x8x32xf32> to vector<3x8x8xf32>
    %59 = arith.truncf %58 : vector<3x8x8xf32> to vector<3x8x8xbf16>
    %cst_15 = arith.constant dense<0.000000e+00> : vector<3x8x8xf32>
    %60 = tpu.matmul %57, %59, %cst_15 {dimension_numbers = #tpu.dot_dimension_numbers<[2], [2], [1], [1], [0, 0, 0, 1, 1, 1], [0], [0]>} : vector<3x8x8xbf16>, vector<3x8x8xbf16>, vector<3x8x8xf32> -> vector<3x8x8xf32>
    %cst_16 = arith.constant dense<0xFF800000> : vector<3x8xf32>
    %61 = vector.multi_reduction <maximumf>, %60, %cst_16 [2] : vector<3x8x8xf32> to vector<3x8xf32>
    %62 = vector.shape_cast %61 : vector<3x8xf32> to vector<3x8x1xf32>
    %63 = vector.broadcast %62 : vector<3x8x1xf32> to vector<3x8x8xf32>
    %64 = arith.subf %60, %63 : vector<3x8x8xf32>
    %65 = math.exp %64 : vector<3x8x8xf32>
    %cst_17 = arith.constant dense<0.000000e+00> : vector<3x8xf32>
    %66 = vector.multi_reduction <add>, %65, %cst_17 [2] : vector<3x8x8xf32> to vector<3x8xf32>
    %67 = vector.shape_cast %66 : vector<3x8xf32> to vector<3x8x1xf32>
    %68 = tpu.reciprocal %67 {approx = true} : vector<3x8x1xf32> -> vector<3x8x1xf32>
    %69 = vector.broadcast %68 : vector<3x8x1xf32> to vector<3x8x8xf32>
    %70 = arith.mulf %65, %69 : vector<3x8x8xf32>
    %71 = arith.truncf %70 : vector<3x8x8xf32> to vector<3x8x8xbf16>
    %72 = vector.extract_strided_slice %11 {offsets = [0, 0, 16], sizes = [3, 8, 8], strides = [1, 1, 1]} : vector<3x8x32xf32> to vector<3x8x8xf32>
    %73 = arith.truncf %72 : vector<3x8x8xf32> to vector<3x8x8xbf16>
    %cst_18 = arith.constant dense<0.000000e+00> : vector<3x8x8xf32>
    %74 = tpu.matmul %71, %73, %cst_18 {dimension_numbers = #tpu.dot_dimension_numbers<[2], [1], [1], [2], [0, 0, 0, 1, 1, 2], [0], [0]>} : vector<3x8x8xbf16>, vector<3x8x8xbf16>, vector<3x8x8xf32> -> vector<3x8x8xf32>
    %75 = vector.shape_cast %74 : vector<3x8x8xf32> to vector<24x8xf32>
    %76 = arith.truncf %75 : vector<24x8xf32> to vector<24x8xbf16>
    %c0_19 = arith.constant 0 : index
    %c16 = arith.constant 16 : index
    %77 = vector.load %arg8[%c0_19, %c16] : memref<24x32xbf16, #tpu.memory_space<vmem>>, vector<24x8xbf16>
    tpu.vector_store %arg8[%c0_19, %c16], %76 {strides = array<i32>} : memref<24x32xbf16, #tpu.memory_space<vmem>>, vector<24x8xbf16>,
    %78 = vector.extract_strided_slice %7 {offsets = [0, 0, 24], sizes = [3, 8, 8], strides = [1, 1, 1]} : vector<3x8x32xf32> to vector<3x8x8xf32>
    %79 = arith.truncf %78 : vector<3x8x8xf32> to vector<3x8x8xbf16>
    %80 = vector.extract_strided_slice %9 {offsets = [0, 0, 24], sizes = [3, 8, 8], strides = [1, 1, 1]} : vector<3x8x32xf32> to vector<3x8x8xf32>
    %81 = arith.truncf %80 : vector<3x8x8xf32> to vector<3x8x8xbf16>
    %cst_20 = arith.constant dense<0.000000e+00> : vector<3x8x8xf32>
    %82 = tpu.matmul %79, %81, %cst_20 {dimension_numbers = #tpu.dot_dimension_numbers<[2], [2], [1], [1], [0, 0, 0, 1, 1, 1], [0], [0]>} : vector<3x8x8xbf16>, vector<3x8x8xbf16>, vector<3x8x8xf32> -> vector<3x8x8xf32>
    %cst_21 = arith.constant dense<0xFF800000> : vector<3x8xf32>
    %83 = vector.multi_reduction <maximumf>, %82, %cst_21 [2] : vector<3x8x8xf32> to vector<3x8xf32>
    %84 = vector.shape_cast %83 : vector<3x8xf32> to vector<3x8x1xf32>
    %85 = vector.broadcast %84 : vector<3x8x1xf32> to vector<3x8x8xf32>
    %86 = arith.subf %82, %85 : vector<3x8x8xf32>
    %87 = math.exp %86 : vector<3x8x8xf32>
    %cst_22 = arith.constant dense<0.000000e+00> : vector<3x8xf32>
    %88 = vector.multi_reduction <add>, %87, %cst_22 [2] : vector<3x8x8xf32> to vector<3x8xf32>
    %89 = vector.shape_cast %88 : vector<3x8xf32> to vector<3x8x1xf32>
    %90 = tpu.reciprocal %89 {approx = true} : vector<3x8x1xf32> -> vector<3x8x1xf32>
    %91 = vector.broadcast %90 : vector<3x8x1xf32> to vector<3x8x8xf32>
    %92 = arith.mulf %87, %91 : vector<3x8x8xf32>
    %93 = arith.truncf %92 : vector<3x8x8xf32> to vector<3x8x8xbf16>
    %94 = vector.extract_strided_slice %11 {offsets = [0, 0, 24], sizes = [3, 8, 8], strides = [1, 1, 1]} : vector<3x8x32xf32> to vector<3x8x8xf32>
    %95 = arith.truncf %94 : vector<3x8x8xf32> to vector<3x8x8xbf16>
    %cst_23 = arith.constant dense<0.000000e+00> : vector<3x8x8xf32>
    %96 = tpu.matmul %93, %95, %cst_23 {dimension_numbers = #tpu.dot_dimension_numbers<[2], [1], [1], [2], [0, 0, 0, 1, 1, 2], [0], [0]>} : vector<3x8x8xbf16>, vector<3x8x8xbf16>, vector<3x8x8xf32> -> vector<3x8x8xf32>
    %97 = vector.shape_cast %96 : vector<3x8x8xf32> to vector<24x8xf32>
    %98 = arith.truncf %97 : vector<24x8xf32> to vector<24x8xbf16>
    %c0_24 = arith.constant 0 : index
    %c24 = arith.constant 24 : index
    %99 = vector.load %arg8[%c0_24, %c24] : memref<24x32xbf16, #tpu.memory_space<vmem>>, vector<24x8xbf16>
    tpu.vector_store %arg8[%c0_24, %c24], %98 {strides = array<i32>} : memref<24x32xbf16, #tpu.memory_space<vmem>>, vector<24x8xbf16>,
    %c0_25 = arith.constant 0 : index
    %c0_26 = arith.constant 0 : index
    %100 = vector.load %arg8[%c0_25, %c0_26] : memref<24x32xbf16, #tpu.memory_space<vmem>>, vector<24x32xbf16>
    %c0_27 = arith.constant 0 : index
    %c96 = arith.constant 96 : index
    %101 = vector.load %arg4[%c0_27, %c96] : memref<32x512xbf16, #tpu.memory_space<vmem>>, vector<32x32xbf16>
    %cst_28 = arith.constant dense<0.000000e+00> : vector<24x32xf32>
    %102 = tpu.matmul %100, %101, %cst_28 {dimension_numbers = #tpu.dot_dimension_numbers<[1], [0], [0], [1], [0, 0, 1, 1], [], []>} : vector<24x32xbf16>, vector<32x32xbf16>, vector<24x32xf32> -> vector<24x32xf32>
    %103 = arith.addf %2, %102 : vector<24x32xf32>
    %104 = vector.shape_cast %103 : vector<24x32xf32> to vector<3x8x32xf32>
    %cst_29 = arith.constant dense<0.000000e+00> : vector<3x32xf32>
    %105 = vector.multi_reduction <add>, %104, %cst_29 [1] : vector<3x8x32xf32> to vector<3x32xf32>
    %cst_30 = arith.constant 1.250000e-01 : f32
    %106 = vector.broadcast %cst_30 : f32 to vector<3x32xf32>
    %107 = arith.mulf %105, %106 : vector<3x32xf32>
    %c0_31 = arith.constant 0 : index
    %c128 = arith.constant 128 : index
    %108 = vector.load %arg4[%c0_31, %c128] : memref<32x512xbf16, #tpu.memory_space<vmem>>, vector<32x96xbf16>
    %109 = arith.truncf %107 : vector<3x32xf32> to vector<3x32xbf16>
    %cst_32 = arith.constant dense<0.000000e+00> : vector<3x96xf32>
    %110 = tpu.matmul %109, %108, %cst_32 {dimension_numbers = #tpu.dot_dimension_numbers<[1], [0], [0], [1], [0, 0, 1, 1], [], []>} : vector<3x32xbf16>, vector<32x96xbf16>, vector<3x96xf32> -> vector<3x96xf32>
    %111 = vector.extract_strided_slice %110 {offsets = [0, 0], sizes = [3, 32], strides = [1, 1]} : vector<3x96xf32> to vector<3x32xf32>
    %112 = vector.extract_strided_slice %110 {offsets = [0, 32], sizes = [3, 32], strides = [1, 1]} : vector<3x96xf32> to vector<3x32xf32>
    %113 = vector.extract_strided_slice %110 {offsets = [0, 64], sizes = [3, 32], strides = [1, 1]} : vector<3x96xf32> to vector<3x32xf32>
    %114 = vector.extract_strided_slice %111 {offsets = [0, 0], sizes = [3, 8], strides = [1, 1]} : vector<3x32xf32> to vector<3x8xf32>
    %115 = arith.truncf %114 : vector<3x8xf32> to vector<3x8xbf16>
    %116 = vector.extract_strided_slice %112 {offsets = [0, 0], sizes = [3, 8], strides = [1, 1]} : vector<3x32xf32> to vector<3x8xf32>
    %117 = arith.truncf %116 : vector<3x8xf32> to vector<3x8xbf16>
    %cst_33 = arith.constant dense<0.000000e+00> : vector<3x3xf32>
    %118 = tpu.matmul %115, %117, %cst_33 {dimension_numbers = #tpu.dot_dimension_numbers<[1], [1], [0], [0], [0, 0, 1, 0], [], []>} : vector<3x8xbf16>, vector<3x8xbf16>, vector<3x3xf32> -> vector<3x3xf32>
    %cst_34 = arith.constant dense<0xFF800000> : vector<3xf32>
    %119 = vector.multi_reduction <maximumf>, %118, %cst_34 [1] : vector<3x3xf32> to vector<3xf32>
    %120 = vector.shape_cast %119 : vector<3xf32> to vector<3x1xf32>
    %121 = vector.broadcast %120 : vector<3x1xf32> to vector<3x3xf32>
    %122 = arith.subf %118, %121 : vector<3x3xf32>
    %123 = math.exp %122 : vector<3x3xf32>
    %cst_35 = arith.constant dense<0.000000e+00> : vector<3xf32>
    %124 = vector.multi_reduction <add>, %123, %cst_35 [1] : vector<3x3xf32> to vector<3xf32>
    %125 = vector.shape_cast %124 : vector<3xf32> to vector<3x1xf32>
    %126 = tpu.reciprocal %125 {approx = true} : vector<3x1xf32> -> vector<3x1xf32>
    %127 = vector.broadcast %126 : vector<3x1xf32> to vector<3x3xf32>
    %128 = arith.mulf %123, %127 : vector<3x3xf32>
    %129 = arith.truncf %128 : vector<3x3xf32> to vector<3x3xbf16>
    %130 = vector.extract_strided_slice %113 {offsets = [0, 0], sizes = [3, 8], strides = [1, 1]} : vector<3x32xf32> to vector<3x8xf32>
    %131 = arith.truncf %130 : vector<3x8xf32> to vector<3x8xbf16>
    %cst_36 = arith.constant dense<0.000000e+00> : vector<3x8xf32>
    %132 = tpu.matmul %129, %131, %cst_36 {dimension_numbers = #tpu.dot_dimension_numbers<[1], [0], [0], [1], [0, 0, 1, 1], [], []>} : vector<3x3xbf16>, vector<3x8xbf16>, vector<3x8xf32> -> vector<3x8xf32>
    %133 = arith.truncf %132 : vector<3x8xf32> to vector<3x8xbf16>
    %c0_37 = arith.constant 0 : index
    %c0_38 = arith.constant 0 : index
    %134 = vector.load %arg9[%c0_37, %c0_38] : memref<3x32xbf16, #tpu.memory_space<vmem>>, vector<3x8xbf16>
    tpu.vector_store %arg9[%c0_37, %c0_38], %133 {strides = array<i32>} : memref<3x32xbf16, #tpu.memory_space<vmem>>, vector<3x8xbf16>,
    %135 = vector.extract_strided_slice %111 {offsets = [0, 8], sizes = [3, 8], strides = [1, 1]} : vector<3x32xf32> to vector<3x8xf32>
    %136 = arith.truncf %135 : vector<3x8xf32> to vector<3x8xbf16>
    %137 = vector.extract_strided_slice %112 {offsets = [0, 8], sizes = [3, 8], strides = [1, 1]} : vector<3x32xf32> to vector<3x8xf32>
    %138 = arith.truncf %137 : vector<3x8xf32> to vector<3x8xbf16>
    %cst_39 = arith.constant dense<0.000000e+00> : vector<3x3xf32>
    %139 = tpu.matmul %136, %138, %cst_39 {dimension_numbers = #tpu.dot_dimension_numbers<[1], [1], [0], [0], [0, 0, 1, 0], [], []>} : vector<3x8xbf16>, vector<3x8xbf16>, vector<3x3xf32> -> vector<3x3xf32>
    %cst_40 = arith.constant dense<0xFF800000> : vector<3xf32>
    %140 = vector.multi_reduction <maximumf>, %139, %cst_40 [1] : vector<3x3xf32> to vector<3xf32>
    %141 = vector.shape_cast %140 : vector<3xf32> to vector<3x1xf32>
    %142 = vector.broadcast %141 : vector<3x1xf32> to vector<3x3xf32>
    %143 = arith.subf %139, %142 : vector<3x3xf32>
    %144 = math.exp %143 : vector<3x3xf32>
    %cst_41 = arith.constant dense<0.000000e+00> : vector<3xf32>
    %145 = vector.multi_reduction <add>, %144, %cst_41 [1] : vector<3x3xf32> to vector<3xf32>
    %146 = vector.shape_cast %145 : vector<3xf32> to vector<3x1xf32>
    %147 = tpu.reciprocal %146 {approx = true} : vector<3x1xf32> -> vector<3x1xf32>
    %148 = vector.broadcast %147 : vector<3x1xf32> to vector<3x3xf32>
    %149 = arith.mulf %144, %148 : vector<3x3xf32>
    %150 = arith.truncf %149 : vector<3x3xf32> to vector<3x3xbf16>
    %151 = vector.extract_strided_slice %113 {offsets = [0, 8], sizes = [3, 8], strides = [1, 1]} : vector<3x32xf32> to vector<3x8xf32>
    %152 = arith.truncf %151 : vector<3x8xf32> to vector<3x8xbf16>
    %cst_42 = arith.constant dense<0.000000e+00> : vector<3x8xf32>
    %153 = tpu.matmul %150, %152, %cst_42 {dimension_numbers = #tpu.dot_dimension_numbers<[1], [0], [0], [1], [0, 0, 1, 1], [], []>} : vector<3x3xbf16>, vector<3x8xbf16>, vector<3x8xf32> -> vector<3x8xf32>
    %154 = arith.truncf %153 : vector<3x8xf32> to vector<3x8xbf16>
    %c0_43 = arith.constant 0 : index
    %c8_44 = arith.constant 8 : index
    %155 = vector.load %arg9[%c0_43, %c8_44] : memref<3x32xbf16, #tpu.memory_space<vmem>>, vector<3x8xbf16>
    tpu.vector_store %arg9[%c0_43, %c8_44], %154 {strides = array<i32>} : memref<3x32xbf16, #tpu.memory_space<vmem>>, vector<3x8xbf16>,
    %156 = vector.extract_strided_slice %111 {offsets = [0, 16], sizes = [3, 8], strides = [1, 1]} : vector<3x32xf32> to vector<3x8xf32>
    %157 = arith.truncf %156 : vector<3x8xf32> to vector<3x8xbf16>
    %158 = vector.extract_strided_slice %112 {offsets = [0, 16], sizes = [3, 8], strides = [1, 1]} : vector<3x32xf32> to vector<3x8xf32>
    %159 = arith.truncf %158 : vector<3x8xf32> to vector<3x8xbf16>
    %cst_45 = arith.constant dense<0.000000e+00> : vector<3x3xf32>
    %160 = tpu.matmul %157, %159, %cst_45 {dimension_numbers = #tpu.dot_dimension_numbers<[1], [1], [0], [0], [0, 0, 1, 0], [], []>} : vector<3x8xbf16>, vector<3x8xbf16>, vector<3x3xf32> -> vector<3x3xf32>
    %cst_46 = arith.constant dense<0xFF800000> : vector<3xf32>
    %161 = vector.multi_reduction <maximumf>, %160, %cst_46 [1] : vector<3x3xf32> to vector<3xf32>
    %162 = vector.shape_cast %161 : vector<3xf32> to vector<3x1xf32>
    %163 = vector.broadcast %162 : vector<3x1xf32> to vector<3x3xf32>
    %164 = arith.subf %160, %163 : vector<3x3xf32>
    %165 = math.exp %164 : vector<3x3xf32>
    %cst_47 = arith.constant dense<0.000000e+00> : vector<3xf32>
    %166 = vector.multi_reduction <add>, %165, %cst_47 [1] : vector<3x3xf32> to vector<3xf32>
    %167 = vector.shape_cast %166 : vector<3xf32> to vector<3x1xf32>
    %168 = tpu.reciprocal %167 {approx = true} : vector<3x1xf32> -> vector<3x1xf32>
    %169 = vector.broadcast %168 : vector<3x1xf32> to vector<3x3xf32>
    %170 = arith.mulf %165, %169 : vector<3x3xf32>
    %171 = arith.truncf %170 : vector<3x3xf32> to vector<3x3xbf16>
    %172 = vector.extract_strided_slice %113 {offsets = [0, 16], sizes = [3, 8], strides = [1, 1]} : vector<3x32xf32> to vector<3x8xf32>
    %173 = arith.truncf %172 : vector<3x8xf32> to vector<3x8xbf16>
    %cst_48 = arith.constant dense<0.000000e+00> : vector<3x8xf32>
    %174 = tpu.matmul %171, %173, %cst_48 {dimension_numbers = #tpu.dot_dimension_numbers<[1], [0], [0], [1], [0, 0, 1, 1], [], []>} : vector<3x3xbf16>, vector<3x8xbf16>, vector<3x8xf32> -> vector<3x8xf32>
    %175 = arith.truncf %174 : vector<3x8xf32> to vector<3x8xbf16>
    %c0_49 = arith.constant 0 : index
    %c16_50 = arith.constant 16 : index
    %176 = vector.load %arg9[%c0_49, %c16_50] : memref<3x32xbf16, #tpu.memory_space<vmem>>, vector<3x8xbf16>
    tpu.vector_store %arg9[%c0_49, %c16_50], %175 {strides = array<i32>} : memref<3x32xbf16, #tpu.memory_space<vmem>>, vector<3x8xbf16>,
    %177 = vector.extract_strided_slice %111 {offsets = [0, 24], sizes = [3, 8], strides = [1, 1]} : vector<3x32xf32> to vector<3x8xf32>
    %178 = arith.truncf %177 : vector<3x8xf32> to vector<3x8xbf16>
    %179 = vector.extract_strided_slice %112 {offsets = [0, 24], sizes = [3, 8], strides = [1, 1]} : vector<3x32xf32> to vector<3x8xf32>
    %180 = arith.truncf %179 : vector<3x8xf32> to vector<3x8xbf16>
    %cst_51 = arith.constant dense<0.000000e+00> : vector<3x3xf32>
    %181 = tpu.matmul %178, %180, %cst_51 {dimension_numbers = #tpu.dot_dimension_numbers<[1], [1], [0], [0], [0, 0, 1, 0], [], []>} : vector<3x8xbf16>, vector<3x8xbf16>, vector<3x3xf32> -> vector<3x3xf32>
    %cst_52 = arith.constant dense<0xFF800000> : vector<3xf32>
    %182 = vector.multi_reduction <maximumf>, %181, %cst_52 [1] : vector<3x3xf32> to vector<3xf32>
    %183 = vector.shape_cast %182 : vector<3xf32> to vector<3x1xf32>
    %184 = vector.broadcast %183 : vector<3x1xf32> to vector<3x3xf32>
    %185 = arith.subf %181, %184 : vector<3x3xf32>
    %186 = math.exp %185 : vector<3x3xf32>
    %cst_53 = arith.constant dense<0.000000e+00> : vector<3xf32>
    %187 = vector.multi_reduction <add>, %186, %cst_53 [1] : vector<3x3xf32> to vector<3xf32>
    %188 = vector.shape_cast %187 : vector<3xf32> to vector<3x1xf32>
    %189 = tpu.reciprocal %188 {approx = true} : vector<3x1xf32> -> vector<3x1xf32>
    %190 = vector.broadcast %189 : vector<3x1xf32> to vector<3x3xf32>
    %191 = arith.mulf %186, %190 : vector<3x3xf32>
    %192 = arith.truncf %191 : vector<3x3xf32> to vector<3x3xbf16>
    %193 = vector.extract_strided_slice %113 {offsets = [0, 24], sizes = [3, 8], strides = [1, 1]} : vector<3x32xf32> to vector<3x8xf32>
    %194 = arith.truncf %193 : vector<3x8xf32> to vector<3x8xbf16>
    %cst_54 = arith.constant dense<0.000000e+00> : vector<3x8xf32>
    %195 = tpu.matmul %192, %194, %cst_54 {dimension_numbers = #tpu.dot_dimension_numbers<[1], [0], [0], [1], [0, 0, 1, 1], [], []>} : vector<3x3xbf16>, vector<3x8xbf16>, vector<3x8xf32> -> vector<3x8xf32>
    %196 = arith.truncf %195 : vector<3x8xf32> to vector<3x8xbf16>
    %c0_55 = arith.constant 0 : index
    %c24_56 = arith.constant 24 : index
    %197 = vector.load %arg9[%c0_55, %c24_56] : memref<3x32xbf16, #tpu.memory_space<vmem>>, vector<3x8xbf16>
    tpu.vector_store %arg9[%c0_55, %c24_56], %196 {strides = array<i32>} : memref<3x32xbf16, #tpu.memory_space<vmem>>, vector<3x8xbf16>,
    %c0_57 = arith.constant 0 : index
    %c0_58 = arith.constant 0 : index
    %198 = vector.load %arg9[%c0_57, %c0_58] : memref<3x32xbf16, #tpu.memory_space<vmem>>, vector<3x32xbf16>
    %c0_59 = arith.constant 0 : index
    %c224 = arith.constant 224 : index
    %199 = vector.load %arg4[%c0_59, %c224] : memref<32x512xbf16, #tpu.memory_space<vmem>>, vector<32x32xbf16>
    %cst_60 = arith.constant dense<0.000000e+00> : vector<3x32xf32>
    %200 = tpu.matmul %198, %199, %cst_60 {dimension_numbers = #tpu.dot_dimension_numbers<[1], [0], [0], [1], [0, 0, 1, 1], [], []>} : vector<3x32xbf16>, vector<32x32xbf16>, vector<3x32xf32> -> vector<3x32xf32>
    %201 = arith.addf %107, %200 : vector<3x32xf32>
    %c0_61 = arith.constant 0 : index
    %c0_62 = arith.constant 0 : index
    %c0_63 = arith.constant 0 : index
    %202 = vector.load %arg2[%c0_61, %c0_62, %c0_63] : memref<1x24x64xbf16, #tpu.memory_space<vmem>>, vector<1x24x64xbf16>
    %203 = vector.shape_cast %202 : vector<1x24x64xbf16> to vector<24x64xbf16>
    %204 = arith.extf %203 : vector<24x64xbf16> to vector<24x64xf32>
    %205 = tpu.iota {dimensions = array<i32: 0>} : vector<8x8xi32>
    %206 = tpu.iota {dimensions = array<i32: 1>} : vector<8x8xi32>
    %207 = arith.cmpi sge, %205, %206 : vector<8x8xi32>
    %cst_64 = arith.constant 0.000000e+00 : f32
    %cst_65 = arith.constant -1.000000e+30 : f32
    %208 = vector.broadcast %cst_64 : f32 to vector<8x8xf32>
    %209 = vector.broadcast %cst_65 : f32 to vector<8x8xf32>
    %210 = arith.select %207, %208, %209 : vector<8x8xi1>, vector<8x8xf32>
    %211 = vector.shape_cast %210 : vector<8x8xf32> to vector<1x8x8xf32>
    %c0_66 = arith.constant 0 : index
    %c0_67 = arith.constant 0 : index
    %212 = vector.load %arg5[%c0_66, %c0_67] : memref<64x512xbf16, #tpu.memory_space<vmem>>, vector<64x192xbf16>
    %213 = arith.truncf %204 : vector<24x64xf32> to vector<24x64xbf16>
    %cst_68 = arith.constant dense<0.000000e+00> : vector<24x192xf32>
    %214 = tpu.matmul %213, %212, %cst_68 {dimension_numbers = #tpu.dot_dimension_numbers<[1], [0], [0], [1], [0, 0, 1, 1], [], []>} : vector<24x64xbf16>, vector<64x192xbf16>, vector<24x192xf32> -> vector<24x192xf32>
    %215 = vector.extract_strided_slice %214 {offsets = [0, 0], sizes = [24, 64], strides = [1, 1]} : vector<24x192xf32> to vector<24x64xf32>
    %216 = vector.shape_cast %215 : vector<24x64xf32> to vector<3x8x64xf32>
    %217 = vector.extract_strided_slice %214 {offsets = [0, 64], sizes = [24, 64], strides = [1, 1]} : vector<24x192xf32> to vector<24x64xf32>
    %218 = vector.shape_cast %217 : vector<24x64xf32> to vector<3x8x64xf32>
    %219 = vector.extract_strided_slice %214 {offsets = [0, 128], sizes = [24, 64], strides = [1, 1]} : vector<24x192xf32> to vector<24x64xf32>
    %220 = vector.shape_cast %219 : vector<24x64xf32> to vector<3x8x64xf32>
    %221 = vector.extract_strided_slice %216 {offsets = [0, 0, 0], sizes = [3, 8, 16], strides = [1, 1, 1]} : vector<3x8x64xf32> to vector<3x8x16xf32>
    %222 = arith.truncf %221 : vector<3x8x16xf32> to vector<3x8x16xbf16>
    %223 = vector.extract_strided_slice %218 {offsets = [0, 0, 0], sizes = [3, 8, 16], strides = [1, 1, 1]} : vector<3x8x64xf32> to vector<3x8x16xf32>
    %224 = arith.truncf %223 : vector<3x8x16xf32> to vector<3x8x16xbf16>
    %cst_69 = arith.constant dense<0.000000e+00> : vector<3x8x8xf32>
    %225 = tpu.matmul %222, %224, %cst_69 {dimension_numbers = #tpu.dot_dimension_numbers<[2], [2], [1], [1], [0, 0, 0, 1, 1, 1], [0], [0]>} : vector<3x8x16xbf16>, vector<3x8x16xbf16>, vector<3x8x8xf32> -> vector<3x8x8xf32>
    %226 = vector.broadcast %211 : vector<1x8x8xf32> to vector<3x8x8xf32>
    %227 = arith.addf %225, %226 : vector<3x8x8xf32>
    %cst_70 = arith.constant dense<0xFF800000> : vector<3x8xf32>
    %228 = vector.multi_reduction <maximumf>, %227, %cst_70 [2] : vector<3x8x8xf32> to vector<3x8xf32>
    %229 = vector.shape_cast %228 : vector<3x8xf32> to vector<3x8x1xf32>
    %230 = vector.broadcast %229 : vector<3x8x1xf32> to vector<3x8x8xf32>
    %231 = arith.subf %227, %230 : vector<3x8x8xf32>
    %232 = math.exp %231 : vector<3x8x8xf32>
    %cst_71 = arith.constant dense<0.000000e+00> : vector<3x8xf32>
    %233 = vector.multi_reduction <add>, %232, %cst_71 [2] : vector<3x8x8xf32> to vector<3x8xf32>
    %234 = vector.shape_cast %233 : vector<3x8xf32> to vector<3x8x1xf32>
    %235 = tpu.reciprocal %234 {approx = true} : vector<3x8x1xf32> -> vector<3x8x1xf32>
    %236 = vector.broadcast %235 : vector<3x8x1xf32> to vector<3x8x8xf32>
    %237 = arith.mulf %232, %236 : vector<3x8x8xf32>
    %238 = arith.truncf %237 : vector<3x8x8xf32> to vector<3x8x8xbf16>
    %239 = vector.extract_strided_slice %220 {offsets = [0, 0, 0], sizes = [3, 8, 16], strides = [1, 1, 1]} : vector<3x8x64xf32> to vector<3x8x16xf32>
    %240 = arith.truncf %239 : vector<3x8x16xf32> to vector<3x8x16xbf16>
    %cst_72 = arith.constant dense<0.000000e+00> : vector<3x8x16xf32>
    %241 = tpu.matmul %238, %240, %cst_72 {dimension_numbers = #tpu.dot_dimension_numbers<[2], [1], [1], [2], [0, 0, 0, 1, 1, 2], [0], [0]>} : vector<3x8x8xbf16>, vector<3x8x16xbf16>, vector<3x8x16xf32> -> vector<3x8x16xf32>
    %242 = vector.shape_cast %241 : vector<3x8x16xf32> to vector<24x16xf32>
    %243 = arith.truncf %242 : vector<24x16xf32> to vector<24x16xbf16>
    %c0_73 = arith.constant 0 : index
    %c0_74 = arith.constant 0 : index
    %244 = vector.load %arg10[%c0_73, %c0_74] : memref<24x64xbf16, #tpu.memory_space<vmem>>, vector<24x16xbf16>
    tpu.vector_store %arg10[%c0_73, %c0_74], %243 {strides = array<i32>} : memref<24x64xbf16, #tpu.memory_space<vmem>>, vector<24x16xbf16>,
    %245 = vector.extract_strided_slice %216 {offsets = [0, 0, 16], sizes = [3, 8, 16], strides = [1, 1, 1]} : vector<3x8x64xf32> to vector<3x8x16xf32>
    %246 = arith.truncf %245 : vector<3x8x16xf32> to vector<3x8x16xbf16>
    %247 = vector.extract_strided_slice %218 {offsets = [0, 0, 16], sizes = [3, 8, 16], strides = [1, 1, 1]} : vector<3x8x64xf32> to vector<3x8x16xf32>
    %248 = arith.truncf %247 : vector<3x8x16xf32> to vector<3x8x16xbf16>
    %cst_75 = arith.constant dense<0.000000e+00> : vector<3x8x8xf32>
    %249 = tpu.matmul %246, %248, %cst_75 {dimension_numbers = #tpu.dot_dimension_numbers<[2], [2], [1], [1], [0, 0, 0, 1, 1, 1], [0], [0]>} : vector<3x8x16xbf16>, vector<3x8x16xbf16>, vector<3x8x8xf32> -> vector<3x8x8xf32>
    %250 = vector.broadcast %211 : vector<1x8x8xf32> to vector<3x8x8xf32>
    %251 = arith.addf %249, %250 : vector<3x8x8xf32>
    %cst_76 = arith.constant dense<0xFF800000> : vector<3x8xf32>
    %252 = vector.multi_reduction <maximumf>, %251, %cst_76 [2] : vector<3x8x8xf32> to vector<3x8xf32>
    %253 = vector.shape_cast %252 : vector<3x8xf32> to vector<3x8x1xf32>
    %254 = vector.broadcast %253 : vector<3x8x1xf32> to vector<3x8x8xf32>
    %255 = arith.subf %251, %254 : vector<3x8x8xf32>
    %256 = math.exp %255 : vector<3x8x8xf32>
    %cst_77 = arith.constant dense<0.000000e+00> : vector<3x8xf32>
    %257 = vector.multi_reduction <add>, %256, %cst_77 [2] : vector<3x8x8xf32> to vector<3x8xf32>
    %258 = vector.shape_cast %257 : vector<3x8xf32> to vector<3x8x1xf32>
    %259 = tpu.reciprocal %258 {approx = true} : vector<3x8x1xf32> -> vector<3x8x1xf32>
    %260 = vector.broadcast %259 : vector<3x8x1xf32> to vector<3x8x8xf32>
    %261 = arith.mulf %256, %260 : vector<3x8x8xf32>
    %262 = arith.truncf %261 : vector<3x8x8xf32> to vector<3x8x8xbf16>
    %263 = vector.extract_strided_slice %220 {offsets = [0, 0, 16], sizes = [3, 8, 16], strides = [1, 1, 1]} : vector<3x8x64xf32> to vector<3x8x16xf32>
    %264 = arith.truncf %263 : vector<3x8x16xf32> to vector<3x8x16xbf16>
    %cst_78 = arith.constant dense<0.000000e+00> : vector<3x8x16xf32>
    %265 = tpu.matmul %262, %264, %cst_78 {dimension_numbers = #tpu.dot_dimension_numbers<[2], [1], [1], [2], [0, 0, 0, 1, 1, 2], [0], [0]>} : vector<3x8x8xbf16>, vector<3x8x16xbf16>, vector<3x8x16xf32> -> vector<3x8x16xf32>
    %266 = vector.shape_cast %265 : vector<3x8x16xf32> to vector<24x16xf32>
    %267 = arith.truncf %266 : vector<24x16xf32> to vector<24x16xbf16>
    %c0_79 = arith.constant 0 : index
    %c16_80 = arith.constant 16 : index
    %268 = vector.load %arg10[%c0_79, %c16_80] : memref<24x64xbf16, #tpu.memory_space<vmem>>, vector<24x16xbf16>
    tpu.vector_store %arg10[%c0_79, %c16_80], %267 {strides = array<i32>} : memref<24x64xbf16, #tpu.memory_space<vmem>>, vector<24x16xbf16>,
    %269 = vector.extract_strided_slice %216 {offsets = [0, 0, 32], sizes = [3, 8, 16], strides = [1, 1, 1]} : vector<3x8x64xf32> to vector<3x8x16xf32>
    %270 = arith.truncf %269 : vector<3x8x16xf32> to vector<3x8x16xbf16>
    %271 = vector.extract_strided_slice %218 {offsets = [0, 0, 32], sizes = [3, 8, 16], strides = [1, 1, 1]} : vector<3x8x64xf32> to vector<3x8x16xf32>
    %272 = arith.truncf %271 : vector<3x8x16xf32> to vector<3x8x16xbf16>
    %cst_81 = arith.constant dense<0.000000e+00> : vector<3x8x8xf32>
    %273 = tpu.matmul %270, %272, %cst_81 {dimension_numbers = #tpu.dot_dimension_numbers<[2], [2], [1], [1], [0, 0, 0, 1, 1, 1], [0], [0]>} : vector<3x8x16xbf16>, vector<3x8x16xbf16>, vector<3x8x8xf32> -> vector<3x8x8xf32>
    %274 = vector.broadcast %211 : vector<1x8x8xf32> to vector<3x8x8xf32>
    %275 = arith.addf %273, %274 : vector<3x8x8xf32>
    %cst_82 = arith.constant dense<0xFF800000> : vector<3x8xf32>
    %276 = vector.multi_reduction <maximumf>, %275, %cst_82 [2] : vector<3x8x8xf32> to vector<3x8xf32>
    %277 = vector.shape_cast %276 : vector<3x8xf32> to vector<3x8x1xf32>
    %278 = vector.broadcast %277 : vector<3x8x1xf32> to vector<3x8x8xf32>
    %279 = arith.subf %275, %278 : vector<3x8x8xf32>
    %280 = math.exp %279 : vector<3x8x8xf32>
    %cst_83 = arith.constant dense<0.000000e+00> : vector<3x8xf32>
    %281 = vector.multi_reduction <add>, %280, %cst_83 [2] : vector<3x8x8xf32> to vector<3x8xf32>
    %282 = vector.shape_cast %281 : vector<3x8xf32> to vector<3x8x1xf32>
    %283 = tpu.reciprocal %282 {approx = true} : vector<3x8x1xf32> -> vector<3x8x1xf32>
    %284 = vector.broadcast %283 : vector<3x8x1xf32> to vector<3x8x8xf32>
    %285 = arith.mulf %280, %284 : vector<3x8x8xf32>
    %286 = arith.truncf %285 : vector<3x8x8xf32> to vector<3x8x8xbf16>
    %287 = vector.extract_strided_slice %220 {offsets = [0, 0, 32], sizes = [3, 8, 16], strides = [1, 1, 1]} : vector<3x8x64xf32> to vector<3x8x16xf32>
    %288 = arith.truncf %287 : vector<3x8x16xf32> to vector<3x8x16xbf16>
    %cst_84 = arith.constant dense<0.000000e+00> : vector<3x8x16xf32>
    %289 = tpu.matmul %286, %288, %cst_84 {dimension_numbers = #tpu.dot_dimension_numbers<[2], [1], [1], [2], [0, 0, 0, 1, 1, 2], [0], [0]>} : vector<3x8x8xbf16>, vector<3x8x16xbf16>, vector<3x8x16xf32> -> vector<3x8x16xf32>
    %290 = vector.shape_cast %289 : vector<3x8x16xf32> to vector<24x16xf32>
    %291 = arith.truncf %290 : vector<24x16xf32> to vector<24x16xbf16>
    %c0_85 = arith.constant 0 : index
    %c32 = arith.constant 32 : index
    %292 = vector.load %arg10[%c0_85, %c32] : memref<24x64xbf16, #tpu.memory_space<vmem>>, vector<24x16xbf16>
    tpu.vector_store %arg10[%c0_85, %c32], %291 {strides = array<i32>} : memref<24x64xbf16, #tpu.memory_space<vmem>>, vector<24x16xbf16>,
    %293 = vector.extract_strided_slice %216 {offsets = [0, 0, 48], sizes = [3, 8, 16], strides = [1, 1, 1]} : vector<3x8x64xf32> to vector<3x8x16xf32>
    %294 = arith.truncf %293 : vector<3x8x16xf32> to vector<3x8x16xbf16>
    %295 = vector.extract_strided_slice %218 {offsets = [0, 0, 48], sizes = [3, 8, 16], strides = [1, 1, 1]} : vector<3x8x64xf32> to vector<3x8x16xf32>
    %296 = arith.truncf %295 : vector<3x8x16xf32> to vector<3x8x16xbf16>
    %cst_86 = arith.constant dense<0.000000e+00> : vector<3x8x8xf32>
    %297 = tpu.matmul %294, %296, %cst_86 {dimension_numbers = #tpu.dot_dimension_numbers<[2], [2], [1], [1], [0, 0, 0, 1, 1, 1], [0], [0]>} : vector<3x8x16xbf16>, vector<3x8x16xbf16>, vector<3x8x8xf32> -> vector<3x8x8xf32>
    %298 = vector.broadcast %211 : vector<1x8x8xf32> to vector<3x8x8xf32>
    %299 = arith.addf %297, %298 : vector<3x8x8xf32>
    %cst_87 = arith.constant dense<0xFF800000> : vector<3x8xf32>
    %300 = vector.multi_reduction <maximumf>, %299, %cst_87 [2] : vector<3x8x8xf32> to vector<3x8xf32>
    %301 = vector.shape_cast %300 : vector<3x8xf32> to vector<3x8x1xf32>
    %302 = vector.broadcast %301 : vector<3x8x1xf32> to vector<3x8x8xf32>
    %303 = arith.subf %299, %302 : vector<3x8x8xf32>
    %304 = math.exp %303 : vector<3x8x8xf32>
    %cst_88 = arith.constant dense<0.000000e+00> : vector<3x8xf32>
    %305 = vector.multi_reduction <add>, %304, %cst_88 [2] : vector<3x8x8xf32> to vector<3x8xf32>
    %306 = vector.shape_cast %305 : vector<3x8xf32> to vector<3x8x1xf32>
    %307 = tpu.reciprocal %306 {approx = true} : vector<3x8x1xf32> -> vector<3x8x1xf32>
    %308 = vector.broadcast %307 : vector<3x8x1xf32> to vector<3x8x8xf32>
    %309 = arith.mulf %304, %308 : vector<3x8x8xf32>
    %310 = arith.truncf %309 : vector<3x8x8xf32> to vector<3x8x8xbf16>
    %311 = vector.extract_strided_slice %220 {offsets = [0, 0, 48], sizes = [3, 8, 16], strides = [1, 1, 1]} : vector<3x8x64xf32> to vector<3x8x16xf32>
    %312 = arith.truncf %311 : vector<3x8x16xf32> to vector<3x8x16xbf16>
    %cst_89 = arith.constant dense<0.000000e+00> : vector<3x8x16xf32>
    %313 = tpu.matmul %310, %312, %cst_89 {dimension_numbers = #tpu.dot_dimension_numbers<[2], [1], [1], [2], [0, 0, 0, 1, 1, 2], [0], [0]>} : vector<3x8x8xbf16>, vector<3x8x16xbf16>, vector<3x8x16xf32> -> vector<3x8x16xf32>
    %314 = vector.shape_cast %313 : vector<3x8x16xf32> to vector<24x16xf32>
    %315 = arith.truncf %314 : vector<24x16xf32> to vector<24x16xbf16>
    %c0_90 = arith.constant 0 : index
    %c48 = arith.constant 48 : index
    %316 = vector.load %arg10[%c0_90, %c48] : memref<24x64xbf16, #tpu.memory_space<vmem>>, vector<24x16xbf16>
    tpu.vector_store %arg10[%c0_90, %c48], %315 {strides = array<i32>} : memref<24x64xbf16, #tpu.memory_space<vmem>>, vector<24x16xbf16>,
    %c0_91 = arith.constant 0 : index
    %c0_92 = arith.constant 0 : index
    %317 = vector.load %arg10[%c0_91, %c0_92] : memref<24x64xbf16, #tpu.memory_space<vmem>>, vector<24x64xbf16>
    %c0_93 = arith.constant 0 : index
    %c192 = arith.constant 192 : index
    %318 = vector.load %arg5[%c0_93, %c192] : memref<64x512xbf16, #tpu.memory_space<vmem>>, vector<64x64xbf16>
    %cst_94 = arith.constant dense<0.000000e+00> : vector<24x64xf32>
    %319 = tpu.matmul %317, %318, %cst_94 {dimension_numbers = #tpu.dot_dimension_numbers<[1], [0], [0], [1], [0, 0, 1, 1], [], []>} : vector<24x64xbf16>, vector<64x64xbf16>, vector<24x64xf32> -> vector<24x64xf32>
    %320 = arith.addf %204, %319 : vector<24x64xf32>
    %c0_95 = arith.constant 0 : index
    %c256 = arith.constant 256 : index
    %321 = vector.load %arg4[%c0_95, %c256] : memref<32x512xbf16, #tpu.memory_space<vmem>>, vector<32x128xbf16>
    %322 = arith.truncf %103 : vector<24x32xf32> to vector<24x32xbf16>
    %cst_96 = arith.constant dense<0.000000e+00> : vector<24x128xf32>
    %323 = tpu.matmul %322, %321, %cst_96 {dimension_numbers = #tpu.dot_dimension_numbers<[1], [0], [0], [1], [0, 0, 1, 1], [], []>} : vector<24x32xbf16>, vector<32x128xbf16>, vector<24x128xf32> -> vector<24x128xf32>
    %324 = vector.shape_cast %323 : vector<24x128xf32> to vector<3x8x128xf32>
    %c0_97 = arith.constant 0 : index
    %c384 = arith.constant 384 : index
    %325 = vector.load %arg4[%c0_97, %c384] : memref<32x512xbf16, #tpu.memory_space<vmem>>, vector<32x128xbf16>
    %326 = arith.truncf %201 : vector<3x32xf32> to vector<3x32xbf16>
    %cst_98 = arith.constant dense<0.000000e+00> : vector<3x128xf32>
    %327 = tpu.matmul %326, %325, %cst_98 {dimension_numbers = #tpu.dot_dimension_numbers<[1], [0], [0], [1], [0, 0, 1, 1], [], []>} : vector<3x32xbf16>, vector<32x128xbf16>, vector<3x128xf32> -> vector<3x128xf32>
    %328 = vector.shape_cast %327 : vector<3x128xf32> to vector<3x1x128xf32>
    %329 = vector.broadcast %328 : vector<3x1x128xf32> to vector<3x8x128xf32>
    %330 = arith.addf %324, %329 : vector<3x8x128xf32>
    %c0_99 = arith.constant 0 : index
    %c256_100 = arith.constant 256 : index
    %331 = vector.load %arg5[%c0_99, %c256_100] : memref<64x512xbf16, #tpu.memory_space<vmem>>, vector<64x64xbf16>
    %332 = arith.truncf %320 : vector<24x64xf32> to vector<24x64xbf16>
    %cst_101 = arith.constant dense<0.000000e+00> : vector<24x64xf32>
    %333 = tpu.matmul %332, %331, %cst_101 {dimension_numbers = #tpu.dot_dimension_numbers<[1], [0], [0], [1], [0, 0, 1, 1], [], []>} : vector<24x64xbf16>, vector<64x64xbf16>, vector<24x64xf32> -> vector<24x64xf32>
    %334 = vector.shape_cast %333 : vector<24x64xf32> to vector<3x8x64xf32>
    %335 = vector.extract_strided_slice %330 {offsets = [0, 0, 0], sizes = [3, 8, 64], strides = [1, 1, 1]} : vector<3x8x128xf32> to vector<3x8x64xf32>
    %336 = vector.extract_strided_slice %330 {offsets = [0, 0, 64], sizes = [3, 8, 64], strides = [1, 1, 1]} : vector<3x8x128xf32> to vector<3x8x64xf32>
    %337 = vector.extract_strided_slice %334 {offsets = [0, 0, 0], sizes = [3, 8, 16], strides = [1, 1, 1]} : vector<3x8x64xf32> to vector<3x8x16xf32>
    %338 = arith.truncf %337 : vector<3x8x16xf32> to vector<3x8x16xbf16>
    %339 = vector.extract_strided_slice %335 {offsets = [0, 0, 0], sizes = [3, 8, 16], strides = [1, 1, 1]} : vector<3x8x64xf32> to vector<3x8x16xf32>
    %340 = arith.truncf %339 : vector<3x8x16xf32> to vector<3x8x16xbf16>
    %cst_102 = arith.constant dense<0.000000e+00> : vector<3x8x8xf32>
    %341 = tpu.matmul %338, %340, %cst_102 {dimension_numbers = #tpu.dot_dimension_numbers<[2], [2], [1], [1], [0, 0, 0, 1, 1, 1], [0], [0]>} : vector<3x8x16xbf16>, vector<3x8x16xbf16>, vector<3x8x8xf32> -> vector<3x8x8xf32>
    %cst_103 = arith.constant dense<0xFF800000> : vector<3x8xf32>
    %342 = vector.multi_reduction <maximumf>, %341, %cst_103 [2] : vector<3x8x8xf32> to vector<3x8xf32>
    %343 = vector.shape_cast %342 : vector<3x8xf32> to vector<3x8x1xf32>
    %344 = vector.broadcast %343 : vector<3x8x1xf32> to vector<3x8x8xf32>
    %345 = arith.subf %341, %344 : vector<3x8x8xf32>
    %346 = math.exp %345 : vector<3x8x8xf32>
    %cst_104 = arith.constant dense<0.000000e+00> : vector<3x8xf32>
    %347 = vector.multi_reduction <add>, %346, %cst_104 [2] : vector<3x8x8xf32> to vector<3x8xf32>
    %348 = vector.shape_cast %347 : vector<3x8xf32> to vector<3x8x1xf32>
    %349 = tpu.reciprocal %348 {approx = true} : vector<3x8x1xf32> -> vector<3x8x1xf32>
    %350 = vector.broadcast %349 : vector<3x8x1xf32> to vector<3x8x8xf32>
    %351 = arith.mulf %346, %350 : vector<3x8x8xf32>
    %352 = arith.truncf %351 : vector<3x8x8xf32> to vector<3x8x8xbf16>
    %353 = vector.extract_strided_slice %336 {offsets = [0, 0, 0], sizes = [3, 8, 16], strides = [1, 1, 1]} : vector<3x8x64xf32> to vector<3x8x16xf32>
    %354 = arith.truncf %353 : vector<3x8x16xf32> to vector<3x8x16xbf16>
    %cst_105 = arith.constant dense<0.000000e+00> : vector<3x8x16xf32>
    %355 = tpu.matmul %352, %354, %cst_105 {dimension_numbers = #tpu.dot_dimension_numbers<[2], [1], [1], [2], [0, 0, 0, 1, 1, 2], [0], [0]>} : vector<3x8x8xbf16>, vector<3x8x16xbf16>, vector<3x8x16xf32> -> vector<3x8x16xf32>
    %356 = vector.shape_cast %355 : vector<3x8x16xf32> to vector<24x16xf32>
    %357 = arith.truncf %356 : vector<24x16xf32> to vector<24x16xbf16>
    %c0_106 = arith.constant 0 : index
    %c0_107 = arith.constant 0 : index
    %358 = vector.load %arg10[%c0_106, %c0_107] : memref<24x64xbf16, #tpu.memory_space<vmem>>, vector<24x16xbf16>
    tpu.vector_store %arg10[%c0_106, %c0_107], %357 {strides = array<i32>} : memref<24x64xbf16, #tpu.memory_space<vmem>>, vector<24x16xbf16>,
    %359 = vector.extract_strided_slice %334 {offsets = [0, 0, 16], sizes = [3, 8, 16], strides = [1, 1, 1]} : vector<3x8x64xf32> to vector<3x8x16xf32>
    %360 = arith.truncf %359 : vector<3x8x16xf32> to vector<3x8x16xbf16>
    %361 = vector.extract_strided_slice %335 {offsets = [0, 0, 16], sizes = [3, 8, 16], strides = [1, 1, 1]} : vector<3x8x64xf32> to vector<3x8x16xf32>
    %362 = arith.truncf %361 : vector<3x8x16xf32> to vector<3x8x16xbf16>
    %cst_108 = arith.constant dense<0.000000e+00> : vector<3x8x8xf32>
    %363 = tpu.matmul %360, %362, %cst_108 {dimension_numbers = #tpu.dot_dimension_numbers<[2], [2], [1], [1], [0, 0, 0, 1, 1, 1], [0], [0]>} : vector<3x8x16xbf16>, vector<3x8x16xbf16>, vector<3x8x8xf32> -> vector<3x8x8xf32>
    %cst_109 = arith.constant dense<0xFF800000> : vector<3x8xf32>
    %364 = vector.multi_reduction <maximumf>, %363, %cst_109 [2] : vector<3x8x8xf32> to vector<3x8xf32>
    %365 = vector.shape_cast %364 : vector<3x8xf32> to vector<3x8x1xf32>
    %366 = vector.broadcast %365 : vector<3x8x1xf32> to vector<3x8x8xf32>
    %367 = arith.subf %363, %366 : vector<3x8x8xf32>
    %368 = math.exp %367 : vector<3x8x8xf32>
    %cst_110 = arith.constant dense<0.000000e+00> : vector<3x8xf32>
    %369 = vector.multi_reduction <add>, %368, %cst_110 [2] : vector<3x8x8xf32> to vector<3x8xf32>
    %370 = vector.shape_cast %369 : vector<3x8xf32> to vector<3x8x1xf32>
    %371 = tpu.reciprocal %370 {approx = true} : vector<3x8x1xf32> -> vector<3x8x1xf32>
    %372 = vector.broadcast %371 : vector<3x8x1xf32> to vector<3x8x8xf32>
    %373 = arith.mulf %368, %372 : vector<3x8x8xf32>
    %374 = arith.truncf %373 : vector<3x8x8xf32> to vector<3x8x8xbf16>
    %375 = vector.extract_strided_slice %336 {offsets = [0, 0, 16], sizes = [3, 8, 16], strides = [1, 1, 1]} : vector<3x8x64xf32> to vector<3x8x16xf32>
    %376 = arith.truncf %375 : vector<3x8x16xf32> to vector<3x8x16xbf16>
    %cst_111 = arith.constant dense<0.000000e+00> : vector<3x8x16xf32>
    %377 = tpu.matmul %374, %376, %cst_111 {dimension_numbers = #tpu.dot_dimension_numbers<[2], [1], [1], [2], [0, 0, 0, 1, 1, 2], [0], [0]>} : vector<3x8x8xbf16>, vector<3x8x16xbf16>, vector<3x8x16xf32> -> vector<3x8x16xf32>
    %378 = vector.shape_cast %377 : vector<3x8x16xf32> to vector<24x16xf32>
    %379 = arith.truncf %378 : vector<24x16xf32> to vector<24x16xbf16>
    %c0_112 = arith.constant 0 : index
    %c16_113 = arith.constant 16 : index
    %380 = vector.load %arg10[%c0_112, %c16_113] : memref<24x64xbf16, #tpu.memory_space<vmem>>, vector<24x16xbf16>
    tpu.vector_store %arg10[%c0_112, %c16_113], %379 {strides = array<i32>} : memref<24x64xbf16, #tpu.memory_space<vmem>>, vector<24x16xbf16>,
    %381 = vector.extract_strided_slice %334 {offsets = [0, 0, 32], sizes = [3, 8, 16], strides = [1, 1, 1]} : vector<3x8x64xf32> to vector<3x8x16xf32>
    %382 = arith.truncf %381 : vector<3x8x16xf32> to vector<3x8x16xbf16>
    %383 = vector.extract_strided_slice %335 {offsets = [0, 0, 32], sizes = [3, 8, 16], strides = [1, 1, 1]} : vector<3x8x64xf32> to vector<3x8x16xf32>
    %384 = arith.truncf %383 : vector<3x8x16xf32> to vector<3x8x16xbf16>
    %cst_114 = arith.constant dense<0.000000e+00> : vector<3x8x8xf32>
    %385 = tpu.matmul %382, %384, %cst_114 {dimension_numbers = #tpu.dot_dimension_numbers<[2], [2], [1], [1], [0, 0, 0, 1, 1, 1], [0], [0]>} : vector<3x8x16xbf16>, vector<3x8x16xbf16>, vector<3x8x8xf32> -> vector<3x8x8xf32>
    %cst_115 = arith.constant dense<0xFF800000> : vector<3x8xf32>
    %386 = vector.multi_reduction <maximumf>, %385, %cst_115 [2] : vector<3x8x8xf32> to vector<3x8xf32>
    %387 = vector.shape_cast %386 : vector<3x8xf32> to vector<3x8x1xf32>
    %388 = vector.broadcast %387 : vector<3x8x1xf32> to vector<3x8x8xf32>
    %389 = arith.subf %385, %388 : vector<3x8x8xf32>
    %390 = math.exp %389 : vector<3x8x8xf32>
    %cst_116 = arith.constant dense<0.000000e+00> : vector<3x8xf32>
    %391 = vector.multi_reduction <add>, %390, %cst_116 [2] : vector<3x8x8xf32> to vector<3x8xf32>
    %392 = vector.shape_cast %391 : vector<3x8xf32> to vector<3x8x1xf32>
    %393 = tpu.reciprocal %392 {approx = true} : vector<3x8x1xf32> -> vector<3x8x1xf32>
    %394 = vector.broadcast %393 : vector<3x8x1xf32> to vector<3x8x8xf32>
    %395 = arith.mulf %390, %394 : vector<3x8x8xf32>
    %396 = arith.truncf %395 : vector<3x8x8xf32> to vector<3x8x8xbf16>
    %397 = vector.extract_strided_slice %336 {offsets = [0, 0, 32], sizes = [3, 8, 16], strides = [1, 1, 1]} : vector<3x8x64xf32> to vector<3x8x16xf32>
    %398 = arith.truncf %397 : vector<3x8x16xf32> to vector<3x8x16xbf16>
    %cst_117 = arith.constant dense<0.000000e+00> : vector<3x8x16xf32>
    %399 = tpu.matmul %396, %398, %cst_117 {dimension_numbers = #tpu.dot_dimension_numbers<[2], [1], [1], [2], [0, 0, 0, 1, 1, 2], [0], [0]>} : vector<3x8x8xbf16>, vector<3x8x16xbf16>, vector<3x8x16xf32> -> vector<3x8x16xf32>
    %400 = vector.shape_cast %399 : vector<3x8x16xf32> to vector<24x16xf32>
    %401 = arith.truncf %400 : vector<24x16xf32> to vector<24x16xbf16>
    %c0_118 = arith.constant 0 : index
    %c32_119 = arith.constant 32 : index
    %402 = vector.load %arg10[%c0_118, %c32_119] : memref<24x64xbf16, #tpu.memory_space<vmem>>, vector<24x16xbf16>
    tpu.vector_store %arg10[%c0_118, %c32_119], %401 {strides = array<i32>} : memref<24x64xbf16, #tpu.memory_space<vmem>>, vector<24x16xbf16>,
    %403 = vector.extract_strided_slice %334 {offsets = [0, 0, 48], sizes = [3, 8, 16], strides = [1, 1, 1]} : vector<3x8x64xf32> to vector<3x8x16xf32>
    %404 = arith.truncf %403 : vector<3x8x16xf32> to vector<3x8x16xbf16>
    %405 = vector.extract_strided_slice %335 {offsets = [0, 0, 48], sizes = [3, 8, 16], strides = [1, 1, 1]} : vector<3x8x64xf32> to vector<3x8x16xf32>
    %406 = arith.truncf %405 : vector<3x8x16xf32> to vector<3x8x16xbf16>
    %cst_120 = arith.constant dense<0.000000e+00> : vector<3x8x8xf32>
    %407 = tpu.matmul %404, %406, %cst_120 {dimension_numbers = #tpu.dot_dimension_numbers<[2], [2], [1], [1], [0, 0, 0, 1, 1, 1], [0], [0]>} : vector<3x8x16xbf16>, vector<3x8x16xbf16>, vector<3x8x8xf32> -> vector<3x8x8xf32>
    %cst_121 = arith.constant dense<0xFF800000> : vector<3x8xf32>
    %408 = vector.multi_reduction <maximumf>, %407, %cst_121 [2] : vector<3x8x8xf32> to vector<3x8xf32>
    %409 = vector.shape_cast %408 : vector<3x8xf32> to vector<3x8x1xf32>
    %410 = vector.broadcast %409 : vector<3x8x1xf32> to vector<3x8x8xf32>
    %411 = arith.subf %407, %410 : vector<3x8x8xf32>
    %412 = math.exp %411 : vector<3x8x8xf32>
    %cst_122 = arith.constant dense<0.000000e+00> : vector<3x8xf32>
    %413 = vector.multi_reduction <add>, %412, %cst_122 [2] : vector<3x8x8xf32> to vector<3x8xf32>
    %414 = vector.shape_cast %413 : vector<3x8xf32> to vector<3x8x1xf32>
    %415 = tpu.reciprocal %414 {approx = true} : vector<3x8x1xf32> -> vector<3x8x1xf32>
    %416 = vector.broadcast %415 : vector<3x8x1xf32> to vector<3x8x8xf32>
    %417 = arith.mulf %412, %416 : vector<3x8x8xf32>
    %418 = arith.truncf %417 : vector<3x8x8xf32> to vector<3x8x8xbf16>
    %419 = vector.extract_strided_slice %336 {offsets = [0, 0, 48], sizes = [3, 8, 16], strides = [1, 1, 1]} : vector<3x8x64xf32> to vector<3x8x16xf32>
    %420 = arith.truncf %419 : vector<3x8x16xf32> to vector<3x8x16xbf16>
    %cst_123 = arith.constant dense<0.000000e+00> : vector<3x8x16xf32>
    %421 = tpu.matmul %418, %420, %cst_123 {dimension_numbers = #tpu.dot_dimension_numbers<[2], [1], [1], [2], [0, 0, 0, 1, 1, 2], [0], [0]>} : vector<3x8x8xbf16>, vector<3x8x16xbf16>, vector<3x8x16xf32> -> vector<3x8x16xf32>
    %422 = vector.shape_cast %421 : vector<3x8x16xf32> to vector<24x16xf32>
    %423 = arith.truncf %422 : vector<24x16xf32> to vector<24x16xbf16>
    %c0_124 = arith.constant 0 : index
    %c48_125 = arith.constant 48 : index
    %424 = vector.load %arg10[%c0_124, %c48_125] : memref<24x64xbf16, #tpu.memory_space<vmem>>, vector<24x16xbf16>
    tpu.vector_store %arg10[%c0_124, %c48_125], %423 {strides = array<i32>} : memref<24x64xbf16, #tpu.memory_space<vmem>>, vector<24x16xbf16>,
    %c0_126 = arith.constant 0 : index
    %c0_127 = arith.constant 0 : index
    %425 = vector.load %arg10[%c0_126, %c0_127] : memref<24x64xbf16, #tpu.memory_space<vmem>>, vector<24x64xbf16>
    %c0_128 = arith.constant 0 : index
    %c320 = arith.constant 320 : index
    %426 = vector.load %arg5[%c0_128, %c320] : memref<64x512xbf16, #tpu.memory_space<vmem>>, vector<64x64xbf16>
    %cst_129 = arith.constant dense<0.000000e+00> : vector<24x64xf32>
    %427 = tpu.matmul %425, %426, %cst_129 {dimension_numbers = #tpu.dot_dimension_numbers<[1], [0], [0], [1], [0, 0, 1, 1], [], []>} : vector<24x64xbf16>, vector<64x64xbf16>, vector<24x64xf32> -> vector<24x64xf32>
    %428 = arith.addf %320, %427 : vector<24x64xf32>
    %c0_130 = arith.constant 0 : index
    %c384_131 = arith.constant 384 : index
    %429 = vector.load %arg5[%c0_130, %c384_131] : memref<64x512xbf16, #tpu.memory_space<vmem>>, vector<64x128xbf16>
    %430 = arith.truncf %428 : vector<24x64xf32> to vector<24x64xbf16>
    %cst_132 = arith.constant dense<0.000000e+00> : vector<24x128xf32>
    %431 = tpu.matmul %430, %429, %cst_132 {dimension_numbers = #tpu.dot_dimension_numbers<[1], [0], [0], [1], [0, 0, 1, 1], [], []>} : vector<24x64xbf16>, vector<64x128xbf16>, vector<24x128xf32> -> vector<24x128xf32>
    %c0_133 = arith.constant 0 : index
    %c0_134 = arith.constant 0 : index
    %432 = vector.load %arg6[%c0_133, %c0_134] : memref<1x128xf32, #tpu.memory_space<vmem>>, vector<1x128xf32>
    %433 = vector.broadcast %432 : vector<1x128xf32> to vector<24x128xf32>
    %434 = arith.addf %431, %433 : vector<24x128xf32>
    %435 = tpu.iota {dimensions = array<i32: 1>} : vector<24x128xi32>
    %c0_135 = arith.constant 0 : index
    %c0_136 = arith.constant 0 : index
    %c0_137 = arith.constant 0 : index
    %436 = vector.load %arg3[%c0_135, %c0_136, %c0_137] : memref<1x24x1xi32, #tpu.memory_space<vmem>>, vector<1x24x1xi32>
    %437 = vector.shape_cast %436 : vector<1x24x1xi32> to vector<24x1xi32>
    %cst_138 = arith.constant dense<0xFF800000> : vector<24xf32>
    %438 = vector.multi_reduction <maximumf>, %434, %cst_138 [1] : vector<24x128xf32> to vector<24xf32>
    %439 = vector.shape_cast %438 : vector<24xf32> to vector<24x1xf32>
    %440 = vector.broadcast %439 : vector<24x1xf32> to vector<24x128xf32>
    %441 = arith.subf %434, %440 : vector<24x128xf32>
    %442 = math.exp %441 : vector<24x128xf32>
    %cst_139 = arith.constant dense<0.000000e+00> : vector<24xf32>
    %443 = vector.multi_reduction <add>, %442, %cst_139 [1] : vector<24x128xf32> to vector<24xf32>
    %444 = vector.shape_cast %443 : vector<24xf32> to vector<24x1xf32>
    %445 = math.log %444 : vector<24x1xf32>
    %446 = arith.addf %439, %445 : vector<24x1xf32>
    %447 = vector.broadcast %437 : vector<24x1xi32> to vector<24x128xi32>
    %448 = arith.cmpi eq, %435, %447 : vector<24x128xi32>
    %cst_140 = arith.constant 0.000000e+00 : f32
    %449 = vector.broadcast %cst_140 : f32 to vector<24x128xf32>
    %450 = arith.select %448, %434, %449 : vector<24x128xi1>, vector<24x128xf32>
    %cst_141 = arith.constant dense<0.000000e+00> : vector<24xf32>
    %451 = vector.multi_reduction <add>, %450, %cst_141 [1] : vector<24x128xf32> to vector<24xf32>
    %452 = vector.shape_cast %451 : vector<24xf32> to vector<24x1xf32>
    %c0_i32 = arith.constant 0 : i32
    %453 = vector.broadcast %c0_i32 : i32 to vector<24x1xi32>
    %454 = arith.cmpi ne, %437, %453 : vector<24x1xi32>
    %455 = arith.subf %446, %452 : vector<24x1xf32>
    %cst_142 = arith.constant 0.000000e+00 : f32
    %456 = vector.broadcast %cst_142 : f32 to vector<24x1xf32>
    %457 = arith.select %454, %455, %456 : vector<24x1xi1>, vector<24x1xf32>
    %458 = vector.broadcast %439 : vector<24x1xf32> to vector<24x128xf32>
    %459 = arith.cmpf oge, %434, %458 : vector<24x128xf32>
    %460 = arith.sitofp %435 : vector<24x128xi32> to vector<24x128xf32>
    %cst_143 = arith.constant 1.280000e+02 : f32
    %461 = vector.broadcast %cst_143 : f32 to vector<24x128xf32>
    %462 = arith.select %459, %460, %461 : vector<24x128xi1>, vector<24x128xf32>
    %cst_144 = arith.constant dense<0x7F800000> : vector<24xf32>
    %463 = vector.multi_reduction <minimumf>, %462, %cst_144 [1] : vector<24x128xf32> to vector<24xf32>
    %464 = vector.shape_cast %463 : vector<24xf32> to vector<24x1xf32>
    %c16_i32 = arith.constant 16 : i32
    %465 = vector.broadcast %c16_i32 : i32 to vector<24x128xi32>
    %466 = arith.cmpi eq, %435, %465 : vector<24x128xi32>
    %467 = vector.shape_cast %457 : vector<24x1xf32> to vector<24x1xf32>
    %468 = vector.broadcast %467 : vector<24x1xf32> to vector<24x128xf32>
    %469 = arith.select %466, %468, %434 : vector<24x128xi1>, vector<24x128xf32>
    %c17_i32 = arith.constant 17 : i32
    %470 = vector.broadcast %c17_i32 : i32 to vector<24x128xi32>
    %471 = arith.cmpi eq, %435, %470 : vector<24x128xi32>
    %472 = vector.shape_cast %464 : vector<24x1xf32> to vector<24x1xf32>
    %473 = vector.broadcast %472 : vector<24x1xf32> to vector<24x128xf32>
    %474 = arith.select %471, %473, %469 : vector<24x128xi1>, vector<24x128xf32>
    %c0_145 = arith.constant 0 : index
    %c0_146 = arith.constant 0 : index
    %c0_147 = arith.constant 0 : index
    %475 = vector.load %arg7[%c0_145, %c0_146, %c0_147] : memref<1x24x128xf32, #tpu.memory_space<vmem>>, vector<1x24x128xf32>
    %476 = vector.shape_cast %475 : vector<1x24x128xf32> to vector<24x128xf32>
    %477 = vector.shape_cast %474 : vector<24x128xf32> to vector<1x24x128xf32>
    tpu.vector_store %arg7[%c0_145, %c0_146, %c0_147], %477 {strides = array<i32>} : memref<1x24x128xf32, #tpu.memory_space<vmem>>, vector<1x24x128xf32>,
    return
  }
  func.func @transform_0(%arg0: i32) -> (i32, i32, i32) {
    %c0_i32 = arith.constant 0 : i32
    %c0_i32_0 = arith.constant 0 : i32
    %c0_i32_1 = arith.constant 0 : i32
    return %arg0, %c0_i32, %c0_i32_0 : i32, i32, i32
  }
  func.func @transform_1(%arg0: i32) -> (i32, i32, i32) {
    %c0_i32 = arith.constant 0 : i32
    %c0_i32_0 = arith.constant 0 : i32
    %c0_i32_1 = arith.constant 0 : i32
    return %arg0, %c0_i32, %c0_i32_0 : i32, i32, i32
  }
  func.func @transform_2(%arg0: i32) -> (i32, i32, i32) {
    %c0_i32 = arith.constant 0 : i32
    %c0_i32_0 = arith.constant 0 : i32
    %c0_i32_1 = arith.constant 0 : i32
    return %arg0, %c0_i32, %c0_i32_0 : i32, i32, i32
  }
  func.func @transform_3(%arg0: i32) -> (i32, i32) {
    %c0_i32 = arith.constant 0 : i32
    %c0_i32_0 = arith.constant 0 : i32
    %c0_i32_1 = arith.constant 0 : i32
    return %c0_i32, %c0_i32_0 : i32, i32
  }
  func.func @transform_4(%arg0: i32) -> (i32, i32) {
    %c0_i32 = arith.constant 0 : i32
    %c0_i32_0 = arith.constant 0 : i32
    %c0_i32_1 = arith.constant 0 : i32
    return %c0_i32, %c0_i32_0 : i32, i32
  }
  func.func @transform_5(%arg0: i32) -> (i32, i32) {
    %c0_i32 = arith.constant 0 : i32
    %c0_i32_0 = arith.constant 0 : i32
    %c0_i32_1 = arith.constant 0 : i32
    return %c0_i32, %c0_i32_0 : i32, i32
  }
  func.func @transform_6(%arg0: i32) -> (i32, i32, i32) {
    %c0_i32 = arith.constant 0 : i32
    %c0_i32_0 = arith.constant 0 : i32
    %c0_i32_1 = arith.constant 0 : i32
    return %arg0, %c0_i32, %c0_i32_0 : i32, i32, i32
  }
}

</mosaic_0001>

<bundles_post_ra>
// kernel: squeeze.2
= control target key start
LH: loop header
LB: loop body
LE: loop exit
PB: predicated region body
PF: predicated region fallthrough
CT: control target
= control target key end

     0   :  { %s85_s0 = inlined_call_operand.vmem [shape: f32[2,24], index: 0, kind: input, shape index: {}]   ;;  %s86_s1 = inlined_call_operand.hbm [shape: f32[48], index: 1, kind: output, shape index: {}]  }
   0x1   :  { %v5_v0 = vld [vmem:[%s85_s0] sm:$0x3] }
   0x2   :  { %6 = vst [vmem:[#allocation3] sm:$0x3] %v5_v0 }
   0x3   :  { %2 = vsyncpa [#allocation1], 0  ;;  %vm8_vm0 = vcmask 195584   ;;  %s58_s0 = smov 24   ;;  %vm14_vm1 = vcmask 392384   ;;  %s59_s8 = smov [#allocation0]  }
   0x4   :  { %s26_s9 = sshll.u32 %s59_s8, 4  ;;  %s27_s9 = int_to_ptr.vmem [resolvable:$true] %s26_s9 }
   0x5   :  { %s34_s10 = scalar_lea.vmem %s27_s9, 16  ;;  %s38_s11 = scalar_lea.vmem %s27_s9, 32 }
   0x6   :  { %p35_p0 = scmp.ne.s32.totalorder %s27_s9, %s34_s10  ;;  %p39_p1 = scmp.lt.s32.totalorder %s27_s9, %s27_s9 }
   0x7   :  { %p40_p2 = scmp.lt.s32.totalorder %s38_s11, %s34_s10 }
   0x9   :  { %v11_v1 = vld [vmem:[#allocation3 + $0x1] sm:$0x1]   ;;  %v7_v2 = vld [vmem:[#allocation3] sm:$0x1]   ;;  %p41_p3 = por %p40_p2, %p39_p1 }
   0xa   :  { %12 = vrot.lane.b32.xlu0 %v11_v1, %s58_s0  ;;  %9 = vst.msk [vmem:[#allocation2] sm:$0x1] %vm8_vm0, %v7_v2  }
   0xb   :  { %p42_p4 = pnand %p41_p3, %p35_p0 }
  0x7c   :  { %v13_v3 = vpop.permute.xlu0 %12  }
  0x7d   :  { %15 = vst.msk [vmem:[#allocation2] sm:$0x1] %vm14_vm1, %v13_v3  }
  0x84   :  { %v19_v4 = vld [vmem:[#allocation2] sm:$0x1] }
  0x85   :  { %21 = vst [vmem:[#allocation0] sm:$0x1] %v19_v4 }
  0x86   :  { %45 = shalt.err (!%p42_p4)
}
  0x87   :  { %s46_s14 = scalar_lea.hbm %s86_s1, 16 }
  0x88   :  { %p47_p5 = scmp.ne.s32.totalorder %s86_s1, %s46_s14  ;;  %p50_p6 = scmp.lt.u32.totalorder %s46_s14, %s86_s1 }
  0x8a   :  { %p52_p7 = pnand %p50_p6, %p47_p5 }
  0x8c   :  { %55 = shalt.err (!%p52_p7)
}
  0x8d   :  { %29 = dma.vmem_to_hbm [thread:$0]  %s27_s9, 16, %s86_s1, [#allocation1]  }
  0x8e   :  { %56 = dma.done.wait [#allocation1], 16  }
  0x8f   :  { %57 = vsyncadd [#allocation1], 4294967280 }
  0x90   :  { %31 = vsyncpa [#allocation1], 1 }

// kernel: _morse_device_forward.1
= control target key start
LH: loop header
LB: loop body
LE: loop exit
PB: predicated region body
PF: predicated region fallthrough
CT: control target
= control target key end

     0   :  { %s7586_s21 = smov 0   ;;  %s8766_s0 = inlined_call_operand.vmem [shape: bf16[2,24,32], index: 0, kind: input, shape index: {}]   ;;  %s8767_s1 = inlined_call_operand.vmem [shape: bf16[2,24,64], index: 1, kind: input, shape index: {}]   ;;  %s8768_s2 = inlined_call_operand.vmem [shape: s32[2,24,1], index: 2, kind: input, shape index: {}]   ;;  %s8769_s3 = inlined_call_operand.vmem [shape: bf16[32,512], index: 3, kind: input, shape index: {}]   ;;  %s8770_s4 = inlined_call_operand.vmem [shape: bf16[64,512], index: 4, kind: input, shape index: {}]   ;;  %s8771_s5 = inlined_call_operand.vmem [shape: f32[1,128], index: 5, kind: input, shape index: {}]   ;;  %s8772_s6 = inlined_call_operand.vmem [shape: f32[2,24,128], index: 6, kind: output, shape index: {}]  }
   0x1 LB: > { %s6250_s22 = sadd.s32 4294967295, %s7527_s21   ;;  %p6254_p0 = scmp.ge.s32.totalorder %s7527_s21, 1  ;;  %s7527_s21 = sphi %s7586_s21, %s16_s21  }
   0x2   : > { %p232_p1 = scmp.lt.s32.totalorder %s7527_s21, 3 }
   0x4   : > { %p233_p2 = pnand %p6254_p0, %p232_p1 }
   0x5   : > { %v7294_v0 = vld [vmem:[%s8769_s3] ss:$16 sps:$4 sm:$0xff] (!%p233_p2)   ;;  %p272_p3 = scmp.lt.s32.totalorder (!%p233_p2), %s6250_s22, 1  ;;  %vm323_vm0 = vcmask (!%p233_p2), 261120   ;;  %v7529_v5 = vmov (!%p233_p2), 0.0   ;;  %vm7530_vm1 = vmmov (!%p233_p2), 0  }
   0x6   : > { %236 = sbr.rel (%p233_p2) target bundleno = 10933 (0x2ab5), region = 44  ;;  %v7295_v1 = vld [vmem:[%s8769_s3 + $0x20] ss:$16 sps:$4 sm:$0xff] (!%p233_p2)   ;;  %6684 = vmatprep.subr.bf16.mxu0 (!%p233_p2), %v7294_v0  ;;  %6692 = vmatprep.subr.bf16.mxu1 (!%p233_p2), %v7529_v5  ;;  %s7531_s7 = smov (!%p233_p2), 96   ;;  %vm384_vm2 = vcmask (!%p233_p2), 64512   ;;  %vm570_vm3 = vcmask (!%p233_p2), 1043456  }
   0x7   : > { %6685 = vmatpush3.bf16.msra.mxu0 (!%p233_p2), %v7294_v0  ;;  %6694 = vmatprep.mubr.msk.bf16.mxu1 (!%p233_p2), %vm7530_vm1, %v7529_v5  ;;  %s7532_s8 = smov (!%p233_p2), 64   ;;  %s7533_s9 = smov (!%p233_p2), 88   ;;  %vm723_vm4 = vcmask (!%p233_p2), 60416   ;;  %vm1076_vm5 = vcmask (!%p233_p2), 126016   ;;  %vm1429_vm6 = vcmask (!%p233_p2), 191616   ;;  %vm1782_vm7 = vcmask (!%p233_p2), 257216  }
   0x8   : > { %6686 = vmatprep.subr.bf16.mxu0 (!%p233_p2), %v7295_v1  ;;  %s7534_s10 = smov (!%p233_p2), 120   ;;  %s7535_s11 = smov (!%p233_p2), 56   ;;  %vm1911_vm8 = vcmask (!%p233_p2), 1041409   ;;  %vm1913_vm9 = vcmask (!%p233_p2), 1042434   ;;  %vm2021_vm10 = vcmask (!%p233_p2), 18432   ;;  %vm2040_vm11 = vcmask (!%p233_p2), 1040384  }
   0x9   : > { %s7536_s12 = smov (!%p233_p2), 80   ;;  %s7537_s13 = smov (!%p233_p2), 112   ;;  %vm2041_vm12 = vcmask (!%p233_p2), 1041408   ;;  %vm2036_vm13 = vcmask (!%p233_p2), 23552   ;;  %vm2616_vm14 = vcmask (!%p233_p2), 523264   ;;  %vm2088_vm15 = vcmask (!%p233_p2), 58368  }
   0xa   : > { %s7538_s14 = smov (!%p233_p2), 48   ;;  %s7539_s15 = smov (!%p233_p2), 72  }
   0xb   : > { %6687 = vmatpush3.bf16.msra.mxu0 (!%p233_p2), %v7295_v1  ;;  %s7540_s16 = smov (!%p233_p2), 104   ;;  %s7541_s17 = smov (!%p233_p2), 40  }
   0xc   : > { %6698 = vmatprep.subr.bf16.mxu0 (!%p233_p2), %v7529_v5  ;;  %s7542_s18 = smov (!%p233_p2), 8   ;;  %s7543_s19 = smov (!%p233_p2), 16  }
   0xd   : > { %s8774_s22 = smov (!%p272_p3, %s6250_s22), 1  ;;  %s7544_s20 = smov 24  }
   0xe   : > { %s7260_s27 = smul.u32 12, %s8774_s22  ;;  %s7545_s25 = smov 32  }
  0x10   : > { %s7608_s30 = scalar_lea.vmem %s8766_s0, %s7260_s27 }
  0x11   : > { %v293_v2 = vld [vmem:[%s7608_s30] sm:$0xff]   ;;  %v295_v3 = vld [vmem:[%s7608_s30 + $0x8] sm:$0xf] }
  0x12   : > { %v6260_v4 = vcombine.low %v295_v3, %v295_v3  ;;  %6688 = vmatprep.mubr.msk.bf16.mxu0 %vm323_vm0, %v293_v2 }
  0x14   : > { %6689 = vmatmul.mubr.msk.bf16.vlgmr.msra.gmra.mrb[0].mxu0 %vm323_vm0, %v6260_v4 }
  0x15   : > { %6700 = vmatprep.mubr.msk.bf16.mxu0 %vm7530_vm1, %v7529_v5 }
  0xe7   : > { %v6690_v6 = vpop.f32.mrb[0].mxu0 }
  0xe8   : > { %v7620_v7 = vpack.c.bf16 %v6690_v6, %v6690_v6  ;;  %v364_v8 = vpop.f32.mrb[1].mxu0 }
  0xe9   : > { %v7622_v9 = vpack.c.bf16 %v364_v8, %v364_v8  ;;  %v6691_v10 = vpop.f32.mrb[2].mxu0 }
  0xea   : > { %481 = vrot.lane.b32.xlu1 %v7620_v7, %s7531_s7  ;;  %v367_v11 = vpop.f32.mrb[3].mxu0 }
  0xeb   : > { %382 = vrot.lane.b32.xlu0 %v7622_v9, %s7531_s7  ;;  %v7628_v12 = vpack.c.bf16 %v367_v11, %v367_v11 }
  0xef   : > { %432 = vrot.lane.b32.xlu0 %v7628_v12, %s7531_s7 }
 0x15c   : > { %v482_v17 = vpop.permute.xlu1 %481 }
 0x15d   : > { %v383_v13 = vpop.permute.xlu0 %382  ;;  %v487_v18 = vsel %vm384_vm2, %v482_v17, 0 }
 0x15e   : > { %v389_v14 = vsel %vm384_vm2, %v383_v13, 0 }
 0x15f   : > { %6693 = vmatpush3.bf16.xpose.msra.mxu1 %v389_v14 }
 0x160   : > { %6704 = vmatprep.subr.bf16.mxu1 %v7529_v5 }
 0x161   : > { %v433_v15 = vpop.permute.xlu0 %432 }
 0x162   : > { %v438_v16 = vsel %vm384_vm2, %v433_v15, 0 }
 0x163   : > { %6699 = vmatpush3.bf16.xpose.msra.mxu0 %v438_v16 }
 0x164   : > { %6710 = vmatprep.subr.bf16.mxu0 %v7529_v5 }
 0x166   : > { %6695 = vmatmul.mubr.msk.bf16.vlgmr.msra.gmra.mrb[0].mxu1 %vm384_vm2, %v7622_v9 }
 0x167   : > { %6705 = vmatpush3.bf16.xpose.msra.mxu1 %v487_v18  ;;  %6706 = vmatprep.mubr.msk.bf16.mxu1 %vm7530_vm1, %v7529_v5 }
 0x168   : > { %6716 = vmatprep.subr.bf16.mxu1 %v7529_v5 }
 0x16a   : > { %6701 = vmatmul.mubr.msk.bf16.vlgmr.msra.gmra.mrb[4].mxu0 %vm384_vm2, %v7628_v12 }
 0x16b   : > { %6712 = vmatprep.mubr.msk.bf16.mxu0 %vm7530_vm1, %v7529_v5 }
 0x16e   : > { %6707 = vmatmul.mubr.msk.bf16.vlgmr.msra.gmra.mrb[4].mxu1 %vm384_vm2, %v7620_v7 }
 0x16f   : > { %6718 = vmatprep.mubr.msk.bf16.mxu1 %vm7530_vm1, %v7529_v5 }
 0x239   : > { %v425_v19 = vpop.f32.mrb[0].mxu1 }
 0x23a   : > { %v6696_v20 = vpop.f32.mrb[1].mxu1  ;;  %v529_v21 = vsel %vm384_vm2, %v425_v19, -inf }
 0x23b   : > { %530 = vmax.xlane.f32.xlu1 %v529_v21  ;;  %v428_v22 = vpop.f32.mrb[2].mxu1 }
 0x23c   : > { %v6697_v23 = vpop.f32.mrb[3].mxu1 }
 0x23d   : > { %v474_v24 = vpop.f32.mrb[4].mxu0 }
 0x23e   : > { %v6702_v25 = vpop.f32.mrb[5].mxu0  ;;  %v532_v26 = vsel %vm384_vm2, %v474_v24, -inf }
 0x23f   : > { %533 = vmax.xlane.f32.xlu0 %v532_v26  ;;  %v477_v27 = vpop.f32.mrb[6].mxu0 }
 0x240   : > { %v6703_v28 = vpop.f32.mrb[7].mxu0 }
 0x241   : > { %v523_v29 = vpop.f32.mrb[4].mxu1 }
 0x242   : > { %v6708_v30 = vpop.f32.mrb[5].mxu1  ;;  %v535_v31 = vsel %vm384_vm2, %v523_v29, -inf }
 0x243   : > { %v526_v32 = vpop.f32.mrb[6].mxu1  ;;  %536 = vmax.xlane.f32.xlu0 %v535_v31 }
 0x244   : > { %v6709_v33 = vpop.f32.mrb[7].mxu1 }
 0x24c   : > { %565 = vrot.lane.b32.xlu1 %v7622_v9, %s7532_s8 }
 0x250   : > { %662 = vrot.lane.b32.xlu1 %v7620_v7, %s7532_s8 }
 0x259   : > { %614 = vrot.lane.b32.xlu0 %v7628_v12, %s7532_s8 }
 0x2c8   : > { %v531_v34 = vpop.xlane.xlu1 %530 }
 0x2c9   : > { %v538_v35 = vsub.f32 %v425_v19, %v531_v34 }
 0x2cb   : > { %v541_v36 = vmul.f32 1.442695, %v538_v35 }
 0x2cc   : > { %v566_v37 = vpop.permute.xlu1 %565  ;;  %v534_v38 = vpop.xlane.xlu0 %533 }
 0x2cd   : > { %7345 = vpow2.f32 %v541_v36  ;;  %v572_v39 = vsel %vm570_vm3, %v566_v37, 0  ;;  %v539_v40 = vsub.f32 %v474_v24, %v534_v38 }
 0x2ce   : > { %6711 = vmatpush3.bf16.msra.mxu0 %v572_v39 }
 0x2cf   : > { %v543_v41 = vmul.f32 1.442695, %v539_v40  ;;  %6722 = vmatprep.subr.bf16.mxu0 %v7529_v5 }
 0x2d0   : > { %v537_v42 = vpop.xlane.xlu0 %536  ;;  %v663_v53 = vpop.permute.xlu1 %662 }
 0x2d1   : > { %7347 = vpow2.f32 %v543_v41  ;;  %v540_v49 = vsub.f32 %v523_v29, %v537_v42  ;;  %v668_v60 = vsel %vm570_vm3, %v663_v53, 0 }
 0x2d3   : > { %v545_v50 = vmul.f32 1.442695, %v540_v49 }
 0x2d4   : > { %v615_v43 = vpop.permute.xlu0 %614 }
 0x2d5   : > { %v620_v44 = vsel %vm570_vm3, %v615_v43, 0  ;;  %7349 = vpow2.f32 %v545_v50 }
 0x2d6   : > { %6717 = vmatpush3.bf16.msra.mxu1 %v620_v44 }
 0x2d7   : > { %v7346_v45 = vpop.eup %7345  ;;  %6728 = vmatprep.subr.bf16.mxu1 %v7529_v5 }
 0x2d8   : > { %v547_v46 = vsel %vm384_vm2, %v7346_v45, 0.0 }
 0x2d9   : > { %548 = vadd.xlane.f32.xlu1 %v547_v46 }
 0x2db   : > { %v7348_v47 = vpop.eup %7347 }
 0x2dc   : > { %v550_v48 = vsel %vm384_vm2, %v7348_v47, 0.0 }
 0x2dd   : > { %551 = vadd.xlane.f32.xlu0 %v550_v48 }
 0x2df   : > { %v7350_v51 = vpop.eup %7349 }
 0x2e0   : > { %v553_v52 = vsel %vm384_vm2, %v7350_v51, 0.0 }
 0x2ea   : > { %779 = vrot.lane.b32.xlu1 %v7628_v12, %s7533_s9 }
 0x2f3   : > { %729 = vrot.lane.b32.xlu0 %v7622_v9, %s7533_s9 }
 0x2f7   : > { %727 = vrot.lane.b32.xlu0 %v7622_v9, %s7534_s10 }
 0x2fb   : > { %777 = vrot.lane.b32.xlu0 %v7628_v12, %s7534_s10 }
 0x30e   : > { %554 = vadd.xlane.f32.xlu1 %v553_v52 }
 0x31f   : > { %829 = vrot.lane.b32.xlu1 %v7620_v7, %s7533_s9 }
 0x323   : > { %827 = vrot.lane.b32.xlu1 %v7620_v7, %s7534_s10 }
 0x366   : > { %v549_v54 = vpop.xlane.xlu1 %548 }
 0x367   : > { %7351 = vrcp.f32 %v549_v54 }
 0x36a   : > { %v552_v55 = vpop.xlane.xlu0 %551  ;;  %v780_v2 = vpop.permute.xlu1 %779 }
 0x36b   : > { %7353 = vrcp.f32 %v552_v55  ;;  %v785_v14 = vsel %vm384_vm2, %v780_v2, 0 }
 0x36e   : > { %v730_v62 = vpop.permute.xlu0 %729 }
 0x36f   : > { %v735_v0 = vsel %vm384_vm2, %v730_v62, 0 }
 0x371   : > { %v7352_v56 = vpop.eup %7351 }
 0x372   : > { %v559_v57 = vmul.f32 %v7352_v56, %v7346_v45  ;;  %v728_v1 = vpop.permute.xlu0 %727 }
 0x374   : > { %v562_v58 = vpack.c.bf16 %v559_v57, %v559_v57 }
 0x375   : > { %v7354_v59 = vpop.eup %7353 }
 0x376   : > { %6713 = vmatmul.mubr.msk.bf16.vlgmr.msra.gmra.mrb[8].mxu0 %vm384_vm2, %v562_v58  ;;  %v560_v61 = vmul.f32 %v7354_v59, %v7348_v47  ;;  %v778_v15 = vpop.permute.xlu0 %777 }
 0x377   : > { %6723 = vmatpush3.bf16.msra.mxu0 %v668_v60  ;;  %6724 = vmatprep.mubr.msk.bf16.mxu0 %vm7530_vm1, %v7529_v5 }
 0x378   : > { %v563_v63 = vpack.c.bf16 %v560_v61, %v560_v61  ;;  %6734 = vmatprep.subr.bf16.mxu0 %v7529_v5 }
 0x37a   : > { %6719 = vmatmul.mubr.msk.bf16.vlgmr.msra.gmra.mrb[8].mxu1 %vm384_vm2, %v563_v63 }
 0x37b   : > { %6729 = vmatpush3.bf16.xpose.msra.mxu1 %v735_v0  ;;  %6730 = vmatprep.mubr.msk.bf16.mxu1 %vm7530_vm1, %v7529_v5 }
 0x37c   : > { %6740 = vmatprep.subr.bf16.mxu1 %v7529_v5 }
 0x382   : > { %6731 = vmatmul.mubr.msk.bf16.vlgmr.msra.gmra.mrb[12].mxu1 %vm384_vm2, %v728_v1 }
 0x383   : > { %6742 = vmatprep.mubr.msk.bf16.mxu1 %vm7530_vm1, %v7529_v5 }
 0x39b   : > { %v555_v3 = vpop.xlane.xlu1 %554 }
 0x39c   : > { %7355 = vrcp.f32 %v555_v3 }
 0x39f   : > { %v830_v4 = vpop.permute.xlu1 %829 }
 0x3a0   : > { %v835_v6 = vsel %vm384_vm2, %v830_v4, 0 }
 0x3a1   : > { %6741 = vmatpush3.bf16.xpose.msra.mxu1 %v835_v6 }
 0x3a2   : > { %6752 = vmatprep.subr.bf16.mxu1 %v7529_v5 }
 0x3a3   : > { %v828_v10 = vpop.permute.xlu1 %827 }
 0x3a6   : > { %v7356_v8 = vpop.eup %7355 }
 0x3a7   : > { %v561_v11 = vmul.f32 %v7356_v8, %v7350_v51 }
 0x3a8   : > { %6743 = vmatmul.mubr.msk.bf16.vlgmr.msra.gmra.mrb[16].mxu1 %vm384_vm2, %v828_v10 }
 0x3a9   : > { %v564_v13 = vpack.c.bf16 %v561_v11, %v561_v11  ;;  %6754 = vmatprep.mubr.msk.bf16.mxu1 %vm7530_vm1, %v7529_v5 }
 0x3ab   : > { %6725 = vmatmul.mubr.msk.bf16.vlgmr.msra.gmra.mrb[12].mxu0 %vm384_vm2, %v564_v13 }
 0x3ac   : > { %6735 = vmatpush3.bf16.xpose.msra.mxu0 %v785_v14  ;;  %6736 = vmatprep.mubr.msk.bf16.mxu0 %vm7530_vm1, %v7529_v5 }
 0x3ad   : > { %6746 = vmatprep.subr.bf16.mxu0 %v7529_v5 }
 0x3b3   : > { %6737 = vmatmul.mubr.msk.bf16.vlgmr.msra.gmra.mrb[16].mxu0 %vm384_vm2, %v778_v15 }
 0x3b4   : > { %6748 = vmatprep.mubr.msk.bf16.mxu0 %vm7530_vm1, %v7529_v5 }
 0x449   : > { %v608_v16 = vpop.f32.mrb[8].mxu0 }
 0x44a   : > { %v6443_v17 = vpack.c.bf16 %v608_v16, %v608_v16  ;;  %v6714_v18 = vpop.f32.mrb[9].mxu0 }
 0x44b   : > { %v611_v19 = vpop.f32.mrb[10].mxu0 }
 0x44c   : > { %724 = vst.msk [vmem:[#allocation2] sm:$0xf] %vm723_vm4, %v6443_v17  ;;  %v6715_v20 = vpop.f32.mrb[11].mxu0 }
 0x44d   : > { %v656_v21 = vpop.f32.mrb[8].mxu1 }
 0x44e   : > { %v6444_v22 = vpack.c.bf16 %v656_v21, %v656_v21  ;;  %v6720_v23 = vpop.f32.mrb[9].mxu1 }
 0x44f   : > { %v659_v24 = vpop.f32.mrb[10].mxu1 }
 0x450   : > { %725 = vst.msk [vmem:[#allocation2 + $0x4] sm:$0xf] %vm723_vm4, %v6444_v22  ;;  %v6721_v25 = vpop.f32.mrb[11].mxu1 }
 0x455   : > { %v771_v26 = vpop.f32.mrb[12].mxu1 }
 0x456   : > { %v6732_v27 = vpop.f32.mrb[13].mxu1  ;;  %v877_v28 = vsel %vm384_vm2, %v771_v26, -inf }
 0x457   : > { %878 = vmax.xlane.f32.xlu0 %v877_v28  ;;  %v774_v29 = vpop.f32.mrb[14].mxu1 }
 0x458   : > { %v6733_v30 = vpop.f32.mrb[15].mxu1 }
 0x47b   : > { %v871_v31 = vpop.f32.mrb[16].mxu1 }
 0x47c   : > { %v6744_v32 = vpop.f32.mrb[17].mxu1  ;;  %v883_v33 = vsel %vm384_vm2, %v871_v31, -inf }
 0x47d   : > { %884 = vmax.xlane.f32.xlu0 %v883_v33  ;;  %v874_v34 = vpop.f32.mrb[18].mxu1 }
 0x47e   : > { %v704_v35 = vpop.f32.mrb[12].mxu0  ;;  %v6745_v36 = vpop.f32.mrb[19].mxu1 }
 0x47f   : > { %v6445_v37 = vpack.c.bf16 %v704_v35, %v704_v35  ;;  %v6726_v38 = vpop.f32.mrb[13].mxu0 }
 0x480   : > { %v707_v39 = vpop.f32.mrb[14].mxu0 }
 0x481   : > { %726 = vst.msk [vmem:[#allocation2 + $0x8] sm:$0xf] %vm723_vm4, %v6445_v37  ;;  %v6727_v40 = vpop.f32.mrb[15].mxu0  ;;  %vm2089_vm4 = vsmask.f32 1280 }
 0x486   : > { %v821_v41 = vpop.f32.mrb[16].mxu0 }
 0x487   : > { %v6738_v42 = vpop.f32.mrb[17].mxu0  ;;  %v880_v43 = vsel %vm384_vm2, %v821_v41, -inf }
 0x488   : > { %881 = vmax.xlane.f32.xlu1 %v880_v43  ;;  %v824_v44 = vpop.f32.mrb[18].mxu0 }
 0x489   : > { %v6739_v45 = vpop.f32.mrb[19].mxu0 }
 0x499   : > { %913 = vrot.lane.b32.xlu1 %v7622_v9, %s7535_s11 }
 0x49d   : > { %1009 = vrot.lane.b32.xlu1 %v7620_v7, %s7535_s11 }
 0x4a1   : > { %1082 = vrot.lane.b32.xlu1 %v7622_v9, %s7536_s12 }
 0x4e4   : > { %v879_v46 = vpop.xlane.xlu0 %878 }
 0x4e5   : > { %v886_v47 = vsub.f32 %v771_v26, %v879_v46 }
 0x4e7   : > { %v889_v48 = vmul.f32 1.442695, %v886_v47 }
 0x4e9   : > { %7357 = vpow2.f32 %v889_v48 }
 0x4f3   : > { %v7358_v49 = vpop.eup %7357 }
 0x4f4   : > { %v895_v50 = vsel %vm384_vm2, %v7358_v49, 0.0 }
 0x4f5   : > { %896 = vadd.xlane.f32.xlu0 %v895_v50 }
 0x50a   : > { %v885_v51 = vpop.xlane.xlu0 %884 }
 0x50b   : > { %961 = vrot.lane.b32.xlu0 %v7628_v12, %s7535_s11  ;;  %v888_v52 = vsub.f32 %v871_v31, %v885_v51 }
 0x50d   : > { %v893_v55 = vmul.f32 1.442695, %v888_v52 }
 0x515   : > { %v882_v53 = vpop.xlane.xlu1 %881 }
 0x516   : > { %v887_v54 = vsub.f32 %v821_v41, %v882_v53 }
 0x518   : > { %v891_v56 = vmul.f32 1.442695, %v887_v54 }
 0x519   : > { %v914_v57 = vpop.permute.xlu1 %913 }
 0x51a   : > { %7359 = vpow2.f32 %v891_v56  ;;  %v919_v58 = vsel %vm570_vm3, %v914_v57, 0 }
 0x51b   : > { %6747 = vmatpush3.bf16.msra.mxu0 %v919_v58  ;;  %7361 = vpow2.f32 %v893_v55 }
 0x51c   : > { %6758 = vmatprep.subr.bf16.mxu0 %v7529_v5 }
 0x51d   : > { %v1010_v4 = vpop.permute.xlu1 %1009 }
 0x51e   : > { %v1015_v8 = vsel %vm570_vm3, %v1010_v4, 0 }
 0x521   : > { %v1083_v10 = vpop.permute.xlu1 %1082 }
 0x522   : > { %v1088_v19 = vsel %vm384_vm2, %v1083_v10, 0 }
 0x524   : > { %v7360_v59 = vpop.eup %7359 }
 0x525   : > { %v898_v60 = vsel %vm384_vm2, %v7360_v59, 0.0  ;;  %v7362_v61 = vpop.eup %7361 }
 0x526   : > { %899 = vadd.xlane.f32.xlu1 %v898_v60  ;;  %v901_v62 = vsel %vm384_vm2, %v7362_v61, 0.0 }
 0x52a   : > { %902 = vadd.xlane.f32.xlu0 %v901_v62 }
 0x537   : > { %1080 = vrot.lane.b32.xlu1 %v7622_v9, %s7537_s13 }
 0x53b   : > { %1130 = vrot.lane.b32.xlu1 %v7628_v12, %s7537_s13 }
 0x540   : > { %1132 = vrot.lane.b32.xlu0 %v7628_v12, %s7536_s12 }
 0x544   : > { %1182 = vrot.lane.b32.xlu0 %v7620_v7, %s7536_s12 }
 0x548   : > { %1180 = vrot.lane.b32.xlu0 %v7620_v7, %s7537_s13 }
 0x582   : > { %v897_v63 = vpop.xlane.xlu0 %896 }
 0x583   : > { %7363 = vrcp.f32 %v897_v63 }
 0x586   : > { %v962_v0 = vpop.permute.xlu0 %961 }
 0x587   : > { %v967_v1 = vsel %vm570_vm3, %v962_v0, 0 }
 0x588   : > { %6753 = vmatpush3.bf16.msra.mxu1 %v967_v1 }
 0x589   : > { %6764 = vmatprep.subr.bf16.mxu1 %v7529_v5 }
 0x58d   : > { %v7364_v2 = vpop.eup %7363 }
 0x58e   : > { %v907_v3 = vmul.f32 %v7364_v2, %v7358_v49 }
 0x590   : > { %v910_v6 = vpack.c.bf16 %v907_v3, %v907_v3 }
 0x592   : > { %6749 = vmatmul.mubr.msk.bf16.vlgmr.msra.gmra.mrb[20].mxu0 %vm384_vm2, %v910_v6 }
 0x593   : > { %6759 = vmatpush3.bf16.msra.mxu0 %v1015_v8  ;;  %6760 = vmatprep.mubr.msk.bf16.mxu0 %vm7530_vm1, %v7529_v5 }
 0x594   : > { %6770 = vmatprep.subr.bf16.mxu0 %v7529_v5 }
 0x5b3   : > { %v900_v11 = vpop.xlane.xlu1 %899 }
 0x5b4   : > { %7365 = vrcp.f32 %v900_v11 }
 0x5b7   : > { %v903_v13 = vpop.xlane.xlu0 %902  ;;  %v1081_v23 = vpop.permute.xlu1 %1080 }
 0x5b8   : > { %7367 = vrcp.f32 %v903_v13 }
 0x5bb   : > { %v1133_v18 = vpop.permute.xlu0 %1132  ;;  %v1131_v26 = vpop.permute.xlu1 %1130 }
 0x5bc   : > { %v1138_v22 = vsel %vm384_vm2, %v1133_v18, 0 }
 0x5be   : > { %v7366_v14 = vpop.eup %7365 }
 0x5bf   : > { %v908_v15 = vmul.f32 %v7366_v14, %v7360_v59  ;;  %v1183_v24 = vpop.permute.xlu0 %1182 }
 0x5c0   : > { %v1188_v25 = vsel %vm384_vm2, %v1183_v24, 0 }
 0x5c1   : > { %v911_v16 = vpack.c.bf16 %v908_v15, %v908_v15 }
 0x5c2   : > { %v7368_v17 = vpop.eup %7367 }
 0x5c3   : > { %6755 = vmatmul.mubr.msk.bf16.vlgmr.msra.gmra.mrb[20].mxu1 %vm384_vm2, %v911_v16  ;;  %v909_v20 = vmul.f32 %v7368_v17, %v7362_v61  ;;  %v1181_v27 = vpop.permute.xlu0 %1180 }
 0x5c4   : > { %6765 = vmatpush3.bf16.xpose.msra.mxu1 %v1088_v19  ;;  %6766 = vmatprep.mubr.msk.bf16.mxu1 %vm7530_vm1, %v7529_v5 }
 0x5c5   : > { %v912_v21 = vpack.c.bf16 %v909_v20, %v909_v20  ;;  %6776 = vmatprep.subr.bf16.mxu1 %v7529_v5 }
 0x5c7   : > { %6761 = vmatmul.mubr.msk.bf16.vlgmr.msra.gmra.mrb[24].mxu0 %vm384_vm2, %v912_v21 }
 0x5c8   : > { %6771 = vmatpush3.bf16.xpose.msra.mxu0 %v1138_v22  ;;  %6772 = vmatprep.mubr.msk.bf16.mxu0 %vm7530_vm1, %v7529_v5 }
 0x5c9   : > { %6782 = vmatprep.subr.bf16.mxu0 %v7529_v5 }
 0x5cb   : > { %6767 = vmatmul.mubr.msk.bf16.vlgmr.msra.gmra.mrb[24].mxu1 %vm384_vm2, %v1081_v23 }
 0x5cc   : > { %6777 = vmatpush3.bf16.xpose.msra.mxu1 %v1188_v25  ;;  %6778 = vmatprep.mubr.msk.bf16.mxu1 %vm7530_vm1, %v7529_v5 }
 0x5cd   : > { %6788 = vmatprep.subr.bf16.mxu1 %v7529_v5 }
 0x5cf   : > { %6773 = vmatmul.mubr.msk.bf16.vlgmr.msra.gmra.mrb[28].mxu0 %vm384_vm2, %v1131_v26 }
 0x5d0   : > { %6784 = vmatprep.mubr.msk.bf16.mxu0 %vm7530_vm1, %v7529_v5 }
 0x5d3   : > { %6779 = vmatmul.mubr.msk.bf16.vlgmr.msra.gmra.mrb[28].mxu1 %vm384_vm2, %v1181_v27 }
 0x5d4   : > { %6790 = vmatprep.mubr.msk.bf16.mxu1 %vm7530_vm1, %v7529_v5 }
 0x665   : > { %v7761_v28 = vpop.f32.mrb[20].mxu0 }
 0x666   : > { %v6750_v29 = vpop.f32.mrb[21].mxu0 }
 0x667   : > { %v958_v30 = vpop.f32.mrb[22].mxu0 }
 0x668   : > { %v6751_v31 = vpop.f32.mrb[23].mxu0 }
 0x696   : > { %v7763_v32 = vpop.f32.mrb[20].mxu1 }
 0x697   : > { %v6756_v33 = vpop.f32.mrb[21].mxu1 }
 0x698   : > { %v1006_v34 = vpop.f32.mrb[22].mxu1 }
 0x699   : > { %v6757_v35 = vpop.f32.mrb[23].mxu1 }
 0x69a   : > { %v7765_v36 = vpop.f32.mrb[24].mxu0 }
 0x69b   : > { %v6762_v37 = vpop.f32.mrb[25].mxu0 }
 0x69c   : > { %v1054_v38 = vpop.f32.mrb[26].mxu0 }
 0x69d   : > { %v6763_v39 = vpop.f32.mrb[27].mxu0 }
 0x69e   : > { %v1124_v40 = vpop.f32.mrb[24].mxu1 }
 0x69f   : > { %v6768_v41 = vpop.f32.mrb[25].mxu1  ;;  %v1230_v42 = vsel %vm384_vm2, %v1124_v40, -inf }
 0x6a0   : > { %1231 = vmax.xlane.f32.xlu1 %v1230_v42  ;;  %v1127_v43 = vpop.f32.mrb[26].mxu1 }
 0x6a1   : > { %v6769_v44 = vpop.f32.mrb[27].mxu1 }
 0x6a2   : > { %v1174_v45 = vpop.f32.mrb[28].mxu0 }
 0x6a3   : > { %v6774_v46 = vpop.f32.mrb[29].mxu0  ;;  %v1233_v47 = vsel %vm384_vm2, %v1174_v45, -inf }
 0x6a4   : > { %1234 = vmax.xlane.f32.xlu0 %v1233_v47  ;;  %v1177_v48 = vpop.f32.mrb[30].mxu0 }
 0x6a5   : > { %v6775_v49 = vpop.f32.mrb[31].mxu0 }
 0x6a6   : > { %v1224_v50 = vpop.f32.mrb[28].mxu1 }
 0x6a7   : > { %v6780_v51 = vpop.f32.mrb[29].mxu1  ;;  %v1236_v52 = vsel %vm384_vm2, %v1224_v50, -inf }
 0x6a8   : > { %v1227_v53 = vpop.f32.mrb[30].mxu1  ;;  %1237 = vmax.xlane.f32.xlu0 %v1236_v52 }
 0x6a9   : > { %v6781_v54 = vpop.f32.mrb[31].mxu1 }
 0x6b1   : > { %1266 = vrot.lane.b32.xlu1 %v7622_v9, %s7538_s14 }
 0x6b5   : > { %1362 = vrot.lane.b32.xlu1 %v7620_v7, %s7538_s14 }
 0x6be   : > { %1314 = vrot.lane.b32.xlu0 %v7628_v12, %s7538_s14 }
 0x72d   : > { %v1232_v55 = vpop.xlane.xlu1 %1231 }
 0x72e   : > { %v1239_v56 = vsub.f32 %v1124_v40, %v1232_v55 }
 0x730   : > { %v1242_v57 = vmul.f32 1.442695, %v1239_v56 }
 0x731   : > { %v1267_v58 = vpop.permute.xlu1 %1266  ;;  %v1235_v59 = vpop.xlane.xlu0 %1234 }
 0x732   : > { %7369 = vpow2.f32 %v1242_v57  ;;  %v1272_v60 = vsel %vm570_vm3, %v1267_v58, 0  ;;  %v1240_v61 = vsub.f32 %v1174_v45, %v1235_v59 }
 0x733   : > { %6783 = vmatpush3.bf16.msra.mxu0 %v1272_v60 }
 0x734   : > { %v1244_v62 = vmul.f32 1.442695, %v1240_v61  ;;  %6794 = vmatprep.subr.bf16.mxu0 %v7529_v5 }
 0x735   : > { %v1238_v63 = vpop.xlane.xlu0 %1237  ;;  %v1363_v14 = vpop.permute.xlu1 %1362 }
 0x736   : > { %7371 = vpow2.f32 %v1244_v62  ;;  %v1241_v8 = vsub.f32 %v1224_v50, %v1238_v63  ;;  %v1368_v21 = vsel %vm570_vm3, %v1363_v14, 0 }
 0x738   : > { %v1246_v10 = vmul.f32 1.442695, %v1241_v8 }
 0x739   : > { %v1315_v0 = vpop.permute.xlu0 %1314 }
 0x73a   : > { %v1320_v1 = vsel %vm570_vm3, %v1315_v0, 0  ;;  %7373 = vpow2.f32 %v1246_v10 }
 0x73b   : > { %6789 = vmatpush3.bf16.msra.mxu1 %v1320_v1 }
 0x73c   : > { %v7370_v2 = vpop.eup %7369  ;;  %6800 = vmatprep.subr.bf16.mxu1 %v7529_v5 }
 0x73d   : > { %v1248_v3 = vsel %vm384_vm2, %v7370_v2, 0.0 }
 0x73e   : > { %1249 = vadd.xlane.f32.xlu1 %v1248_v3 }
 0x740   : > { %v7372_v4 = vpop.eup %7371 }
 0x741   : > { %v1251_v6 = vsel %vm384_vm2, %v7372_v4, 0.0 }
 0x742   : > { %1252 = vadd.xlane.f32.xlu0 %v1251_v6 }
 0x744   : > { %v7374_v11 = vpop.eup %7373 }
 0x745   : > { %v1254_v13 = vsel %vm384_vm2, %v7374_v11, 0.0 }
 0x74f   : > { %1485 = vrot.lane.b32.xlu1 %v7628_v12, %s7539_s15 }
 0x758   : > { %1435 = vrot.lane.b32.xlu0 %v7622_v9, %s7539_s15 }
 0x75c   : > { %1433 = vrot.lane.b32.xlu0 %v7622_v9, %s7540_s16 }
 0x760   : > { %1483 = vrot.lane.b32.xlu0 %v7628_v12, %s7540_s16 }
 0x773   : > { %1255 = vadd.xlane.f32.xlu1 %v1254_v13 }
 0x784   : > { %1535 = vrot.lane.b32.xlu1 %v7620_v7, %s7539_s15 }
 0x788   : > { %1533 = vrot.lane.b32.xlu1 %v7620_v7, %s7540_s16 }
 0x7cb   : > { %v1250_v15 = vpop.xlane.xlu1 %1249 }
 0x7cc   : > { %7375 = vrcp.f32 %v1250_v15 }
 0x7cf   : > { %v1253_v16 = vpop.xlane.xlu0 %1252  ;;  %v1486_v27 = vpop.permute.xlu1 %1485 }
 0x7d0   : > { %7377 = vrcp.f32 %v1253_v16  ;;  %v1491_v38 = vsel %vm384_vm2, %v1486_v27, 0 }
 0x7d3   : > { %v1436_v23 = vpop.permute.xlu0 %1435 }
 0x7d4   : > { %v1441_v25 = vsel %vm384_vm2, %v1436_v23, 0  ;;  %v6447_v23 = vpack.c.bf16 %v7763_v32, %v7763_v32 }
 0x7d6   : > { %v7376_v17 = vpop.eup %7375 }
 0x7d7   : > { %v1260_v18 = vmul.f32 %v7376_v17, %v7370_v2  ;;  %v1434_v26 = vpop.permute.xlu0 %1433 }
 0x7d9   : > { %v1263_v19 = vpack.c.bf16 %v1260_v18, %v1260_v18 }
 0x7da   : > { %v7378_v20 = vpop.eup %7377 }
 0x7db   : > { %6785 = vmatmul.mubr.msk.bf16.vlgmr.msra.gmra.mrb[32].mxu0 %vm384_vm2, %v1263_v19  ;;  %v1261_v22 = vmul.f32 %v7378_v20, %v7372_v4  ;;  %v1484_v39 = vpop.permute.xlu0 %1483 }
 0x7dc   : > { %6795 = vmatpush3.bf16.msra.mxu0 %v1368_v21  ;;  %6796 = vmatprep.mubr.msk.bf16.mxu0 %vm7530_vm1, %v7529_v5 }
 0x7dd   : > { %v1264_v24 = vpack.c.bf16 %v1261_v22, %v1261_v22  ;;  %6806 = vmatprep.subr.bf16.mxu0 %v7529_v5 }
 0x7df   : > { %6791 = vmatmul.mubr.msk.bf16.vlgmr.msra.gmra.mrb[32].mxu1 %vm384_vm2, %v1264_v24 }
 0x7e0   : > { %6801 = vmatpush3.bf16.xpose.msra.mxu1 %v1441_v25  ;;  %6802 = vmatprep.mubr.msk.bf16.mxu1 %vm7530_vm1, %v7529_v5  ;;  %v6446_v25 = vpack.c.bf16 %v7761_v28, %v7761_v28 }
 0x7e1   : > { %6812 = vmatprep.subr.bf16.mxu1 %v7529_v5 }
 0x7e7   : > { %6803 = vmatmul.mubr.msk.bf16.vlgmr.msra.gmra.mrb[36].mxu1 %vm384_vm2, %v1434_v26 }
 0x7e8   : > { %6814 = vmatprep.mubr.msk.bf16.mxu1 %vm7530_vm1, %v7529_v5 }
 0x800   : > { %v1256_v29 = vpop.xlane.xlu1 %1255 }
 0x801   : > { %7379 = vrcp.f32 %v1256_v29 }
 0x804   : > { %v1536_v30 = vpop.permute.xlu1 %1535 }
 0x805   : > { %v1541_v31 = vsel %vm384_vm2, %v1536_v30, 0 }
 0x806   : > { %6813 = vmatpush3.bf16.xpose.msra.mxu1 %v1541_v31 }
 0x807   : > { %6824 = vmatprep.subr.bf16.mxu1 %v7529_v5 }
 0x808   : > { %v1534_v34 = vpop.permute.xlu1 %1533 }
 0x80b   : > { %v7380_v33 = vpop.eup %7379 }
 0x80c   : > { %v1262_v35 = vmul.f32 %v7380_v33, %v7374_v11 }
 0x80d   : > { %6815 = vmatmul.mubr.msk.bf16.vlgmr.msra.gmra.mrb[40].mxu1 %vm384_vm2, %v1534_v34 }
 0x80e   : > { %v1265_v37 = vpack.c.bf16 %v1262_v35, %v1262_v35  ;;  %6826 = vmatprep.mubr.msk.bf16.mxu1 %vm7530_vm1, %v7529_v5 }
 0x810   : > { %6797 = vmatmul.mubr.msk.bf16.vlgmr.msra.gmra.mrb[36].mxu0 %vm384_vm2, %v1265_v37 }
 0x811   : > { %6807 = vmatpush3.bf16.xpose.msra.mxu0 %v1491_v38  ;;  %6808 = vmatprep.mubr.msk.bf16.mxu0 %vm7530_vm1, %v7529_v5 }
 0x812   : > { %6818 = vmatprep.subr.bf16.mxu0 %v7529_v5 }
 0x818   : > { %6809 = vmatmul.mubr.msk.bf16.vlgmr.msra.gmra.mrb[40].mxu0 %vm384_vm2, %v1484_v39 }
 0x819   : > { %6820 = vmatprep.mubr.msk.bf16.mxu0 %vm7530_vm1, %v7529_v5 }
 0x8ae   : > { %v7821_v40 = vpop.f32.mrb[32].mxu0 }
 0x8af   : > { %v6786_v41 = vpop.f32.mrb[33].mxu0  ;;  %v6449_v24 = vpack.c.bf16 %v7821_v40, %v7821_v40 }
 0x8b0   : > { %v1311_v42 = vpop.f32.mrb[34].mxu0 }
 0x8b1   : > { %v6787_v43 = vpop.f32.mrb[35].mxu0 }
 0x8b2   : > { %v7823_v44 = vpop.f32.mrb[32].mxu1 }
 0x8b3   : > { %v6792_v45 = vpop.f32.mrb[33].mxu1  ;;  %v6450_v32 = vpack.c.bf16 %v7823_v44, %v7823_v44 }
 0x8b4   : > { %v1359_v46 = vpop.f32.mrb[34].mxu1 }
 0x8b5   : > { %v6793_v47 = vpop.f32.mrb[35].mxu1 }
 0x8ba   : > { %v1477_v48 = vpop.f32.mrb[36].mxu1 }
 0x8bb   : > { %v6804_v49 = vpop.f32.mrb[37].mxu1  ;;  %v1583_v50 = vsel %vm384_vm2, %v1477_v48, -inf }
 0x8bc   : > { %1584 = vmax.xlane.f32.xlu0 %v1583_v50  ;;  %v1480_v51 = vpop.f32.mrb[38].mxu1 }
 0x8bd   : > { %v6805_v52 = vpop.f32.mrb[39].mxu1 }
 0x8e0   : > { %v1577_v53 = vpop.f32.mrb[40].mxu1 }
 0x8e1   : > { %v6816_v54 = vpop.f32.mrb[41].mxu1  ;;  %v1589_v55 = vsel %vm384_vm2, %v1577_v53, -inf }
 0x8e2   : > { %1590 = vmax.xlane.f32.xlu0 %v1589_v55  ;;  %v1580_v56 = vpop.f32.mrb[42].mxu1 }
 0x8e3   : > { %v1404_v57 = vpop.f32.mrb[36].mxu0  ;;  %v6817_v58 = vpop.f32.mrb[43].mxu1 }
 0x8e4   : > { %v6798_v59 = vpop.f32.mrb[37].mxu0  ;;  %v6451_v26 = vpack.c.bf16 %v1404_v57, %v1404_v57 }
 0x8e5   : > { %v1407_v60 = vpop.f32.mrb[38].mxu0  ;;  %v7299_v59 = vld [vmem:[%s8769_s3 + $0x20] ss:$16 sps:$4 sm:$0xff]  }
 0x8e6   : > { %v6799_v61 = vpop.f32.mrb[39].mxu0 }
 0x8eb   : > { %v1527_v62 = vpop.f32.mrb[40].mxu0 }
 0x8ec   : > { %v6810_v63 = vpop.f32.mrb[41].mxu0  ;;  %v1586_v0 = vsel %vm384_vm2, %v1527_v62, -inf }
 0x8ed   : > { %1587 = vmax.xlane.f32.xlu1 %v1586_v0  ;;  %v1530_v1 = vpop.f32.mrb[42].mxu0 }
 0x8ee   : > { %v6811_v2 = vpop.f32.mrb[43].mxu0  ;;  %v7298_v1 = vld [vmem:[%s8769_s3] ss:$16 sps:$4 sm:$0xff]  }
 0x8fe   : > { %1619 = vrot.lane.b32.xlu1 %v7622_v9, %s7541_s17 }
 0x949   : > { %v1585_v3 = vpop.xlane.xlu0 %1584 }
 0x94a   : > { %v1592_v4 = vsub.f32 %v1477_v48, %v1585_v3 }
 0x94c   : > { %v1595_v6 = vmul.f32 1.442695, %v1592_v4 }
 0x94e   : > { %7381 = vpow2.f32 %v1595_v6 }
 0x958   : > { %v7382_v8 = vpop.eup %7381 }
 0x959   : > { %v1601_v10 = vsel %vm384_vm2, %v7382_v8, 0.0 }
 0x95a   : > { %1602 = vadd.xlane.f32.xlu0 %v1601_v10 }
 0x96f   : > { %v1591_v11 = vpop.xlane.xlu0 %1590 }
 0x970   : > { %v1594_v13 = vsub.f32 %v1577_v53, %v1591_v11 }
 0x972   : > { %v1599_v14 = vmul.f32 1.442695, %v1594_v13  ;;  %v7302_v13 = vld [vmem:[%s8769_s3 + $0x4] ss:$16 sps:$4 sm:$0xff]  }
 0x974   : > { %7383 = vpow2.f32 %v1599_v14  ;;  %v7303_v14 = vld [vmem:[%s8769_s3 + $0x24] ss:$16 sps:$4 sm:$0xff]  }
 0x97a   : > { %v1588_v15 = vpop.xlane.xlu1 %1587 }
 0x97b   : > { %v1593_v16 = vsub.f32 %v1527_v62, %v1588_v15  ;;  %v7517_v15 = vld [vmem:[%s7608_s30 + $0x8] sm:$0xf] }
 0x97d   : > { %v1597_v17 = vmul.f32 1.442695, %v1593_v16  ;;  %v298_v16 = vunpack.c.l.bf16 %v7517_v15 }
 0x97e   : > { %v7384_v18 = vpop.eup %7383  ;;  %v1620_v19 = vpop.permute.xlu1 %1619 }
 0x97f   : > { %7385 = vpow2.f32 %v1597_v17  ;;  %v1625_v9 = vsel %vm570_vm3, %v1620_v19, 0  ;;  %v1607_v20 = vsel %vm384_vm2, %v7384_v18, 0.0  ;;  %v7518_v17 = vld [vmem:[%s7608_s30] sm:$0xff]   ;;  %s7261_s30 = smul.u32 24, %s8774_s22 }
 0x980   : > { %1608 = vadd.xlane.f32.xlu0 %v1607_v20  ;;  %6819 = vmatpush3.bf16.msra.mxu0 %v1625_v9  ;;  %v297_v9 = vunpack.c.h.bf16 %v7518_v17 }
 0x981   : > { %6830 = vmatprep.subr.bf16.mxu0 %v7529_v5 }
 0x989   : > { %v7386_v21 = vpop.eup %7385 }
 0x98a   : > { %v1604_v22 = vsel %vm384_vm2, %v7386_v21, 0.0 }
 0x98b   : > { %1605 = vadd.xlane.f32.xlu1 %v1604_v22 }
 0x996   : > { %1667 = vrot.lane.b32.xlu0 %v7628_v12, %s7541_s17  ;;  %v6448_v12 = vpack.c.bf16 %v7765_v36, %v7765_v36 }
 0x99a   : > { %1069 = vrot.lane.b32.xlu0 %v6447_v23, %s7542_s18 }
 0x99c   : > { %1715 = vrot.lane.b32.xlu1 %v7620_v7, %s7541_s17 }
 0x99e   : > { %1420 = vrot.lane.b32.xlu0 %v6449_v24, %s7543_s19 }
 0x9a0   : > { %1067 = vrot.lane.b32.xlu1 %v6446_v25, %s7542_s18 }
 0x9a2   : > { %1424 = vrot.lane.b32.xlu0 %v6451_v26, %s7543_s19 }
 0x9a4   : > { %1071 = vrot.lane.b32.xlu1 %v6448_v12, %s7542_s18 }
 0x9a8   : > { %1422 = vrot.lane.b32.xlu1 %v6450_v32, %s7543_s19 }
 0x9e7   : > { %v1603_v7 = vpop.xlane.xlu0 %1602 }
 0x9e8   : > { %7387 = vrcp.f32 %v1603_v7 }
 0x9f2   : > { %v7388_v28 = vpop.eup %7387 }
 0x9f3   : > { %v1613_v27 = vmul.f32 %v7388_v28, %v7382_v8 }
 0x9f5   : > { %v1616_v29 = vpack.c.bf16 %v1613_v27, %v1613_v27 }
 0x9f7   : > { %6821 = vmatmul.mubr.msk.bf16.vlgmr.msra.gmra.mrb[44].mxu0 %vm384_vm2, %v1616_v29 }
 0x9f8   : > { %6832 = vmatprep.mubr.msk.bf16.mxu0 %vm7530_vm1, %v7529_v5 }
 0xa0d   : > { %v1609_v36 = vpop.xlane.xlu0 %1608 }
 0xa0e   : > { %7389 = vrcp.f32 %v1609_v36 }
 0xa11   : > { %v1668_v30 = vpop.permute.xlu0 %1667 }
 0xa12   : > { %v1673_v31 = vsel %vm570_vm3, %v1668_v30, 0 }
 0xa13   : > { %6825 = vmatpush3.bf16.msra.mxu1 %v1673_v31 }
 0xa15   : > { %v1070_v33 = vpop.permute.xlu0 %1069 }
 0xa16   : > { %1078 = vst.msk [vmem:[#allocation2 + $0x4] sm:$0xf] %vm1076_vm5, %v1070_v33 }
 0xa18   : > { %v7390_v34 = vpop.eup %7389  ;;  %v1606_v35 = vpop.xlane.xlu1 %1605 }
 0xa19   : > { %7391 = vrcp.f32 %v1606_v35  ;;  %v1615_v37 = vmul.f32 %v7390_v34, %v7384_v18  ;;  %v1421_v40 = vpop.permute.xlu0 %1420  ;;  %v296_v18 = vunpack.c.l.bf16 %v7518_v17 }
 0xa1b   : > { %v1618_v41 = vpack.c.bf16 %v1615_v37, %v1615_v37 }
 0xa1c   : > { %v1716_v38 = vpop.permute.xlu1 %1715 }
 0xa1d   : > { %v1721_v39 = vsel %vm570_vm3, %v1716_v38, 0  ;;  %v1425_v46 = vpop.permute.xlu0 %1424 }
 0xa1e   : > { %6831 = vmatpush3.bf16.msra.mxu0 %v1721_v39 }
 0xa1f   : > { %6844 = vmatprep.subr.bf16.mxu0 %v7529_v5 }
 0xa20   : > { %v1068_v42 = vpop.permute.xlu1 %1067 }
 0xa21   : > { %1077 = vst.msk [vmem:[#allocation2] sm:$0xf] %vm1076_vm5, %v1068_v42  ;;  %6833 = vmatmul.mubr.msk.bf16.vlgmr.msra.gmra.mrb[48].mxu0 %vm384_vm2, %v1618_v41 }
 0xa22   : > { %1430 = vst.msk [vmem:[#allocation2] sm:$0xf] %vm1429_vm6, %v1421_v40  ;;  %6848 = vmatprep.mubr.msk.bf16.mxu0 %vm7530_vm1, %v7529_v5  ;;  %6845 = vmatpush3.bf16.msra.mxu0 %v7302_v13 }
 0xa23   : > { %v7392_v43 = vpop.eup %7391  ;;  %6846 = vmatprep.subr.bf16.mxu0 %v7529_v5 }
 0xa24   : > { %v1072_v44 = vpop.permute.xlu1 %1071  ;;  %v1614_v45 = vmul.f32 %v7392_v43, %v7386_v21 }
 0xa25   : > { %1079 = vst.msk [vmem:[#allocation2 + $0x8] sm:$0xf] %vm1076_vm5, %v1072_v44  ;;  %vm2090_vm5 = vmand %vm2088_vm15, %vm2089_vm4  ;;  %vm2680_vm15 = vcmask 130048  }
 0xa26   : > { %v1617_v47 = vpack.c.bf16 %v1614_v45, %v1614_v45  ;;  %1432 = vst.msk [vmem:[#allocation2 + $0x8] sm:$0xf] %vm1429_vm6, %v1425_v46  ;;  %6847 = vmatpush3.bf16.msra.mxu0 %v7303_v14 }
 0xa27   : > { %6858 = vmatprep.subr.bf16.mxu0 %v7529_v5 }
 0xa28   : > { %6827 = vmatmul.mubr.msk.bf16.vlgmr.msra.gmra.mrb[44].mxu1 %vm384_vm2, %v1617_v47  ;;  %v1423_v48 = vpop.permute.xlu1 %1422 }
 0xa29   : > { %1431 = vst.msk [vmem:[#allocation2 + $0x4] sm:$0xf] %vm1429_vm6, %v1423_v48  ;;  %vm2216_vm6 = vcmask 123968  }
 0xaca   : > { %v1661_v49 = vpop.f32.mrb[44].mxu0 }
 0xacb   : > { %v6452_v50 = vpack.c.bf16 %v1661_v49, %v1661_v49  ;;  %v6822_v51 = vpop.f32.mrb[45].mxu0 }
 0xacc   : > { %v1664_v52 = vpop.f32.mrb[46].mxu0 }
 0xacd   : > { %1773 = vrot.lane.b32.xlu1 %v6452_v50, %s7544_s20  ;;  %v6823_v53 = vpop.f32.mrb[47].mxu0 }
 0xaf4   : > { %v1757_v54 = vpop.f32.mrb[48].mxu0 }
 0xaf5   : > { %v6454_v55 = vpack.c.bf16 %v1757_v54, %v1757_v54  ;;  %v6834_v56 = vpop.f32.mrb[49].mxu0 }
 0xaf6   : > { %v1760_v57 = vpop.f32.mrb[50].mxu0 }
 0xaf7   : > { %1777 = vrot.lane.b32.xlu1 %v6454_v55, %s7544_s20  ;;  %v6835_v58 = vpop.f32.mrb[51].mxu0 }
 0xafb   : > { %v1709_v60 = vpop.f32.mrb[44].mxu1  ;;  %1813 = vrot.lane.b32.xlu1 %v7299_v59, %s7545_s25 }
 0xafc   : > { %v6453_v61 = vpack.c.bf16 %v1709_v60, %v1709_v60  ;;  %v6828_v62 = vpop.f32.mrb[45].mxu1 }
 0xafd   : > { %v1712_v63 = vpop.f32.mrb[46].mxu1 }
 0xafe   : > { %1775 = vrot.lane.b32.xlu0 %v6453_v61, %s7544_s20  ;;  %v6829_v0 = vpop.f32.mrb[47].mxu1 }
 0xb02   : > { %1811 = vrot.lane.b32.xlu0 %v7298_v1, %s7545_s25 }
 0xb3f   : > { %v1774_v2 = vpop.permute.xlu1 %1773 }
 0xb40   : > { %1783 = vst.msk [vmem:[#allocation2] sm:$0xf] %vm1782_vm7, %v1774_v2 }
 0xb69   : > { %v1778_v3 = vpop.permute.xlu1 %1777 }
 0xb6a   : > { %1785 = vst.msk [vmem:[#allocation2 + $0x8] sm:$0xf] %vm1782_vm7, %v1778_v3 }
 0xb6d   : > { %v1814_v8 = vpop.permute.xlu1 %1813 }
 0xb70   : > { %v1776_v4 = vpop.permute.xlu0 %1775 }
 0xb71   : > { %1784 = vst.msk [vmem:[#allocation2 + $0x4] sm:$0xf] %vm1782_vm7, %v1776_v4  ;;  %v7301_v11 = vld [vmem:[#allocation2 + $0x8] ss:$0 sps:$4 sm:$0xff]   ;;  %vm2217_vm7 = vmand %vm2216_vm6, %vm2089_vm4  ;;  %vm3371_vm6 = vcmask 257152  }
 0xb74   : > { %v1812_v6 = vpop.permute.xlu0 %1811 }
 0xb75   : > { %6836 = vmatprep.subr.bf16.mxu1 %v1812_v6 }
 0xb76   : > { %6837 = vmatpush3.bf16.msra.mxu1 %v1812_v6 }
 0xb77   : > { %6838 = vmatprep.subr.bf16.mxu1 %v1814_v8 }
 0xb78   : > { %v7300_v10 = vld [vmem:[#allocation2] sm:$0xff]  }
 0xb79   : > { %6840 = vmatprep.mubr.msk.bf16.mxu1 %vm323_vm0, %v7300_v10 }
 0xb7a   : > { %6839 = vmatpush3.bf16.msra.mxu1 %v1814_v8 }
 0xb7b   : > { %6852 = vmatprep.subr.bf16.mxu1 %v7529_v5 }
 0xb7d   : > { %6841 = vmatmul.mubr.msk.bf16.vlgmr.msra.gmra.mrb[48].mxu1 %vm323_vm0, %v7301_v11 }
 0xb7e   : > { %6854 = vmatprep.mubr.msk.bf16.mxu1 %vm7530_vm1, %v7529_v5 }
 0xc50   : > { %v6842_v19 = vpop.f32.mrb[48].mxu1 }
 0xc51   : > { %v7897_v20 = vadd.f32 %v6842_v19, %v298_v16  ;;  %v1857_v21 = vpop.f32.mrb[49].mxu1 }
 0xc52   : > { %v7899_v22 = vadd.f32 %v1857_v21, %v296_v18  ;;  %v6843_v23 = vpop.f32.mrb[50].mxu1 }
 0xc53   : > { %v1888_v24 = vsel %vm323_vm0, %v7897_v20, 0.0  ;;  %v1860_v25 = vpop.f32.mrb[51].mxu1 }
 0xc54   : > { %v1889_v26 = vrot.slane %v1888_v24, 4  ;;  %v1874_v12 = vsel %vm323_vm0, %v7899_v22, 0.0  ;;  %v7905_v32 = vadd.f32 %v1860_v25, %v297_v9 }
 0xc55   : > { %v1875_v7 = vrot.slane %v1874_v12, 4 }
 0xc56   : > { %v1890_v28 = vadd.f32 %v1889_v26, %v1888_v24  ;;  %v1881_v27 = vsel %vm323_vm0, %v7905_v32, 0.0  ;;  %v4193_v29 = vpack.c.bf16 %v7905_v32, %v7899_v22 }
 0xc57   : > { %v1876_v36 = vadd.f32 %v1875_v7, %v1874_v12  ;;  %v1882_v30 = vrot.slane %v1881_v27, 4 }
 0xc58   : > { %v1891_v31 = vrot.slane %v1890_v28, 2 }
 0xc59   : > { %v1877_v33 = vrot.slane %v1876_v36, 2  ;;  %v1883_v34 = vadd.f32 %v1882_v30, %v1881_v27 }
 0xc5a   : > { %v1892_v35 = vadd.f32 %v1891_v31, %v1890_v28 }
 0xc5b   : > { %v1878_v37 = vadd.f32 %v1877_v33, %v1876_v36  ;;  %v1884_v38 = vrot.slane %v1883_v34, 2 }
 0xc5c   : > { %v1893_v39 = vrot.slane %v1892_v35, 1 }
 0xc5d   : > { %v1879_v40 = vrot.slane %v1878_v37, 1  ;;  %v1885_v41 = vadd.f32 %v1884_v38, %v1883_v34 }
 0xc5e   : > { %v1894_v42 = vadd.f32 %v1893_v39, %v1892_v35 }
 0xc5f   : > { %v1880_v43 = vadd.f32 %v1879_v40, %v1878_v37  ;;  %v1886_v44 = vrot.slane %v1885_v41, 1 }
 0xc60   : > { %v7911_v45 = vmul.f32 0.125, %v1894_v42 }
 0xc61   : > { %v7913_v46 = vmul.f32 0.125, %v1880_v43  ;;  %v1887_v47 = vadd.f32 %v1886_v44, %v1885_v41 }
 0xc62   : > { %v1904_v50 = vpack.c.bf16 %v7911_v45, %v7911_v45 }
 0xc63   : > { %v1902_v48 = vpack.c.bf16 %v7913_v46, %v7913_v46  ;;  %v7917_v49 = vmul.f32 0.125, %v1887_v47 }
 0xc64   : > { %v1910_v54 = vunpack.c.l.b16 %v1904_v50  ;;  %v7546_v50 = vmov 65535  }
 0xc65   : > { %v1903_v51 = vpack.c.bf16 %v7917_v49, %v7917_v49  ;;  %v1908_v52 = vunpack.c.l.b16 %v1902_v48 }
 0xc67   : > { %v1909_v53 = vunpack.c.l.b16 %v1903_v51  ;;  %v2042_v51 = vsel %vm2040_vm11, 4294967295, %v7546_v50  ;;  %v2209_v50 = vlaneseq }
 0xc69   : > { %v1912_v55 = vsel %vm1911_vm8, %v1909_v53, %v1908_v52 }
 0xc6a   : > { %v1914_v56 = vsel %vm1913_vm9, %v1910_v54, %v1912_v55  ;;  %v2043_v55 = vsel %vm2041_vm12, %v2042_v51, 0  ;;  %vm2470_vm12 = vcmask 255168  }
 0xc6b   : > { %v1915_v57 = vpack.c.b16 %v1914_v56, %v1914_v56 }
 0xc6d   : > { %6849 = vmatmul.mubr.msk.bf16.vlgmr.msra.gmra.mrb[52].mxu0 %vm323_vm0, %v1915_v57 }
 0xc6e   : > { %6860 = vmatprep.mubr.msk.bf16.mxu0 %vm7530_vm1, %v7529_v5 }
 0xd40   : > { %v1965_v58 = vpop.f32.mrb[52].mxu0 }
 0xd41   : > { %v7928_v59 = vpack.c.bf16 %v1965_v58, %v1965_v58  ;;  %v6850_v60 = vpop.f32.mrb[53].mxu0 }
 0xd42   : > { %v1968_v61 = vpop.f32.mrb[54].mxu0 }
 0xd43   : > { %2096 = vrot.lane.b32.xlu1 %v7928_v59, %s7533_s9  ;;  %1973 = vrot.lane.b32.xlu0 %v7928_v59, %s7531_s7  ;;  %v6851_v62 = vpop.f32.mrb[55].mxu0 }
 0xd47   : > { %2223 = vrot.lane.b32.xlu1 %v7928_v59, %s7536_s12  ;;  %2094 = vrot.lane.b32.xlu0 %v7928_v59, %s7534_s10  ;;  %s8020_s10 = scalar_lea.vmem %s8767_s1, %s7260_s27 }
 0xd4b   : > { %2350 = vrot.lane.b32.xlu1 %v7928_v59, %s7539_s15  ;;  %2221 = vrot.lane.b32.xlu0 %v7928_v59, %s7537_s13  ;;  %s286_s15 = scalar_lea.vmem %s8768_s2, %s7261_s30 }
 0xd4f   : > { %2348 = vrot.lane.b32.xlu0 %v7928_v59, %s7540_s16 }
 0xdb5   : > { %v1974_v63 = vpop.permute.xlu0 %1973  ;;  %v2097_v1 = vpop.permute.xlu1 %2096 }
 0xdb6   : > { %v1979_v0 = vsel %vm384_vm2, %v1974_v63, 0  ;;  %v2102_v2 = vsel %vm384_vm2, %v2097_v1, 0 }
 0xdb7   : > { %6853 = vmatpush3.bf16.xpose.msra.mxu1 %v1979_v0  ;;  %v7547_v0 = vmov 0  }
 0xdb8   : > { %6864 = vmatprep.subr.bf16.mxu1 %v7529_v5  ;;  %7293 = vset.pattern.permute.xlu1 %v7547_v0 }
 0xdb9   : > { %v2224_v3 = vpop.permute.xlu1 %2223  ;;  %v2095_v4 = vpop.permute.xlu0 %2094  ;;  %7292 = vset.pattern.permute.xlu0 %v7547_v0 }
 0xdba   : > { %v2229_v6 = vsel %vm384_vm2, %v2224_v3, 0 }
 0xdbd   : > { %v2351_v8 = vpop.permute.xlu1 %2350  ;;  %v2222_v10 = vpop.permute.xlu0 %2221 }
 0xdbe   : > { %6855 = vmatmul.mubr.msk.bf16.vlgmr.msra.gmra.mrb[52].mxu1 %vm384_vm2, %v7928_v59  ;;  %v2356_v11 = vsel %vm384_vm2, %v2351_v8, 0 }
 0xdbf   : > { %6865 = vmatpush3.bf16.xpose.msra.mxu1 %v2102_v2  ;;  %6866 = vmatprep.mubr.msk.bf16.mxu1 %vm7530_vm1, %v7529_v5 }
 0xdc0   : > { %6876 = vmatprep.subr.bf16.mxu1 %v7529_v5 }
 0xdc1   : > { %v2349_v13 = vpop.permute.xlu0 %2348 }
 0xdc6   : > { %6867 = vmatmul.mubr.msk.bf16.vlgmr.msra.gmra.mrb[56].mxu1 %vm384_vm2, %v2095_v4 }
 0xdc7   : > { %6877 = vmatpush3.bf16.xpose.msra.mxu1 %v2229_v6  ;;  %6878 = vmatprep.mubr.msk.bf16.mxu1 %vm7530_vm1, %v7529_v5 }
 0xdc8   : > { %6888 = vmatprep.subr.bf16.mxu1 %v7529_v5 }
 0xdce   : > { %6879 = vmatmul.mubr.msk.bf16.vlgmr.msra.gmra.mrb[60].mxu1 %vm384_vm2, %v2222_v10 }
 0xdcf   : > { %6889 = vmatpush3.bf16.xpose.msra.mxu1 %v2356_v11  ;;  %6890 = vmatprep.mubr.msk.bf16.mxu1 %vm7530_vm1, %v7529_v5 }
 0xdd0   : > { %6900 = vmatprep.subr.bf16.mxu1 %v7529_v5 }
 0xdd6   : > { %6891 = vmatmul.mubr.msk.bf16.vlgmr.msra.gmra.mrb[64].mxu1 %vm384_vm2, %v2349_v13 }
 0xdd7   : > { %6904 = vmatprep.mubr.msk.bf16.mxu1 %vm7530_vm1, %v7529_v5 }
 0xe91   : > { %v2015_v14 = vpop.f32.mrb[52].mxu1 }
 0xe92   : > { %v6856_v15 = vpop.f32.mrb[53].mxu1  ;;  %v2022_v16 = vsel %vm2021_vm10, %v2015_v14, -inf }
 0xe93   : > { %2023 = vmax.xlane.f32.xlu1 %v2022_v16  ;;  %v2018_v17 = vpop.f32.mrb[54].mxu1 }
 0xe94   : > { %v6857_v18 = vpop.f32.mrb[55].mxu1 }
 0xe99   : > { %v2138_v19 = vpop.f32.mrb[56].mxu1 }
 0xe9a   : > { %v6868_v9 = vpop.f32.mrb[57].mxu1  ;;  %v2144_v21 = vsel %vm2021_vm10, %v2138_v19, -inf }
 0xe9b   : > { %2145 = vmax.xlane.f32.xlu0 %v2144_v21  ;;  %v2141_v23 = vpop.f32.mrb[58].mxu1 }
 0xe9c   : > { %v6869_v24 = vpop.f32.mrb[59].mxu1  ;;  %v7306_v23 = vld [vmem:[%s8770_s4 + $0x4] ss:$16 sps:$4 sm:$0xff]  }
 0xea1   : > { %v2265_v25 = vpop.f32.mrb[60].mxu1 }
 0xea2   : > { %v6880_v26 = vpop.f32.mrb[61].mxu1  ;;  %v2271_v12 = vsel %vm2021_vm10, %v2265_v25, -inf }
 0xea3   : > { %2272 = vmax.xlane.f32.xlu0 %v2271_v12  ;;  %v2268_v7 = vpop.f32.mrb[62].mxu1  ;;  %v7304_v12 = vld [vmem:[%s8770_s4] ss:$16 sps:$4 sm:$0xff]  }
 0xea4   : > { %v6881_v28 = vpop.f32.mrb[63].mxu1 }
 0xea5   : > { %v7309_v28 = vld [vmem:[%s8770_s4 + $0x24] ss:$16 sps:$4 sm:$0xff]  }
 0xea9   : > { %v2392_v27 = vpop.f32.mrb[64].mxu1 }
 0xeaa   : > { %v6892_v36 = vpop.f32.mrb[65].mxu1  ;;  %v2398_v30 = vsel %vm2021_vm10, %v2392_v27, -inf }
 0xeab   : > { %2399 = vmax.xlane.f32.xlu1 %v2398_v30  ;;  %v2395_v31 = vpop.f32.mrb[66].mxu1  ;;  %v7312_v36 = vld [vmem:[%s8770_s4 + $0x44] ss:$16 sps:$4 sm:$0xff]   ;;  %v7310_v30 = vld [vmem:[%s8770_s4 + $0x40] ss:$16 sps:$4 sm:$0xff]  }
 0xeac   : > { %v6893_v33 = vpop.f32.mrb[67].mxu1  ;;  %v7315_v31 = vld [vmem:[%s8770_s4 + $0x64] ss:$16 sps:$4 sm:$0xff]  }
 0xead   : > { %v2548_v33 = vld [vmem:[%s8020_s10] sm:$0xff]  }
 0xebc   : > { %2034 = vrot.lane.b32.xlu1 %v7928_v59, %s7532_s8 }
 0xf20   : > { %v2024_v34 = vpop.xlane.xlu1 %2023 }
 0xf21   : > { %v2025_v35 = vsub.f32 %v2015_v14, %v2024_v34  ;;  %v7313_v34 = vld [vmem:[%s8770_s4 + $0x60] ss:$16 sps:$4 sm:$0xff]  }
 0xf23   : > { %v2026_v37 = vmul.f32 1.442695, %v2025_v35  ;;  %v2550_v35 = vld [vmem:[%s8020_s10 + $0x8] sm:$0xf] }
 0xf25   : > { %7393 = vpow2.f32 %v2026_v37  ;;  %v6322_v37 = vcombine.low %v2550_v35, %v2550_v35 }
 0xf28   : > { %v2146_v38 = vpop.xlane.xlu0 %2145 }
 0xf29   : > { %v2147_v39 = vsub.f32 %v2138_v19, %v2146_v38 }
 0xf2b   : > { %v2148_v40 = vmul.f32 1.442695, %v2147_v39  ;;  %v2091_v39 = vld [vmem:[#allocation3] sm:$0x3] }
 0xf2d   : > { %7395 = vpow2.f32 %v2148_v40 }
 0xf2f   : > { %v7394_v41 = vpop.eup %7393 }
 0xf30   : > { %v2273_v42 = vpop.xlane.xlu0 %2272  ;;  %v2028_v43 = vsel %vm2021_vm10, %v7394_v41, 0.0 }
 0xf31   : > { %v2274_v44 = vsub.f32 %v2265_v25, %v2273_v42  ;;  %2029 = vadd.xlane.f32.xlu0 %v2028_v43 }
 0xf33   : > { %v2275_v47 = vmul.f32 1.442695, %v2274_v44 }
 0xf35   : > { %7397 = vpow2.f32 %v2275_v47  ;;  %v7548_v47 = vmov 1983009808  }
 0xf37   : > { %v7396_v48 = vpop.eup %7395 }
 0xf38   : > { %v2400_v52 = vpop.xlane.xlu1 %2399  ;;  %v2150_v53 = vsel %vm2021_vm10, %v7396_v48, 0.0 }
 0xf39   : > { %v2401_v54 = vsub.f32 %v2392_v27, %v2400_v52  ;;  %2151 = vadd.xlane.f32.xlu1 %v2150_v53  ;;  %v7307_v27 = vld [vmem:[%s8770_s4 + $0x20] ss:$16 sps:$4 sm:$0xff]   ;;  %v8038_v52 = vshrl.u32 %v2209_v50, 7 }
 0xf3b   : > { %v2402_v56 = vmul.f32 1.442695, %v2401_v54 }
 0xf3c   : > { %v2035_v57 = vpop.permute.xlu1 %2034 }
 0xf3d   : > { %7399 = vpow2.f32 %v2402_v56  ;;  %v2045_v58 = vand.u32 %v2043_v55, %v2035_v57 }
 0xf3f   : > { %v7398_v60 = vpop.eup %7397  ;;  %6859 = vmatpush3.bf16.msra.mxu0 %v2045_v58 }
 0xf40   : > { %v2277_v61 = vsel %vm2021_vm10, %v7398_v60, 0.0  ;;  %6870 = vmatprep.subr.bf16.mxu0 %v7529_v5 }
 0xf41   : > { %2278 = vadd.xlane.f32.xlu0 %v2277_v61  ;;  %v7317_v61 = vld [vmem:[%s8769_s3 + $0x4] ss:$16 sps:$4 sm:$0xff]  }
 0xf47   : > { %v7400_v62 = vpop.eup %7399 }
 0xf48   : > { %v2404_v63 = vsel %vm2021_vm10, %v7400_v62, 0.0  ;;  %vm2343_vm10 = vcmask 189568  }
 0xf49   : > { %2405 = vadd.xlane.f32.xlu0 %v2404_v63  ;;  %vm2344_vm11 = vmand %vm2343_vm10, %vm2089_vm4 }
 0xf4a   : > { %2283 = vrot.lane.b32.xlu1 %v7928_v59, %s7538_s14 }
 0xf4e   : > { %2410 = vrot.lane.b32.xlu1 %v7928_v59, %s7541_s17 }
 0xf5f   : > { %2156 = vrot.lane.b32.xlu0 %v7928_v59, %s7535_s11 }
 0xfbe   : > { %v2030_v1 = vpop.xlane.xlu0 %2029 }
 0xfbf   : > { %7401 = vrcp.f32 %v2030_v1  ;;  %v7318_v1 = vld [vmem:[%s8769_s3 + $0x24] ss:$16 sps:$4 sm:$0xff]  }
 0xfc6   : > { %v2152_v3 = vpop.xlane.xlu1 %2151 }
 0xfc7   : > { %7403 = vrcp.f32 %v2152_v3 }
 0xfc9   : > { %v7402_v2 = vpop.eup %7401 }
 0xfca   : > { %v2032_v4 = vmul.f32 %v7402_v2, %v7394_v41  ;;  %v2284_v15 = vpop.permute.xlu1 %2283 }
 0xfcb   : > { %v2289_v18 = vand.u32 %v2284_v15, %v2043_v55 }
 0xfcc   : > { %v2033_v6 = vpack.c.bf16 %v2032_v4, %v2032_v4 }
 0xfce   : > { %6861 = vmatmul.mubr.msk.bf16.vlgmr.msra.gmra.mrb[56].mxu0 %vm2036_vm13, %v2033_v6  ;;  %v2279_v8 = vpop.xlane.xlu0 %2278  ;;  %v2411_v9 = vpop.permute.xlu1 %2410 }
 0xfcf   : > { %6872 = vmatprep.mubr.msk.bf16.mxu0 %vm7530_vm1, %v7529_v5  ;;  %7405 = vrcp.f32 %v2279_v8  ;;  %v2416_v25 = vand.u32 %v2411_v9, %v2043_v55 }
 0xfd1   : > { %v7404_v10 = vpop.eup %7403 }
 0xfd2   : > { %v2154_v13 = vmul.f32 %v7404_v10, %v7396_v48  ;;  %v2207_v48 = vunpack.c.l.s4 %v7548_v47 }
 0xfd4   : > { %v2155_v16 = vpack.c.bf16 %v2154_v13, %v2154_v13  ;;  %v2208_v51 = vunpack.c.0.s8 %v2207_v48 }
 0xfd6   : > { %v2406_v59 = vpop.xlane.xlu0 %2405  ;;  %v2211_v53 = vsub.s32 %v2208_v51, %v8038_v52 }
 0xfd7   : > { %7407 = vrcp.f32 %v2406_v59 }
 0xfd9   : > { %v7406_v17 = vpop.eup %7405 }
 0xfda   : > { %v2157_v11 = vpop.permute.xlu0 %2156  ;;  %v2281_v19 = vmul.f32 %v7406_v17, %v7398_v60 }
 0xfdb   : > { %v2162_v14 = vand.u32 %v2157_v11, %v2043_v55 }
 0xfdc   : > { %v2282_v21 = vpack.c.bf16 %v2281_v19, %v2281_v19 }
 0xfdd   : > { %6871 = vmatpush3.bf16.msra.mxu0 %v2162_v14 }
 0xfde   : > { %6882 = vmatprep.subr.bf16.mxu0 %v7529_v5 }
 0xfe0   : > { %6873 = vmatmul.mubr.msk.bf16.vlgmr.msra.gmra.mrb[60].mxu0 %vm2036_vm13, %v2155_v16 }
 0xfe1   : > { %6883 = vmatpush3.bf16.msra.mxu0 %v2289_v18  ;;  %6884 = vmatprep.mubr.msk.bf16.mxu0 %vm7530_vm1, %v7529_v5  ;;  %v7408_v24 = vpop.eup %7407 }
 0xfe2   : > { %6894 = vmatprep.subr.bf16.mxu0 %v7529_v5  ;;  %v2408_v26 = vmul.f32 %v7408_v24, %v7400_v62 }
 0xfe4   : > { %v2409_v7 = vpack.c.bf16 %v2408_v26, %v2408_v26 }
 0xfe8   : > { %6885 = vmatmul.mubr.msk.bf16.vlgmr.msra.gmra.mrb[64].mxu0 %vm2036_vm13, %v2282_v21 }
 0xfe9   : > { %6895 = vmatpush3.bf16.msra.mxu0 %v2416_v25  ;;  %6896 = vmatprep.mubr.msk.bf16.mxu0 %vm7530_vm1, %v7529_v5 }
 0xfea   : > { %2623 = vmatprep.subr.bf16.mxu0 %v7306_v23 }
 0xff0   : > { %6897 = vmatmul.mubr.msk.bf16.vlgmr.msra.gmra.mrb[68].mxu0 %vm2036_vm13, %v2409_v7  ;;  %vm2471_vm13 = vmand %vm2470_vm12, %vm2089_vm4 }
 0xff1   : > { %2624 = vmatpush1.bf16.msra.mxu0 %v7304_v12  ;;  %2655 = vmatprep.mubr.bf16.mxu0 %v7547_v0 }
 0xff2   : > { %2625 = vmatprep.subr.bf16.mxu0 %v7309_v28 }
 0xff5   : > { %2626 = vmatpush1.bf16.msra.mxu0 %v7307_v27 }
 0xff6   : > { %2627 = vmatprep.subr.bf16.mxu0 %v7312_v36 }
 0xff9   : > { %2628 = vmatpush1.bf16.msra.mxu0 %v7310_v30 }
 0xffa   : > { %2629 = vmatprep.subr.bf16.mxu0 %v7315_v31 }
 0xffd   : > { %2630 = vmatpush1.bf16.msra.mxu0 %v7313_v34 }
 0xffe   : > { %6926 = vmatprep.subr.bf16.mxu0 %v7529_v5 }
0x1000   : > { %6331 = vmatmul.mubr.msk.bf16.vlgmr.msra.gmra.mrb[72].mxu0 %vm2616_vm14, %v2548_v33 }
0x1001   : > { %2665 = vmatprep.mubr.bf16.mxu0 %v7547_v0 }
0x1008   : > { %6332 = vmatmul.mubr.msk.bf16.gmra.mrb[76].mxu0 %vm2616_vm14, %v6322_v37 }
0x1009   : > { %6928 = vmatprep.mubr.msk.bf16.mxu0 %vm7530_vm1, %v7529_v5 }
0x10a1   : > { %v2081_v38 = vpop.f32.mrb[56].mxu0 }
0x10a2   : > { %v2087_v40 = vpack.c.bf16 %v2081_v38, %v2081_v38  ;;  %v6862_v41 = vpop.f32.mrb[57].mxu0 }
0x10a3   : > { %v2084_v42 = vpop.f32.mrb[58].mxu0 }
0x10a4   : > { %v2092_v43 = vsel %vm2090_vm5, %v2087_v40, %v2091_v39  ;;  %v6863_v44 = vpop.f32.mrb[59].mxu0  ;;  %vm3015_vm5 = vcmask 125952  }
0x10a5   : > { %2093 = vst [vmem:[#allocation3] sm:$0x3] %v2092_v43 }
0x10ac   : > { %v2218_v7 = vld [vmem:[#allocation3] sm:$0x3] }
0x10b3   : > { %v2198_v54 = vpop.f32.mrb[60].mxu0 }
0x10b4   : > { %v2204_v55 = vpack.c.bf16 %v2198_v54, %v2198_v54  ;;  %v6874_v56 = vpop.f32.mrb[61].mxu0 }
0x10b5   : > { %v2201_v57 = vpop.f32.mrb[62].mxu0 }
0x10b6   : > { %v2212_v58 = vrot.slane %v2204_v55, %v2211_v53  ;;  %v6875_v60 = vpop.f32.mrb[63].mxu0  ;;  %v8105_v55 = vand.u32 127, %v2209_v50 }
0x10b8   : > { %2213 = vrot.lane.b32.xlu1 %v2212_v58, %s7542_s18  ;;  %vm2558_vm4 = vcmp.ge.s32.totalorder %v8038_v52, %v8105_v55  ;;  %v7549_v58 = vmov -1e+30  }
0x10b9   : > { %v8109_v60 = vsel %vm2558_vm4, 0.0, %v7549_v58 }
0x10bb   : > { %v2325_v62 = vpop.f32.mrb[64].mxu0 }
0x10bc   : > { %v2331_v63 = vpack.c.bf16 %v2325_v62, %v2325_v62  ;;  %v6886_v0 = vpop.f32.mrb[65].mxu0  ;;  %2490 = vrot.lane.b32.xlu1 %v7317_v61, %s7545_s25 }
0x10bd   : > { %v2328_v2 = vpop.f32.mrb[66].mxu0 }
0x10be   : > { %v2339_v3 = vrot.slane %v2331_v63, %v2211_v53  ;;  %v6887_v4 = vpop.f32.mrb[67].mxu0 }
0x10c0   : > { %2340 = vrot.lane.b32.xlu0 %v2339_v3, %s7543_s19  ;;  %2492 = vrot.lane.b32.xlu1 %v7318_v1, %s7545_s25 }
0x10c3   : > { %v2452_v6 = vpop.f32.mrb[68].mxu0 }
0x10c4   : > { %v2458_v8 = vpack.c.bf16 %v2452_v6, %v2452_v6  ;;  %v6898_v59 = vpop.f32.mrb[69].mxu0 }
0x10c5   : > { %v2455_v10 = vpop.f32.mrb[70].mxu0 }
0x10c6   : > { %v2466_v11 = vrot.slane %v2458_v8, %v2211_v53  ;;  %v6899_v13 = vpop.f32.mrb[71].mxu0 }
0x10c8   : > { %2467 = vrot.lane.b32.xlu0 %v2466_v11, %s7544_s20 }
0x10d3   : > { %v2657_v14 = vpop.f32.mrb[72].mxu0 }
0x10d4   : > { %v8052_v15 = vpack.c.bf16 %v2657_v14, %v2657_v14  ;;  %v2659_v16 = vpop.f32.mrb[73].mxu0 }
0x10d5   : > { %v8054_v17 = vpack.c.bf16 %v2659_v16, %v2659_v16  ;;  %v2661_v18 = vpop.f32.mrb[74].mxu0 }
0x10d6   : > { %2678 = vrot.lane.b32.xlu0 %v8052_v15, %s7532_s8  ;;  %v8058_v19 = vpack.c.bf16 %v2661_v18, %v2661_v18  ;;  %v2663_v9 = vpop.f32.mrb[75].mxu0 }
0x10d7   : > { %v2868_v21 = vsel %vm570_vm3, %v8054_v17, 0  ;;  %v8093_v48 = vpack.c.bf16 %v2663_v9, %v2663_v9 }
0x10d8   : > { %2728 = vrot.lane.b32.xlu1 %v8058_v19, %s7532_s8  ;;  %6927 = vmatpush3.bf16.msra.mxu0 %v2868_v21 }
0x10d9   : > { %6938 = vmatprep.subr.bf16.mxu0 %v7529_v5  ;;  %v2914_v51 = vsel %vm570_vm3, %v8093_v48, 0 }
0x10db   : > { %v2667_v23 = vpop.f32.mrb[76].mxu0 }
0x10dc   : > { %v8065_v24 = vpack.c.bf16 %v2667_v23, %v2667_v23  ;;  %v8067_v25 = vpop.f32.mrb[77].mxu0 }
0x10dd   : > { %v2671_v26 = vpop.f32.mrb[78].mxu0 }
0x10de   : > { %2777 = vrot.lane.b32.xlu0 %v8065_v24, %s7532_s8  ;;  %v2672_v12 = vpop.f32.mrb[79].mxu0 }
0x112a   : > { %v2214_v28 = vpop.permute.xlu1 %2213 }
0x112b   : > { %v2219_v27 = vsel %vm2217_vm7, %v2214_v28, %v2218_v7  ;;  %vm3724_vm7 = vcmask 388352  }
0x112c   : > { %2220 = vst [vmem:[#allocation3] sm:$0x3] %v2219_v27 }
0x112e   : > { %v2491_v36 = vpop.permute.xlu1 %2490 }
0x112f   : > { %6901 = vmatpush3.bf16.msra.mxu1 %v2491_v36 }
0x1130   : > { %6902 = vmatprep.subr.bf16.mxu1 %v7529_v5 }
0x1132   : > { %v2341_v30 = vpop.permute.xlu0 %2340  ;;  %v2493_v31 = vpop.permute.xlu1 %2492 }
0x1133   : > { %v2345_v33 = vld [vmem:[#allocation3] sm:$0x3]  ;;  %6903 = vmatpush3.bf16.msra.mxu1 %v2493_v31 }
0x1134   : > { %v2346_v34 = vsel %vm2344_vm11, %v2341_v30, %v2345_v33  ;;  %6908 = vmatprep.subr.bf16.mxu1 %v7529_v5 }
0x1135   : > { %2347 = vst [vmem:[#allocation3] sm:$0x3] %v2346_v34 }
0x113a   : > { %v2468_v37 = vpop.permute.xlu0 %2467 }
0x113c   : > { %v2472_v35 = vld [vmem:[#allocation3] sm:$0x3] }
0x113d   : > { %v2473_v38 = vsel %vm2471_vm13, %v2468_v37, %v2472_v35  ;;  %vm6145_vm13 = vcmp.eq.s32.totalorder %v8105_v55, 16 }
0x113e   : > { %2474 = vst [vmem:[#allocation3] sm:$0x3] %v2473_v38 }
0x1145   : > { %v2475_v39 = vld [vmem:[#allocation3] sm:$0x3] }
0x1146   : > { %6905 = vmatmul.mubr.msk.bf16.vlgmr.msra.gmra.mrb[68].mxu1 %vm323_vm0, %v2475_v39 }
0x1147   : > { %6910 = vmatprep.mubr.msk.bf16.mxu1 %vm7530_vm1, %v7529_v5 }
0x1148   : > { %v2679_v40 = vpop.permute.xlu0 %2678 }
0x1149   : > { %v2685_v41 = vsel %vm2680_vm15, %v2679_v40, 0 }
0x114a   : > { %6909 = vmatpush3.bf16.xpose.msra.mxu1 %v2685_v41  ;;  %v2729_v42 = vpop.permute.xlu1 %2728  ;;  %v8134_v41 = vpack.c.bf16 %v8067_v25, %v8067_v25 }
0x114b   : > { %6914 = vmatprep.subr.bf16.mxu1 %v7529_v5  ;;  %v2734_v43 = vsel %vm2680_vm15, %v2729_v42, 0 }
0x1150   : > { %v2778_v44 = vpop.permute.xlu0 %2777 }
0x1151   : > { %6911 = vmatmul.mubr.msk.bf16.vlgmr.msra.gmra.mrb[72].mxu1 %vm2680_vm15, %v8052_v15  ;;  %v2783_v47 = vsel %vm2680_vm15, %v2778_v44, 0  ;;  %v2960_v44 = vsel %vm570_vm3, %v8134_v41, 0 }
0x1152   : > { %6915 = vmatpush3.bf16.xpose.msra.mxu1 %v2734_v43  ;;  %6916 = vmatprep.mubr.msk.bf16.mxu1 %vm7530_vm1, %v7529_v5 }
0x1153   : > { %6920 = vmatprep.subr.bf16.mxu1 %v7529_v5 }
0x1159   : > { %6917 = vmatmul.mubr.msk.bf16.vlgmr.msra.gmra.mrb[76].mxu1 %vm2680_vm15, %v8058_v19 }
0x115a   : > { %6921 = vmatpush3.bf16.xpose.msra.mxu1 %v2783_v47  ;;  %6922 = vmatprep.mubr.msk.bf16.mxu1 %vm7530_vm1, %v7529_v5 }
0x115b   : > { %6932 = vmatprep.subr.bf16.mxu1 %v7529_v5 }
0x1161   : > { %6923 = vmatmul.mubr.msk.bf16.vlgmr.msra.gmra.mrb[80].mxu1 %vm2680_vm15, %v8065_v24 }
0x1162   : > { %6933 = vmatpush3.bf16.msra.mxu1 %v2914_v51  ;;  %6934 = vmatprep.mubr.msk.bf16.mxu1 %vm7530_vm1, %v7529_v5 }
0x1163   : > { %6944 = vmatprep.subr.bf16.mxu1 %v7529_v5 }
0x1219   : > { %v8102_v53 = vpop.f32.mrb[68].mxu1 }
0x121a   : > { %v6906_v54 = vpop.f32.mrb[69].mxu1 }
0x121b   : > { %v2536_v56 = vpop.f32.mrb[70].mxu1 }
0x121c   : > { %v6907_v57 = vpop.f32.mrb[71].mxu1 }
0x1224   : > { %v2721_v61 = vpop.f32.mrb[72].mxu1 }
0x1225   : > { %v2722_v62 = vadd.f32 %v2721_v61, %v8109_v60  ;;  %v6912_v63 = vpop.f32.mrb[73].mxu1 }
0x1226   : > { %v2724_v0 = vpop.f32.mrb[74].mxu1 }
0x1227   : > { %v6913_v1 = vpop.f32.mrb[75].mxu1  ;;  %v2825_v2 = vsel %vm384_vm2, %v2722_v62, -inf }
0x1228   : > { %2826 = vmax.xlane.f32.xlu1 %v2825_v2 }
0x122c   : > { %v2770_v3 = vpop.f32.mrb[76].mxu1 }
0x122d   : > { %v2771_v50 = vadd.f32 %v2770_v3, %v8109_v60  ;;  %v6918_v4 = vpop.f32.mrb[77].mxu1 }
0x122e   : > { %v2773_v6 = vpop.f32.mrb[78].mxu1 }
0x122f   : > { %v6919_v8 = vpop.f32.mrb[79].mxu1  ;;  %v2828_v59 = vsel %vm384_vm2, %v2771_v50, -inf }
0x1230   : > { %2829 = vmax.xlane.f32.xlu0 %v2828_v59 }
0x1234   : > { %v2819_v10 = vpop.f32.mrb[80].mxu1 }
0x1235   : > { %v2820_v11 = vadd.f32 %v2819_v10, %v8109_v60  ;;  %v6924_v13 = vpop.f32.mrb[81].mxu1 }
0x1236   : > { %v2822_v14 = vpop.f32.mrb[82].mxu1 }
0x1237   : > { %v6925_v16 = vpop.f32.mrb[83].mxu1  ;;  %v2831_v18 = vsel %vm384_vm2, %v2820_v11, -inf }
0x1238   : > { %2832 = vmax.xlane.f32.xlu0 %v2831_v18 }
0x12b5   : > { %v2827_v9 = vpop.xlane.xlu1 %2826 }
0x12b6   : > { %v2834_v21 = vsub.f32 %v2722_v62, %v2827_v9 }
0x12b8   : > { %v2837_v23 = vmul.f32 1.442695, %v2834_v21 }
0x12ba   : > { %7409 = vpow2.f32 %v2837_v23 }
0x12bd   : > { %v2830_v26 = vpop.xlane.xlu0 %2829 }
0x12be   : > { %v2835_v12 = vsub.f32 %v2771_v50, %v2830_v26 }
0x12c0   : > { %v2839_v7 = vmul.f32 1.442695, %v2835_v12 }
0x12c2   : > { %7411 = vpow2.f32 %v2839_v7 }
0x12c4   : > { %v7410_v28 = vpop.eup %7409 }
0x12c5   : > { %v2843_v27 = vsel %vm384_vm2, %v7410_v28, 0.0  ;;  %v2833_v31 = vpop.xlane.xlu0 %2832 }
0x12c6   : > { %2844 = vadd.xlane.f32.xlu1 %v2843_v27  ;;  %v2836_v33 = vsub.f32 %v2820_v11, %v2833_v31 }
0x12c8   : > { %v2841_v34 = vmul.f32 1.442695, %v2836_v33 }
0x12ca   : > { %7413 = vpow2.f32 %v2841_v34 }
0x12cc   : > { %v7412_v36 = vpop.eup %7411 }
0x12cd   : > { %v2846_v30 = vsel %vm384_vm2, %v7412_v36, 0.0 }
0x12ce   : > { %2847 = vadd.xlane.f32.xlu0 %v2846_v30 }
0x12d4   : > { %v7414_v35 = vpop.eup %7413 }
0x12d5   : > { %v2849_v37 = vsel %vm384_vm2, %v7414_v35, 0.0 }
0x12d7   : > { %3071 = vrot.lane.b32.xlu1 %v8058_v19, %s7538_s14 }
0x12e4   : > { %3021 = vrot.lane.b32.xlu0 %v8052_v15, %s7538_s14 }
0x12e8   : > { %3121 = vrot.lane.b32.xlu0 %v8065_v24, %s7538_s14 }
0x12ec   : > { %3119 = vrot.lane.b32.xlu0 %v8065_v24, %s7537_s13 }
0x12fb   : > { %2850 = vadd.xlane.f32.xlu1 %v2849_v37 }
0x130c   : > { %3019 = vrot.lane.b32.xlu1 %v8052_v15, %s7537_s13 }
0x1310   : > { %3069 = vrot.lane.b32.xlu1 %v8058_v19, %s7537_s13 }
0x1353   : > { %v2845_v38 = vpop.xlane.xlu1 %2844 }
0x1354   : > { %7415 = vrcp.f32 %v2845_v38 }
0x1357   : > { %v3072_v57 = vpop.permute.xlu1 %3071 }
0x1358   : > { %v3077_v50 = vsel %vm2680_vm15, %v3072_v57, 0 }
0x135b   : > { %v2848_v39 = vpop.xlane.xlu0 %2847 }
0x135c   : > { %7417 = vrcp.f32 %v2848_v39 }
0x135e   : > { %v7416_v40 = vpop.eup %7415 }
0x135f   : > { %v2855_v42 = vmul.f32 %v7416_v40, %v7410_v28  ;;  %v3022_v54 = vpop.permute.xlu0 %3021 }
0x1360   : > { %v3027_v25 = vsel %vm2680_vm15, %v3022_v54, 0 }
0x1361   : > { %v2858_v43 = vpack.c.bf16 %v2855_v42, %v2855_v42 }
0x1363   : > { %6929 = vmatmul.mubr.msk.bf16.vlgmr.msra.gmra.mrb[80].mxu0 %vm384_vm2, %v2858_v43  ;;  %v3122_v61 = vpop.permute.xlu0 %3121 }
0x1364   : > { %6939 = vmatpush3.bf16.msra.mxu0 %v2960_v44  ;;  %6940 = vmatprep.mubr.msk.bf16.mxu0 %vm7530_vm1, %v7529_v5  ;;  %v3127_v63 = vsel %vm2680_vm15, %v3122_v61, 0 }
0x1365   : > { %6950 = vmatprep.subr.bf16.mxu0 %v7529_v5 }
0x1366   : > { %v7418_v47 = vpop.eup %7417 }
0x1367   : > { %v2856_v51 = vmul.f32 %v7418_v47, %v7412_v36  ;;  %v3120_v1 = vpop.permute.xlu0 %3119 }
0x1369   : > { %v2859_v56 = vpack.c.bf16 %v2856_v51, %v2856_v51 }
0x136b   : > { %6935 = vmatmul.mubr.msk.bf16.vlgmr.msra.gmra.mrb[84].mxu1 %vm384_vm2, %v2859_v56 }
0x136c   : > { %6945 = vmatpush3.bf16.xpose.msra.mxu1 %v3027_v25  ;;  %6946 = vmatprep.mubr.msk.bf16.mxu1 %vm7530_vm1, %v7529_v5 }
0x136d   : > { %6956 = vmatprep.subr.bf16.mxu1 %v7529_v5 }
0x1388   : > { %v2851_v58 = vpop.xlane.xlu1 %2850 }
0x1389   : > { %7419 = vrcp.f32 %v2851_v58 }
0x138c   : > { %v3020_v62 = vpop.permute.xlu1 %3019 }
0x138d   : > { %6947 = vmatmul.mubr.msk.bf16.vlgmr.msra.gmra.mrb[88].mxu1 %vm2680_vm15, %v3020_v62 }
0x138e   : > { %6957 = vmatpush3.bf16.xpose.msra.mxu1 %v3127_v63  ;;  %6958 = vmatprep.mubr.msk.bf16.mxu1 %vm7530_vm1, %v7529_v5 }
0x138f   : > { %6968 = vmatprep.subr.bf16.mxu1 %v7529_v5 }
0x1390   : > { %v3070_v4 = vpop.permute.xlu1 %3069 }
0x1393   : > { %v7420_v0 = vpop.eup %7419 }
0x1394   : > { %v2857_v2 = vmul.f32 %v7420_v0, %v7414_v35 }
0x1395   : > { %6959 = vmatmul.mubr.msk.bf16.vlgmr.msra.gmra.mrb[92].mxu1 %vm2680_vm15, %v3120_v1 }
0x1396   : > { %v2860_v3 = vpack.c.bf16 %v2857_v2, %v2857_v2  ;;  %6970 = vmatprep.mubr.msk.bf16.mxu1 %vm7530_vm1, %v7529_v5 }
0x1398   : > { %6941 = vmatmul.mubr.msk.bf16.vlgmr.msra.gmra.mrb[84].mxu0 %vm384_vm2, %v2860_v3 }
0x1399   : > { %6951 = vmatpush3.bf16.xpose.msra.mxu0 %v3077_v50  ;;  %6952 = vmatprep.mubr.msk.bf16.mxu0 %vm7530_vm1, %v7529_v5 }
0x139a   : > { %6962 = vmatprep.subr.bf16.mxu0 %v7529_v5 }
0x13a0   : > { %6953 = vmatmul.mubr.msk.bf16.vlgmr.msra.gmra.mrb[88].mxu0 %vm2680_vm15, %v3070_v4 }
0x13a1   : > { %6964 = vmatprep.mubr.msk.bf16.mxu0 %vm7530_vm1, %v7529_v5 }
0x1436   : > { %v2904_v6 = vpop.f32.mrb[80].mxu0 }
0x1437   : > { %v6455_v8 = vpack.c.bf16 %v2904_v6, %v2904_v6  ;;  %v6930_v59 = vpop.f32.mrb[81].mxu0 }
0x1438   : > { %v2907_v10 = vpop.f32.mrb[82].mxu0 }
0x1439   : > { %3016 = vst.msk [vmem:[#allocation4] sm:$0xf] %vm3015_vm5, %v6455_v8  ;;  %v6931_v11 = vpop.f32.mrb[83].mxu0 }
0x143e   : > { %v2950_v13 = vpop.f32.mrb[84].mxu1 }
0x143f   : > { %v6456_v14 = vpack.c.bf16 %v2950_v13, %v2950_v13  ;;  %v6936_v16 = vpop.f32.mrb[85].mxu1 }
0x1440   : > { %v2953_v18 = vpop.f32.mrb[86].mxu1 }
0x1441   : > { %3017 = vst.msk [vmem:[#allocation4 + $0x4] sm:$0xf] %vm3015_vm5, %v6456_v14  ;;  %v6937_v9 = vpop.f32.mrb[87].mxu1 }
0x1460   : > { %v3063_v21 = vpop.f32.mrb[88].mxu1 }
0x1461   : > { %v3064_v23 = vadd.f32 %v3063_v21, %v8109_v60  ;;  %v6948_v26 = vpop.f32.mrb[89].mxu1 }
0x1462   : > { %v3066_v12 = vpop.f32.mrb[90].mxu1 }
0x1463   : > { %v6949_v7 = vpop.f32.mrb[91].mxu1  ;;  %v3169_v28 = vsel %vm384_vm2, %v3064_v23, -inf }
0x1464   : > { %3170 = vmax.xlane.f32.xlu1 %v3169_v28 }
0x1468   : > { %v3163_v27 = vpop.f32.mrb[92].mxu1 }
0x1469   : > { %v6960_v36 = vpop.f32.mrb[93].mxu1  ;;  %v3164_v44 = vadd.f32 %v3163_v27, %v8109_v60 }
0x146a   : > { %v3166_v30 = vpop.f32.mrb[94].mxu1 }
0x146b   : > { %v2996_v31 = vpop.f32.mrb[84].mxu0  ;;  %v6961_v33 = vpop.f32.mrb[95].mxu1  ;;  %v3175_v54 = vsel %vm384_vm2, %v3164_v44, -inf }
0x146c   : > { %v6457_v34 = vpack.c.bf16 %v2996_v31, %v2996_v31  ;;  %v6942_v35 = vpop.f32.mrb[85].mxu0 }
0x146d   : > { %v2999_v37 = vpop.f32.mrb[86].mxu0 }
0x146e   : > { %3018 = vst.msk [vmem:[#allocation4 + $0x8] sm:$0xf] %vm3015_vm5, %v6457_v34  ;;  %v6943_v38 = vpop.f32.mrb[87].mxu0 }
0x1473   : > { %v3113_v39 = vpop.f32.mrb[88].mxu0 }
0x1474   : > { %v3114_v40 = vadd.f32 %v3113_v39, %v8109_v60  ;;  %v6954_v42 = vpop.f32.mrb[89].mxu0 }
0x1475   : > { %3255 = vrot.lane.b32.xlu1 %v8093_v48, %s7537_s13  ;;  %v3116_v43 = vpop.f32.mrb[90].mxu0 }
0x1476   : > { %v6955_v47 = vpop.f32.mrb[91].mxu0  ;;  %v3172_v51 = vsel %vm384_vm2, %v3114_v40, -inf }
0x1477   : > { %3173 = vmax.xlane.f32.xlu0 %v3172_v51 }
0x1479   : > { %3304 = vrot.lane.b32.xlu1 %v8134_v41, %s7537_s13 }
0x147b   : > { %3176 = vmax.xlane.f32.xlu0 %v3175_v54 }
0x1491   : > { %3206 = vrot.lane.b32.xlu0 %v8054_v17, %s7537_s13 }
0x14f1   : > { %v3171_v56 = vpop.xlane.xlu1 %3170 }
0x14f2   : > { %v3178_v25 = vsub.f32 %v3064_v23, %v3171_v56 }
0x14f4   : > { %v3181_v57 = vmul.f32 1.442695, %v3178_v25 }
0x14f5   : > { %v3256_v58 = vpop.permute.xlu1 %3255 }
0x14f6   : > { %7421 = vpow2.f32 %v3181_v57  ;;  %v3261_v61 = vsel %vm570_vm3, %v3256_v58, 0 }
0x14f7   : > { %6969 = vmatpush3.bf16.msra.mxu1 %v3261_v61 }
0x14f8   : > { %6980 = vmatprep.subr.bf16.mxu1 %v7529_v5 }
0x14f9   : > { %v3305_v14 = vpop.permute.xlu1 %3304 }
0x14fa   : > { %v3310_v23 = vsel %vm570_vm3, %v3305_v14, 0 }
0x1500   : > { %v7422_v62 = vpop.eup %7421 }
0x1501   : > { %v3187_v63 = vsel %vm384_vm2, %v7422_v62, 0.0 }
0x1502   : > { %3188 = vadd.xlane.f32.xlu1 %v3187_v63 }
0x1504   : > { %v3174_v0 = vpop.xlane.xlu0 %3173 }
0x1505   : > { %v3179_v1 = vsub.f32 %v3114_v40, %v3174_v0 }
0x1507   : > { %v3183_v2 = vmul.f32 1.442695, %v3179_v1 }
0x1508   : > { %v3177_v3 = vpop.xlane.xlu0 %3176 }
0x1509   : > { %7423 = vpow2.f32 %v3183_v2  ;;  %v3180_v59 = vsub.f32 %v3164_v44, %v3177_v3 }
0x150b   : > { %v3185_v10 = vmul.f32 1.442695, %v3180_v59 }
0x150c   : > { %v3207_v50 = vpop.permute.xlu0 %3206 }
0x150d   : > { %v3212_v4 = vsel %vm570_vm3, %v3207_v50, 0  ;;  %7425 = vpow2.f32 %v3185_v10 }
0x150e   : > { %6963 = vmatpush3.bf16.msra.mxu0 %v3212_v4 }
0x150f   : > { %6974 = vmatprep.subr.bf16.mxu0 %v7529_v5 }
0x1513   : > { %v7424_v6 = vpop.eup %7423  ;;  %3427 = vrot.lane.b32.xlu1 %v8058_v19, %s7545_s25 }
0x1514   : > { %v3190_v8 = vsel %vm384_vm2, %v7424_v6, 0.0 }
0x1515   : > { %3191 = vadd.xlane.f32.xlu0 %v3190_v8 }
0x1517   : > { %v7426_v11 = vpop.eup %7425 }
0x1518   : > { %v3193_v13 = vsel %vm384_vm2, %v7426_v11, 0.0 }
0x152b   : > { %3377 = vrot.lane.b32.xlu0 %v8052_v15, %s7545_s25 }
0x152f   : > { %3375 = vrot.lane.b32.xlu0 %v8052_v15, %s7531_s7 }
0x1533   : > { %3425 = vrot.lane.b32.xlu0 %v8058_v19, %s7531_s7 }
0x1537   : > { %3194 = vadd.xlane.f32.xlu1 %v3193_v13 }
0x1548   : > { %3477 = vrot.lane.b32.xlu1 %v8065_v24, %s7545_s25 }
0x154c   : > { %3475 = vrot.lane.b32.xlu1 %v8065_v24, %s7531_s7 }
0x158f   : > { %v3189_v16 = vpop.xlane.xlu1 %3188 }
0x1590   : > { %7427 = vrcp.f32 %v3189_v16 }
0x1593   : > { %v3428_v31 = vpop.permute.xlu1 %3427 }
0x1594   : > { %v3433_v42 = vsel %vm2680_vm15, %v3428_v31, 0 }
0x159a   : > { %v7428_v18 = vpop.eup %7427 }
0x159b   : > { %v3199_v9 = vmul.f32 %v7428_v18, %v7422_v62 }
0x159d   : > { %v3202_v21 = vpack.c.bf16 %v3199_v9, %v3199_v9 }
0x159f   : > { %6965 = vmatmul.mubr.msk.bf16.vlgmr.msra.gmra.mrb[92].mxu0 %vm384_vm2, %v3202_v21 }
0x15a0   : > { %6975 = vmatpush3.bf16.msra.mxu0 %v3310_v23  ;;  %6976 = vmatprep.mubr.msk.bf16.mxu0 %vm7530_vm1, %v7529_v5 }
0x15a1   : > { %6986 = vmatprep.subr.bf16.mxu0 %v7529_v5 }
0x15a2   : > { %v3192_v26 = vpop.xlane.xlu0 %3191 }
0x15a3   : > { %7429 = vrcp.f32 %v3192_v26 }
0x15a6   : > { %v3378_v28 = vpop.permute.xlu0 %3377 }
0x15a7   : > { %v3383_v36 = vsel %vm2680_vm15, %v3378_v28, 0 }
0x15aa   : > { %v3376_v30 = vpop.permute.xlu0 %3375 }
0x15ad   : > { %v7430_v12 = vpop.eup %7429 }
0x15ae   : > { %v3200_v7 = vmul.f32 %v7430_v12, %v7424_v6  ;;  %v3426_v43 = vpop.permute.xlu0 %3425 }
0x15b0   : > { %v3203_v27 = vpack.c.bf16 %v3200_v7, %v3200_v7 }
0x15b2   : > { %6971 = vmatmul.mubr.msk.bf16.vlgmr.msra.gmra.mrb[96].mxu1 %vm384_vm2, %v3203_v27 }
0x15b3   : > { %6981 = vmatpush3.bf16.xpose.msra.mxu1 %v3383_v36  ;;  %6982 = vmatprep.mubr.msk.bf16.mxu1 %vm7530_vm1, %v7529_v5 }
0x15b4   : > { %6992 = vmatprep.subr.bf16.mxu1 %v7529_v5 }
0x15ba   : > { %6983 = vmatmul.mubr.msk.bf16.vlgmr.msra.gmra.mrb[100].mxu1 %vm2680_vm15, %v3376_v30 }
0x15bb   : > { %6994 = vmatprep.mubr.msk.bf16.mxu1 %vm7530_vm1, %v7529_v5 }
0x15c4   : > { %v3195_v33 = vpop.xlane.xlu1 %3194 }
0x15c5   : > { %7431 = vrcp.f32 %v3195_v33 }
0x15c8   : > { %v3478_v34 = vpop.permute.xlu1 %3477 }
0x15c9   : > { %v3483_v35 = vsel %vm2680_vm15, %v3478_v34, 0 }
0x15ca   : > { %6993 = vmatpush3.bf16.xpose.msra.mxu1 %v3483_v35 }
0x15cb   : > { %7004 = vmatprep.subr.bf16.mxu1 %v7529_v5 }
0x15cc   : > { %v3476_v38 = vpop.permute.xlu1 %3475 }
0x15cf   : > { %v7432_v37 = vpop.eup %7431 }
0x15d0   : > { %v3201_v39 = vmul.f32 %v7432_v37, %v7426_v11 }
0x15d1   : > { %6995 = vmatmul.mubr.msk.bf16.vlgmr.msra.gmra.mrb[104].mxu1 %vm2680_vm15, %v3476_v38 }
0x15d2   : > { %v3204_v40 = vpack.c.bf16 %v3201_v39, %v3201_v39  ;;  %7006 = vmatprep.mubr.msk.bf16.mxu1 %vm7530_vm1, %v7529_v5 }
0x15d4   : > { %6977 = vmatmul.mubr.msk.bf16.vlgmr.msra.gmra.mrb[96].mxu0 %vm384_vm2, %v3204_v40 }
0x15d5   : > { %6987 = vmatpush3.bf16.xpose.msra.mxu0 %v3433_v42  ;;  %6988 = vmatprep.mubr.msk.bf16.mxu0 %vm7530_vm1, %v7529_v5 }
0x15d6   : > { %6998 = vmatprep.subr.bf16.mxu0 %v7529_v5 }
0x15dc   : > { %6989 = vmatmul.mubr.msk.bf16.vlgmr.msra.gmra.mrb[100].mxu0 %vm2680_vm15, %v3426_v43 }
0x15dd   : > { %7000 = vmatprep.mubr.msk.bf16.mxu0 %vm7530_vm1, %v7529_v5 }
0x1672   : > { %v8223_v44 = vpop.f32.mrb[92].mxu0 }
0x1673   : > { %v6966_v47 = vpop.f32.mrb[93].mxu0 }
0x1674   : > { %v3251_v51 = vpop.f32.mrb[94].mxu0 }
0x1675   : > { %v6967_v54 = vpop.f32.mrb[95].mxu0 }
0x1685   : > { %v8225_v56 = vpop.f32.mrb[96].mxu1 }
0x1686   : > { %v6972_v25 = vpop.f32.mrb[97].mxu1 }
0x1687   : > { %v3300_v57 = vpop.f32.mrb[98].mxu1 }
0x1688   : > { %v6973_v58 = vpop.f32.mrb[99].mxu1 }
0x168d   : > { %v3419_v61 = vpop.f32.mrb[100].mxu1 }
0x168e   : > { %v3420_v62 = vadd.f32 %v3419_v61, %v8109_v60  ;;  %v6984_v63 = vpop.f32.mrb[101].mxu1 }
0x168f   : > { %v3422_v0 = vpop.f32.mrb[102].mxu1 }
0x1690   : > { %v6985_v1 = vpop.f32.mrb[103].mxu1  ;;  %v3525_v2 = vsel %vm384_vm2, %v3420_v62, -inf }
0x1691   : > { %3526 = vmax.xlane.f32.xlu0 %v3525_v2 }
0x16a4   : > { %v3519_v3 = vpop.f32.mrb[104].mxu1 }
0x16a5   : > { %v3520_v50 = vadd.f32 %v3519_v3, %v8109_v60  ;;  %v6996_v4 = vpop.f32.mrb[105].mxu1 }
0x16a6   : > { %v3522_v6 = vpop.f32.mrb[106].mxu1 }
0x16a7   : > { %v8230_v8 = vpop.f32.mrb[96].mxu0  ;;  %v6997_v59 = vpop.f32.mrb[107].mxu1  ;;  %v3531_v10 = vsel %vm384_vm2, %v3520_v50, -inf }
0x16a8   : > { %3532 = vmax.xlane.f32.xlu0 %v3531_v10  ;;  %v6978_v11 = vpop.f32.mrb[97].mxu0 }
0x16a9   : > { %v3349_v13 = vpop.f32.mrb[98].mxu0 }
0x16aa   : > { %v6979_v14 = vpop.f32.mrb[99].mxu0 }
0x16af   : > { %v3469_v16 = vpop.f32.mrb[100].mxu0 }
0x16b0   : > { %v3470_v18 = vadd.f32 %v3469_v16, %v8109_v60  ;;  %v6990_v9 = vpop.f32.mrb[101].mxu0 }
0x16b1   : > { %v3472_v21 = vpop.f32.mrb[102].mxu0 }
0x16b2   : > { %v6991_v23 = vpop.f32.mrb[103].mxu0  ;;  %v3528_v26 = vsel %vm384_vm2, %v3470_v18, -inf }
0x16b3   : > { %3529 = vmax.xlane.f32.xlu1 %v3528_v26 }
0x16be   : > { %3561 = vrot.lane.b32.xlu0 %v8054_v17, %s7531_s7 }
0x16c4   : > { %3609 = vrot.lane.b32.xlu1 %v8093_v48, %s7531_s7 }
0x16c8   : > { %3657 = vrot.lane.b32.xlu1 %v8134_v41, %s7531_s7 }
0x171e   : > { %v3527_v12 = vpop.xlane.xlu0 %3526 }
0x171f   : > { %v3534_v7 = vsub.f32 %v3420_v62, %v3527_v12 }
0x1721   : > { %v3537_v28 = vmul.f32 1.442695, %v3534_v7 }
0x1723   : > { %7433 = vpow2.f32 %v3537_v28 }
0x172d   : > { %v7434_v27 = vpop.eup %7433 }
0x172e   : > { %v3543_v36 = vsel %vm384_vm2, %v7434_v27, 0.0 }
0x172f   : > { %3544 = vadd.xlane.f32.xlu0 %v3543_v36 }
0x1735   : > { %v3533_v30 = vpop.xlane.xlu0 %3532 }
0x1736   : > { %v3536_v40 = vsub.f32 %v3520_v50, %v3533_v30 }
0x1738   : > { %v3541_v47 = vmul.f32 1.442695, %v3536_v40 }
0x1739   : > { %v3562_v31 = vpop.permute.xlu0 %3561 }
0x173a   : > { %v3567_v33 = vsel %vm570_vm3, %v3562_v31, 0 }
0x173b   : > { %6999 = vmatpush3.bf16.msra.mxu0 %v3567_v33 }
0x173c   : > { %7010 = vmatprep.subr.bf16.mxu0 %v7529_v5 }
0x1740   : > { %v3530_v34 = vpop.xlane.xlu1 %3529 }
0x1741   : > { %v3535_v35 = vsub.f32 %v3470_v18, %v3530_v34 }
0x1743   : > { %v3539_v37 = vmul.f32 1.442695, %v3535_v35 }
0x1744   : > { %v3610_v38 = vpop.permute.xlu1 %3609 }
0x1745   : > { %7435 = vpow2.f32 %v3539_v37  ;;  %v3615_v39 = vsel %vm570_vm3, %v3610_v38, 0  ;;  %3780 = vrot.lane.b32.xlu0 %v8058_v19, %s7543_s19 }
0x1746   : > { %7005 = vmatpush3.bf16.msra.mxu1 %v3615_v39  ;;  %7437 = vpow2.f32 %v3541_v47 }
0x1747   : > { %7016 = vmatprep.subr.bf16.mxu1 %v7529_v5 }
0x1748   : > { %v3658_v61 = vpop.permute.xlu1 %3657 }
0x1749   : > { %v3663_v63 = vsel %vm570_vm3, %v3658_v61, 0 }
0x174f   : > { %v7436_v42 = vpop.eup %7435 }
0x1750   : > { %v3546_v43 = vsel %vm384_vm2, %v7436_v42, 0.0  ;;  %v7438_v51 = vpop.eup %7437 }
0x1751   : > { %3547 = vadd.xlane.f32.xlu1 %v3546_v43  ;;  %v3549_v54 = vsel %vm384_vm2, %v7438_v51, 0.0 }
0x1762   : > { %3730 = vrot.lane.b32.xlu1 %v8052_v15, %s7543_s19 }
0x1764   : > { %3550 = vadd.xlane.f32.xlu0 %v3549_v54 }
0x1766   : > { %3728 = vrot.lane.b32.xlu1 %v8052_v15, %s7536_s12 }
0x176a   : > { %3778 = vrot.lane.b32.xlu1 %v8058_v19, %s7536_s12 }
0x177a   : > { %3830 = vrot.lane.b32.xlu0 %v8065_v24, %s7543_s19 }
0x177e   : > { %3828 = vrot.lane.b32.xlu0 %v8065_v24, %s7536_s12 }
0x17bc   : > { %v3545_v25 = vpop.xlane.xlu0 %3544 }
0x17bd   : > { %7439 = vrcp.f32 %v3545_v25 }
0x17c0   : > { %v3781_v2 = vpop.permute.xlu0 %3780 }
0x17c1   : > { %v3786_v16 = vsel %vm2680_vm15, %v3781_v2, 0 }
0x17c7   : > { %v7440_v57 = vpop.eup %7439 }
0x17c8   : > { %v3555_v58 = vmul.f32 %v7440_v57, %v7434_v27 }
0x17ca   : > { %v3558_v62 = vpack.c.bf16 %v3555_v58, %v3555_v58 }
0x17cc   : > { %7001 = vmatmul.mubr.msk.bf16.vlgmr.msra.gmra.mrb[104].mxu0 %vm384_vm2, %v3558_v62 }
0x17cd   : > { %7011 = vmatpush3.bf16.msra.mxu0 %v3663_v63  ;;  %7012 = vmatprep.mubr.msk.bf16.mxu0 %vm7530_vm1, %v7529_v5 }
0x17ce   : > { %7022 = vmatprep.subr.bf16.mxu0 %v7529_v5 }
0x17de   : > { %v3548_v15 = vpop.xlane.xlu1 %3547 }
0x17df   : > { %7441 = vrcp.f32 %v3548_v15 }
0x17e2   : > { %v3731_v0 = vpop.permute.xlu1 %3730 }
0x17e3   : > { %v3736_v3 = vsel %vm2680_vm15, %v3731_v0, 0 }
0x17e6   : > { %v3729_v4 = vpop.permute.xlu1 %3728 }
0x17e9   : > { %v7442_v19 = vpop.eup %7441 }
0x17ea   : > { %v3556_v24 = vmul.f32 %v7442_v19, %v7436_v42  ;;  %v3779_v18 = vpop.permute.xlu1 %3778 }
0x17ec   : > { %v3559_v1 = vpack.c.bf16 %v3556_v24, %v3556_v24 }
0x17ee   : > { %7007 = vmatmul.mubr.msk.bf16.vlgmr.msra.gmra.mrb[108].mxu1 %vm384_vm2, %v3559_v1 }
0x17ef   : > { %7017 = vmatpush3.bf16.xpose.msra.mxu1 %v3736_v3  ;;  %7018 = vmatprep.mubr.msk.bf16.mxu1 %vm7530_vm1, %v7529_v5 }
0x17f0   : > { %7028 = vmatprep.subr.bf16.mxu1 %v7529_v5 }
0x17f1   : > { %v3551_v50 = vpop.xlane.xlu0 %3550 }
0x17f2   : > { %7443 = vrcp.f32 %v3551_v50 }
0x17f5   : > { %v3831_v6 = vpop.permute.xlu0 %3830 }
0x17f6   : > { %v3836_v59 = vsel %vm2680_vm15, %v3831_v6, 0  ;;  %7019 = vmatmul.mubr.msk.bf16.vlgmr.msra.gmra.mrb[112].mxu1 %vm2680_vm15, %v3729_v4 }
0x17f7   : > { %7029 = vmatpush3.bf16.xpose.msra.mxu1 %v3836_v59  ;;  %7030 = vmatprep.mubr.msk.bf16.mxu1 %vm7530_vm1, %v7529_v5 }
0x17f8   : > { %7040 = vmatprep.subr.bf16.mxu1 %v7529_v5 }
0x17f9   : > { %v3829_v11 = vpop.permute.xlu0 %3828 }
0x17fc   : > { %v7444_v10 = vpop.eup %7443 }
0x17fd   : > { %v3557_v13 = vmul.f32 %v7444_v10, %v7438_v51 }
0x17fe   : > { %7031 = vmatmul.mubr.msk.bf16.vlgmr.msra.gmra.mrb[116].mxu1 %vm2680_vm15, %v3829_v11 }
0x17ff   : > { %v3560_v14 = vpack.c.bf16 %v3557_v13, %v3557_v13  ;;  %7042 = vmatprep.mubr.msk.bf16.mxu1 %vm7530_vm1, %v7529_v5  ;;  %v7319_v13 = vld [vmem:[%s8770_s4 + $0x4] ss:$16 sps:$4 sm:$0xff]  }
0x1801   : > { %7013 = vmatmul.mubr.msk.bf16.vlgmr.msra.gmra.mrb[108].mxu0 %vm384_vm2, %v3560_v14  ;;  %v6459_v14 = vpack.c.bf16 %v8225_v56, %v8225_v56  ;;  %v6460_v56 = vpack.c.bf16 %v8230_v8, %v8230_v8 }
0x1802   : > { %7023 = vmatpush3.bf16.xpose.msra.mxu0 %v3786_v16  ;;  %7024 = vmatprep.mubr.msk.bf16.mxu0 %vm7530_vm1, %v7529_v5 }
0x1803   : > { %7034 = vmatprep.subr.bf16.mxu0 %v7529_v5 }
0x1809   : > { %7025 = vmatmul.mubr.msk.bf16.vlgmr.msra.gmra.mrb[112].mxu0 %vm2680_vm15, %v3779_v18 }
0x180a   : > { %7036 = vmatprep.mubr.msk.bf16.mxu0 %vm7530_vm1, %v7529_v5 }
0x189f   : > { %v3603_v9 = vpop.f32.mrb[104].mxu0 }
0x18a0   : > { %v7002_v21 = vpop.f32.mrb[105].mxu0  ;;  %v6461_v16 = vpack.c.bf16 %v3603_v9, %v3603_v9 }
0x18a1   : > { %v3606_v23 = vpop.f32.mrb[106].mxu0 }
0x18a2   : > { %v7003_v26 = vpop.f32.mrb[107].mxu0 }
0x18c1   : > { %v8286_v12 = vpop.f32.mrb[108].mxu1 }
0x18c2   : > { %v7008_v7 = vpop.f32.mrb[109].mxu1  ;;  %v6462_v9 = vpack.c.bf16 %v8286_v12, %v8286_v12 }
0x18c3   : > { %v3654_v28 = vpop.f32.mrb[110].mxu1 }
0x18c4   : > { %v7009_v27 = vpop.f32.mrb[111].mxu1 }
0x18c9   : > { %v3772_v36 = vpop.f32.mrb[112].mxu1 }
0x18ca   : > { %v3773_v30 = vadd.f32 %v3772_v36, %v8109_v60  ;;  %v7020_v31 = vpop.f32.mrb[113].mxu1 }
0x18cb   : > { %v3775_v33 = vpop.f32.mrb[114].mxu1 }
0x18cc   : > { %v7021_v34 = vpop.f32.mrb[115].mxu1  ;;  %v3878_v35 = vsel %vm384_vm2, %v3773_v30, -inf }
0x18cd   : > { %3879 = vmax.xlane.f32.xlu1 %v3878_v35 }
0x18d1   : > { %v3872_v37 = vpop.f32.mrb[116].mxu1 }
0x18d2   : > { %v7032_v38 = vpop.f32.mrb[117].mxu1  ;;  %v3873_v61 = vadd.f32 %v3872_v37, %v8109_v60 }
0x18d3   : > { %v3875_v39 = vpop.f32.mrb[118].mxu1  ;;  %v7320_v38 = vld [vmem:[%s8769_s3 + $0x8] ss:$16 sps:$4 sm:$0xff]  }
0x18d4   : > { %v3699_v40 = vpop.f32.mrb[108].mxu0  ;;  %v7033_v42 = vpop.f32.mrb[119].mxu1  ;;  %v3884_v15 = vsel %vm384_vm2, %v3873_v61, -inf  ;;  %v2540_v39 = vrot.slane %v8102_v53, 1 }
0x18d5   : > { %v7014_v43 = vpop.f32.mrb[109].mxu0  ;;  %v6463_v21 = vpack.c.bf16 %v3699_v40, %v3699_v40 }
0x18d6   : > { %v3702_v47 = vpop.f32.mrb[110].mxu0  ;;  %v2541_v43 = vrot.slane %v8102_v53, 2 }
0x18d7   : > { %v7015_v51 = vpop.f32.mrb[111].mxu0  ;;  %v2546_v47 = vadd.f32 %v2540_v39, %v7917_v49  ;;  %v7321_v49 = vld [vmem:[%s8769_s3 + $0x28] ss:$16 sps:$4 sm:$0xff]  }
0x18dc   : > { %v3822_v54 = vpop.f32.mrb[112].mxu0 }
0x18dd   : > { %v3823_v25 = vadd.f32 %v3822_v54, %v8109_v60  ;;  %v7026_v57 = vpop.f32.mrb[113].mxu0 }
0x18de   : > { %v3825_v58 = vpop.f32.mrb[114].mxu0  ;;  %v2547_v57 = vadd.f32 %v2541_v43, %v7911_v45 }
0x18df   : > { %v7027_v62 = vpop.f32.mrb[115].mxu0  ;;  %v3881_v63 = vsel %vm384_vm2, %v3823_v25, -inf  ;;  %v4266_v58 = vpack.c.bf16 %v2546_v47, %v2546_v47 }
0x18e0   : > { %3882 = vmax.xlane.f32.xlu0 %v3881_v63  ;;  %v2545_v63 = vadd.f32 %v8102_v53, %v7913_v46 }
0x18e2   : > { %v4265_v45 = vpack.c.bf16 %v2545_v63, %v2545_v63 }
0x18e4   : > { %3885 = vmax.xlane.f32.xlu0 %v3884_v15 }
0x195a   : > { %v3880_v19 = vpop.xlane.xlu1 %3879 }
0x195b   : > { %v3887_v24 = vsub.f32 %v3773_v30, %v3880_v19  ;;  %v4267_v19 = vpack.c.bf16 %v2547_v57, %v2547_v57 }
0x195d   : > { %v3890_v0 = vmul.f32 1.442695, %v3887_v24  ;;  %v4272_v24 = vunpack.c.l.b16 %v4266_v58  ;;  %v4273_v46 = vunpack.c.l.b16 %v4267_v19 }
0x195f   : > { %7445 = vpow2.f32 %v3890_v0  ;;  %v4274_v53 = vrot.slane %v4272_v24, 7  ;;  %v4276_v22 = vrot.slane %v4273_v46, 6 }
0x1969   : > { %v7446_v1 = vpop.eup %7445 }
0x196a   : > { %v3896_v2 = vsel %vm384_vm2, %v7446_v1, 0.0 }
0x196b   : > { %3897 = vadd.xlane.f32.xlu1 %v3896_v2  ;;  %v7322_v2 = vld [vmem:[%s8769_s3 + $0xc] ss:$16 sps:$4 sm:$0xff]  }
0x196d   : > { %v3883_v3 = vpop.xlane.xlu0 %3882 }
0x196e   : > { %v3888_v50 = vsub.f32 %v3823_v25, %v3883_v3  ;;  %v4194_v3 = vpack.c.bf16 %v7897_v20, %v7897_v20 }
0x1970   : > { %v3892_v4 = vmul.f32 1.442695, %v3888_v50  ;;  %v4271_v50 = vunpack.c.l.b16 %v4265_v45 }
0x1971   : > { %v3886_v59 = vpop.xlane.xlu0 %3885 }
0x1972   : > { %7447 = vpow2.f32 %v3892_v4  ;;  %v3889_v10 = vsub.f32 %v3873_v61, %v3886_v59  ;;  %v4275_v32 = vsel %vm1911_vm8, %v4274_v53, %v4271_v50  ;;  %v7330_v53 = vld [vmem:[%s8770_s4 + $0x28] ss:$16 sps:$4 sm:$0xff]  }
0x1973   : > { %v4277_v20 = vsel %vm1913_vm9, %v4276_v22, %v4275_v32  ;;  %v7520_v32 = vld [vmem:[%s8020_s10] sm:$0xff]  }
0x1974   : > { %v3894_v11 = vmul.f32 1.442695, %v3889_v10  ;;  %v4278_v4 = vpack.c.b16 %v4277_v20, %v4277_v20  ;;  %v2552_v20 = vunpack.c.h.bf16 %v7520_v32 }
0x1976   : > { %7449 = vpow2.f32 %v3894_v11 }
0x197c   : > { %v7448_v60 = vpop.eup %7447  ;;  %3962 = vrot.lane.b32.xlu1 %v8093_v48, %s7536_s12 }
0x197d   : > { %v3899_v6 = vsel %vm384_vm2, %v7448_v60, 0.0 }
0x197e   : > { %3900 = vadd.xlane.f32.xlu0 %v3899_v6 }
0x1980   : > { %v7450_v48 = vpop.eup %7449 }
0x1981   : > { %v3902_v18 = vsel %vm384_vm2, %v7450_v48, 0.0 }
0x1994   : > { %3914 = vrot.lane.b32.xlu0 %v8054_v17, %s7536_s12  ;;  %v6458_v17 = vpack.c.bf16 %v8223_v44, %v8223_v44 }
0x1998   : > { %4120 = vrot.lane.b32.xlu0 %v7319_v13, %s7532_s8 }
0x199c   : > { %3364 = vrot.lane.b32.xlu0 %v6459_v14, %s7543_s19 }
0x19a0   : > { %3715 = vrot.lane.b32.xlu0 %v6461_v16, %s7545_s25  ;;  %3903 = vadd.xlane.f32.xlu1 %v3902_v18 }
0x19b1   : > { %4010 = vrot.lane.b32.xlu1 %v8134_v41, %s7536_s12  ;;  %v7324_v41 = vld [vmem:[%s8770_s4 + $0x24] ss:$16 sps:$4 sm:$0xff]  }
0x19b2   : > { %4122 = vrot.lane.b32.xlu0 %v7324_v41, %s7532_s8 }
0x19b5   : > { %3362 = vrot.lane.b32.xlu1 %v6458_v17, %s7543_s19 }
0x19b9   : > { %3366 = vrot.lane.b32.xlu1 %v6460_v56, %s7543_s19  ;;  %v7325_v56 = vld [vmem:[%s8770_s4 + $0x44] ss:$16 sps:$4 sm:$0xff]  }
0x19bd   : > { %3717 = vrot.lane.b32.xlu1 %v6462_v9, %s7545_s25 }
0x19c1   : > { %3719 = vrot.lane.b32.xlu1 %v6463_v21, %s7545_s25 }
0x19f8   : > { %v3898_v44 = vpop.xlane.xlu1 %3897 }
0x19f9   : > { %7451 = vrcp.f32 %v3898_v44 }
0x19fc   : > { %v3963_v23 = vpop.permute.xlu1 %3962 }
0x19fd   : > { %v3968_v8 = vsel %vm570_vm3, %v3963_v23, 0 }
0x19fe   : > { %7041 = vmatpush3.bf16.msra.mxu1 %v3968_v8  ;;  %v7326_v8 = vld [vmem:[%s8770_s4 + $0x64] ss:$16 sps:$4 sm:$0xff]  }
0x1a03   : > { %v7452_v26 = vpop.eup %7451 }
0x1a04   : > { %v3908_v12 = vmul.f32 %v7452_v26, %v7446_v1  ;;  %v7550_v26 = vmov 1966171168  }
0x1a06   : > { %v3911_v36 = vpack.c.bf16 %v3908_v12, %v3908_v12 }
0x1a0b   : > { %v3901_v7 = vpop.xlane.xlu0 %3900 }
0x1a0c   : > { %7453 = vrcp.f32 %v3901_v7  ;;  %v4336_v7 = vunpack.c.l.s4 %v7550_v26 }
0x1a0f   : > { %v3915_v28 = vpop.permute.xlu0 %3914 }
0x1a10   : > { %v3920_v27 = vsel %vm570_vm3, %v3915_v28, 0 }
0x1a11   : > { %7035 = vmatpush3.bf16.msra.mxu0 %v3920_v27  ;;  %v4337_v27 = vunpack.c.0.s8 %v4336_v7 }
0x1a12   : > { %7046 = vmatprep.subr.bf16.mxu0 %v7529_v5 }
0x1a13   : > { %v4121_v30 = vpop.permute.xlu0 %4120 }
0x1a14   : > { %7037 = vmatmul.mubr.msk.bf16.vlgmr.msra.gmra.mrb[116].mxu0 %vm384_vm2, %v3911_v36  ;;  %7052 = vmatprep.subr.bf16.mxu1 %v4121_v30 }
0x1a15   : > { %7048 = vmatprep.mubr.msk.bf16.mxu0 %vm7530_vm1, %v7529_v5 }
0x1a16   : > { %v7454_v31 = vpop.eup %7453 }
0x1a17   : > { %v3909_v33 = vmul.f32 %v7454_v31, %v7448_v60  ;;  %v3365_v34 = vpop.permute.xlu0 %3364  ;;  %v4340_v31 = vsub.s32 %v4337_v27, %v8038_v52 }
0x1a18   : > { %3373 = vst.msk [vmem:[#allocation4 + $0x4] sm:$0xf] %vm3371_vm6, %v3365_v34 }
0x1a19   : > { %v3912_v35 = vpack.c.bf16 %v3909_v33, %v3909_v33 }
0x1a1b   : > { %7043 = vmatmul.mubr.msk.bf16.vlgmr.msra.gmra.mrb[120].mxu1 %vm384_vm2, %v3912_v35  ;;  %v3716_v54 = vpop.permute.xlu0 %3715  ;;  %v4360_v35 = vsub.s32 0, %v8038_v52 }
0x1a1c   : > { %7053 = vmatpush3.bf16.msra.mxu1 %v4121_v30 }
0x1a24   : > { %v4123_v60 = vpop.permute.xlu0 %4122 }
0x1a25   : > { %7054 = vmatprep.subr.bf16.mxu1 %v4123_v60 }
0x1a26   : > { %7055 = vmatpush3.bf16.msra.mxu1 %v4123_v60 }
0x1a2d   : > { %v3904_v37 = vpop.xlane.xlu1 %3903 }
0x1a2e   : > { %7455 = vrcp.f32 %v3904_v37 }
0x1a31   : > { %v4011_v40 = vpop.permute.xlu1 %4010 }
0x1a32   : > { %v4016_v42 = vsel %vm570_vm3, %v4011_v40, 0 }
0x1a33   : > { %7047 = vmatpush3.bf16.msra.mxu0 %v4016_v42 }
0x1a34   : > { %7064 = vmatprep.subr.bf16.mxu0 %v7320_v38 }
0x1a35   : > { %v3363_v51 = vpop.permute.xlu1 %3362 }
0x1a36   : > { %3372 = vst.msk [vmem:[#allocation4] sm:$0xf] %vm3371_vm6, %v3363_v51 }
0x1a37   : > { %3725 = vst.msk [vmem:[#allocation4] sm:$0xf] %vm3724_vm7, %v3716_v54 }
0x1a38   : > { %v7456_v25 = vpop.eup %7455 }
0x1a39   : > { %v3367_v61 = vpop.permute.xlu1 %3366  ;;  %v3910_v62 = vmul.f32 %v7456_v25, %v7450_v48 }
0x1a3a   : > { %3374 = vst.msk [vmem:[#allocation4 + $0x8] sm:$0xf] %vm3371_vm6, %v3367_v61 }
0x1a3b   : > { %v3913_v15 = vpack.c.bf16 %v3910_v62, %v3910_v62 }
0x1a3d   : > { %v3718_v0 = vpop.permute.xlu1 %3717  ;;  %7049 = vmatmul.mubr.msk.bf16.vlgmr.msra.gmra.mrb[120].mxu0 %vm384_vm2, %v3913_v15 }
0x1a3e   : > { %3726 = vst.msk [vmem:[#allocation4 + $0x4] sm:$0xf] %vm3724_vm7, %v3718_v0  ;;  %7065 = vmatpush3.bf16.msra.mxu0 %v7320_v38  ;;  %7068 = vmatprep.mubr.msk.bf16.mxu0 %vm323_vm0, %v4193_v29  ;;  %v7323_v29 = vld [vmem:[%s8769_s3 + $0x2c] ss:$16 sps:$4 sm:$0xff]   ;;  %v7329_v0 = vld [vmem:[%s8770_s4 + $0x8] ss:$16 sps:$4 sm:$0xff]  }
0x1a3f   : > { %7066 = vmatprep.subr.bf16.mxu0 %v7321_v49 }
0x1a41   : > { %v3720_v1 = vpop.permute.xlu1 %3719 }
0x1a42   : > { %3727 = vst.msk [vmem:[#allocation4 + $0x8] sm:$0xf] %vm3724_vm7, %v3720_v1  ;;  %7067 = vmatpush3.bf16.msra.mxu0 %v7321_v49  ;;  %v7331_v1 = vld [vmem:[%s8770_s4 + $0x48] ss:$16 sps:$4 sm:$0xff]  }
0x1a43   : > { %7072 = vmatprep.subr.bf16.mxu0 %v7529_v5 }
0x1a45   : > { %7069 = vmatmul.mubr.msk.bf16.vlgmr.msra.gmra.mrb[124].mxu0 %vm323_vm0, %v4194_v3  ;;  %v7519_v3 = vld [vmem:[%s8020_s10 + $0x8] sm:$0xf] }
0x1a46   : > { %7073 = vmatpush3.bf16.msra.mxu0 %v7322_v2  ;;  %7076 = vmatprep.mubr.msk.bf16.mxu0 %vm7530_vm1, %v7529_v5  ;;  %v7332_v2 = vld [vmem:[%s8770_s4 + $0x68] ss:$16 sps:$4 sm:$0xff]   ;;  %v2553_v50 = vunpack.c.l.bf16 %v7519_v3 }
0x1a47   : > { %7074 = vmatprep.subr.bf16.mxu0 %v7529_v5 }
0x1a4a   : > { %7075 = vmatpush3.bf16.msra.mxu0 %v7323_v29  ;;  %v2551_v29 = vunpack.c.l.bf16 %v7520_v32 }
0x1a4b   : > { %7092 = vmatprep.subr.bf16.mxu0 %v7529_v5 }
0x1a4d   : > { %7077 = vmatmul.mubr.msk.bf16.vlgmr.msra.gmra.mrb[128].mxu0 %vm323_vm0, %v4278_v4  ;;  %vm4077_vm0 = vcmask 519552  }
0x1a4e   : > { %7094 = vmatprep.mubr.msk.bf16.mxu0 %vm7530_vm1, %v7529_v5 }
0x1ae7   : > { %v3956_v6 = vpop.f32.mrb[116].mxu0 }
0x1ae8   : > { %v6464_v59 = vpack.c.bf16 %v3956_v6, %v3956_v6  ;;  %v7038_v10 = vpop.f32.mrb[117].mxu0 }
0x1ae9   : > { %v3959_v11 = vpop.f32.mrb[118].mxu0 }
0x1aea   : > { %4068 = vrot.lane.b32.xlu0 %v6464_v59, %s7538_s14  ;;  %v7039_v13 = vpop.f32.mrb[119].mxu0 }
0x1aee   : > { %v4004_v14 = vpop.f32.mrb[120].mxu1 }
0x1aef   : > { %v6465_v48 = vpack.c.bf16 %v4004_v14, %v4004_v14  ;;  %v7044_v16 = vpop.f32.mrb[121].mxu1 }
0x1af0   : > { %v4007_v18 = vpop.f32.mrb[122].mxu1 }
0x1af1   : > { %4070 = vrot.lane.b32.xlu1 %v6465_v48, %s7538_s14  ;;  %v7045_v17 = vpop.f32.mrb[123].mxu1 }
0x1af5   : > { %4124 = vrot.lane.b32.xlu1 %v7325_v56, %s7532_s8 }
0x1b10   : > { %v4052_v9 = vpop.f32.mrb[120].mxu0 }
0x1b11   : > { %v6466_v21 = vpack.c.bf16 %v4052_v9, %v4052_v9  ;;  %v7050_v41 = vpop.f32.mrb[121].mxu0 }
0x1b12   : > { %v4055_v44 = vpop.f32.mrb[122].mxu0 }
0x1b13   : > { %4072 = vrot.lane.b32.xlu0 %v6466_v21, %s7538_s14  ;;  %v7051_v23 = vpop.f32.mrb[123].mxu0 }
0x1b17   : > { %4126 = vrot.lane.b32.xlu0 %v7326_v8, %s7532_s8 }
0x1b18   : > { %v7070_v12 = vpop.f32.mrb[124].mxu0 }
0x1b19   : > { %v4247_v28 = vpop.f32.mrb[125].mxu0 }
0x1b1a   : > { %v7071_v36 = vpop.f32.mrb[126].mxu0 }
0x1b1b   : > { %v4250_v30 = vpop.f32.mrb[127].mxu0 }
0x1b20   : > { %v4328_v33 = vpop.f32.mrb[128].mxu0 }
0x1b21   : > { %v4341_v34 = vrot.slane %v4328_v33, %v4340_v31  ;;  %v7078_v37 = vpop.f32.mrb[129].mxu0 }
0x1b22   : > { %v4331_v38 = vpop.f32.mrb[130].mxu0 }
0x1b23   : > { %v4342_v39 = vcombine.high %v4341_v34, %v4341_v34  ;;  %v4349_v40 = vrot.slane %v4341_v34, %v4340_v31  ;;  %v7079_v42 = vpop.f32.mrb[131].mxu0 }
0x1b25   : > { %v4356_v43 = vrot.slane %v4342_v39, %v4340_v31  ;;  %v4357_v47 = vcombine.high %v4349_v40, %v4349_v40  ;;  %v4361_v51 = vrot.slane %v4349_v40, %v4360_v35 }
0x1b27   : > { %v4365_v54 = vrot.slane %v4356_v43, %v4360_v35  ;;  %v4369_v25 = vrot.slane %v4357_v47, %v4360_v35  ;;  %v4373_v57 = vadd.f32 %v4361_v51, %v4247_v28 }
0x1b29   : > { %v4374_v58 = vadd.f32 %v4365_v54, %v4250_v30  ;;  %v4375_v61 = vadd.f32 %v7070_v12, %v4369_v25  ;;  %v8388_v62 = vpack.c.bf16 %v4373_v57, %v4373_v57 }
0x1b2b   : > { %v4474_v63 = vsel %vm2680_vm15, %v8388_v62, 0  ;;  %v8419_v13 = vpack.c.bf16 %v4375_v61, %v4375_v61  ;;  %v8432_v18 = vpack.c.bf16 %v4374_v58, %v4374_v58 }
0x1b2c   : > { %7093 = vmatpush3.bf16.xpose.msra.mxu0 %v4474_v63 }
0x1b2d   : > { %7098 = vmatprep.subr.bf16.mxu0 %v7529_v5  ;;  %v4566_v16 = vsel %vm2680_vm15, %v8419_v13, 0  ;;  %v4520_v23 = vsel %vm2680_vm15, %v8432_v18, 0 }
0x1b5c   : > { %v4069_v52 = vpop.permute.xlu0 %4068 }
0x1b5d   : > { %4078 = vst.msk [vmem:[#allocation4] sm:$0xf] %vm4077_vm0, %v4069_v52 }
0x1b63   : > { %v4071_v15 = vpop.permute.xlu1 %4070 }
0x1b64   : > { %4079 = vst.msk [vmem:[#allocation4 + $0x4] sm:$0xf] %vm4077_vm0, %v4071_v15 }
0x1b67   : > { %v4125_v49 = vpop.permute.xlu1 %4124 }
0x1b68   : > { %7056 = vmatprep.subr.bf16.mxu1 %v4125_v49 }
0x1b69   : > { %7057 = vmatpush3.bf16.msra.mxu1 %v4125_v49 }
0x1b6b   : > { %v7327_v19 = vld [vmem:[#allocation4] sm:$0xff]  }
0x1b6c   : > { %7060 = vmatprep.mubr.msk.bf16.mxu1 %vm2616_vm14, %v7327_v19 }
0x1b85   : > { %v4073_v24 = vpop.permute.xlu0 %4072 }
0x1b86   : > { %4080 = vst.msk [vmem:[#allocation4 + $0x8] sm:$0xf] %vm4077_vm0, %v4073_v24 }
0x1b89   : > { %v4127_v45 = vpop.permute.xlu0 %4126 }
0x1b8a   : > { %7058 = vmatprep.subr.bf16.mxu1 %v4127_v45 }
0x1b8b   : > { %7059 = vmatpush3.bf16.msra.mxu1 %v4127_v45 }
0x1b8c   : > { %7080 = vmatprep.subr.bf16.mxu1 %v7329_v0 }
0x1b8d   : > { %v7328_v46 = vld [vmem:[#allocation4 + $0x8] ss:$0 sps:$4 sm:$0xff]  }
0x1b8e   : > { %7061 = vmatmul.mubr.msk.bf16.vlgmr.msra.gmra.mrb[124].mxu1 %vm2616_vm14, %v7328_v46 }
0x1b8f   : > { %7081 = vmatpush3.bf16.msra.mxu1 %v7329_v0 }
0x1b90   : > { %7082 = vmatprep.subr.bf16.mxu1 %v7330_v53 }
0x1b93   : > { %7083 = vmatpush3.bf16.msra.mxu1 %v7330_v53 }
0x1b94   : > { %7084 = vmatprep.subr.bf16.mxu1 %v7331_v1 }
0x1b97   : > { %7085 = vmatpush3.bf16.msra.mxu1 %v7331_v1 }
0x1b98   : > { %7086 = vmatprep.subr.bf16.mxu1 %v7332_v2 }
0x1b9b   : > { %7087 = vmatpush3.bf16.msra.mxu1 %v7332_v2 }
0x1b9c   : > { %7104 = vmatprep.subr.bf16.mxu1 %v7529_v5 }
0x1c61   : > { %v7062_v22 = vpop.f32.mrb[124].mxu1 }
0x1c62   : > { %v4172_v4 = vpop.f32.mrb[125].mxu1  ;;  %v8413_v6 = vadd.f32 %v7062_v22, %v2553_v50 }
0x1c63   : > { %v7063_v60 = vpop.f32.mrb[126].mxu1  ;;  %v8415_v10 = vadd.f32 %v4172_v4, %v2551_v29 }
0x1c64   : > { %v4175_v59 = vpop.f32.mrb[127].mxu1  ;;  %v4385_v48 = vpack.c.bf16 %v8413_v6, %v8413_v6 }
0x1c65   : > { %v8417_v11 = vadd.f32 %v4175_v59, %v2552_v20 }
0x1c67   : > { %v4384_v14 = vpack.c.bf16 %v8417_v11, %v8415_v10 }
0x1c69   : > { %7088 = vmatprep.mubr.msk.bf16.mxu1 %vm2616_vm14, %v4384_v14 }
0x1c6a   : > { %7089 = vmatmul.mubr.msk.bf16.vlgmr.msra.gmra.mrb[128].mxu1 %vm2616_vm14, %v4385_v48 }
0x1c6b   : > { %7105 = vmatpush3.bf16.xpose.msra.mxu1 %v4566_v16  ;;  %7106 = vmatprep.mubr.msk.bf16.mxu1 %vm7530_vm1, %v7529_v5 }
0x1c6c   : > { %7116 = vmatprep.subr.bf16.mxu1 %v7529_v5 }
0x1d3d   : > { %v7090_v17 = vpop.f32.mrb[128].mxu1 }
0x1d3e   : > { %v8434_v56 = vpack.c.bf16 %v7090_v17, %v7090_v17  ;;  %v4450_v9 = vpop.f32.mrb[129].mxu1 }
0x1d3f   : > { %v8436_v21 = vpack.c.bf16 %v4450_v9, %v4450_v9  ;;  %v7091_v41 = vpop.f32.mrb[130].mxu1 }
0x1d40   : > { %v4453_v44 = vpop.f32.mrb[131].mxu1  ;;  %7107 = vmatmul.mubr.msk.bf16.vlgmr.msra.gmra.mrb[132].mxu1 %vm2680_vm15, %v8434_v56 }
0x1d41   : > { %7095 = vmatmul.mubr.msk.bf16.vlgmr.msra.gmra.mrb[132].mxu0 %vm2680_vm15, %v8436_v21  ;;  %7118 = vmatprep.mubr.msk.bf16.mxu1 %vm7530_vm1, %v7529_v5  ;;  %v8449_v8 = vpack.c.bf16 %v4453_v44, %v4453_v44 }
0x1d42   : > { %7099 = vmatpush3.bf16.xpose.msra.mxu0 %v4520_v23  ;;  %7100 = vmatprep.mubr.msk.bf16.mxu0 %vm7530_vm1, %v7529_v5 }
0x1d43   : > { %7110 = vmatprep.subr.bf16.mxu0 %v7529_v5 }
0x1d49   : > { %7101 = vmatmul.mubr.msk.bf16.vlgmr.msra.gmra.mrb[136].mxu0 %vm2680_vm15, %v8449_v8 }
0x1d4a   : > { %7112 = vmatprep.mubr.msk.bf16.mxu0 %vm7530_vm1, %v7529_v5 }
0x1e13   : > { %v4602_v26 = vpop.f32.mrb[132].mxu1 }
0x1e14   : > { %v4510_v7 = vpop.f32.mrb[132].mxu0  ;;  %v7108_v12 = vpop.f32.mrb[133].mxu1  ;;  %v4614_v40 = vsel %vm384_vm2, %v4602_v26, -inf }
0x1e15   : > { %v7096_v28 = vpop.f32.mrb[133].mxu0  ;;  %v4605_v27 = vpop.f32.mrb[134].mxu1  ;;  %v4608_v36 = vsel %vm384_vm2, %v4510_v7, -inf }
0x1e16   : > { %v7109_v30 = vpop.f32.mrb[135].mxu1  ;;  %4609 = vmax.xlane.f32.xlu1 %v4608_v36  ;;  %v4513_v31 = vpop.f32.mrb[134].mxu0 }
0x1e17   : > { %v7097_v33 = vpop.f32.mrb[135].mxu0 }
0x1e1c   : > { %v4556_v34 = vpop.f32.mrb[136].mxu0 }
0x1e1d   : > { %v7102_v35 = vpop.f32.mrb[137].mxu0  ;;  %v4611_v37 = vsel %vm384_vm2, %v4556_v34, -inf }
0x1e1e   : > { %4612 = vmax.xlane.f32.xlu0 %v4611_v37  ;;  %v4559_v38 = vpop.f32.mrb[138].mxu0 }
0x1e1f   : > { %v7103_v39 = vpop.f32.mrb[139].mxu0 }
0x1e22   : > { %4615 = vmax.xlane.f32.xlu0 %v4614_v40 }
0x1e27   : > { %4645 = vrot.lane.b32.xlu1 %v8388_v62, %s7532_s8 }
0x1e2b   : > { %4743 = vrot.lane.b32.xlu1 %v8419_v13, %s7532_s8 }
0x1e38   : > { %4694 = vrot.lane.b32.xlu0 %v8432_v18, %s7532_s8 }
0x1ea3   : > { %v4610_v42 = vpop.xlane.xlu1 %4609 }
0x1ea4   : > { %v4617_v25 = vsub.f32 %v4510_v7, %v4610_v42 }
0x1ea6   : > { %v4620_v63 = vmul.f32 1.442695, %v4617_v25 }
0x1ea7   : > { %v4646_v43 = vpop.permute.xlu1 %4645 }
0x1ea8   : > { %v4651_v47 = vsel %vm570_vm3, %v4646_v43, 0 }
0x1ea9   : > { %7111 = vmatpush3.bf16.msra.mxu0 %v4651_v47 }
0x1eaa   : > { %7122 = vmatprep.subr.bf16.mxu0 %v7529_v5 }
0x1eab   : > { %v4613_v51 = vpop.xlane.xlu0 %4612  ;;  %v4744_v1 = vpop.permute.xlu1 %4743 }
0x1eac   : > { %v4618_v54 = vsub.f32 %v4556_v34, %v4613_v51  ;;  %v4749_v41 = vsel %vm570_vm3, %v4744_v1, 0 }
0x1eae   : > { %v4622_v57 = vmul.f32 1.442695, %v4618_v54 }
0x1eaf   : > { %v4616_v58 = vpop.xlane.xlu0 %4615 }
0x1eb0   : > { %7457 = vpow2.f32 %v4622_v57  ;;  %v4619_v61 = vsub.f32 %v4602_v26, %v4616_v58 }
0x1eb2   : > { %v4624_v52 = vmul.f32 1.442695, %v4619_v61 }
0x1eb3   : > { %v4695_v15 = vpop.permute.xlu0 %4694 }
0x1eb4   : > { %7459 = vpow2.f32 %v4624_v52  ;;  %v4700_v49 = vsel %vm570_vm3, %v4695_v15, 0 }
0x1eb5   : > { %7117 = vmatpush3.bf16.msra.mxu1 %v4700_v49  ;;  %7461 = vpow2.f32 %v4620_v63 }
0x1eb6   : > { %7128 = vmatprep.subr.bf16.mxu1 %v7529_v5 }
0x1eba   : > { %v7458_v19 = vpop.eup %7457 }
0x1ebb   : > { %v4629_v24 = vsel %vm384_vm2, %v7458_v19, 0.0 }
0x1ebc   : > { %4630 = vadd.xlane.f32.xlu0 %v4629_v24 }
0x1ebe   : > { %v7460_v0 = vpop.eup %7459 }
0x1ebf   : > { %v4632_v45 = vsel %vm384_vm2, %v7460_v0, 0.0  ;;  %v7462_v46 = vpop.eup %7461 }
0x1ec0   : > { %4633 = vadd.xlane.f32.xlu1 %v4632_v45  ;;  %v4626_v53 = vsel %vm384_vm2, %v7462_v46, 0.0 }
0x1ec4   : > { %4627 = vadd.xlane.f32.xlu1 %v4626_v53 }
0x1ed2   : > { %4810 = vrot.lane.b32.xlu0 %v8388_v62, %s7537_s13 }
0x1ed5   : > { %4861 = vrot.lane.b32.xlu1 %v8432_v18, %s7537_s13 }
0x1ed6   : > { %4808 = vrot.lane.b32.xlu0 %v8436_v21, %s7537_s13 }
0x1ed9   : > { %4912 = vrot.lane.b32.xlu1 %v8419_v13, %s7537_s13 }
0x1eda   : > { %4859 = vrot.lane.b32.xlu0 %v8449_v8, %s7537_s13 }
0x1edd   : > { %4910 = vrot.lane.b32.xlu1 %v8434_v56, %s7537_s13  ;;  %s291_s13 = scalar_lea.vmem %s8772_s6, %s7261_s30 }
0x1f49   : > { %v4631_v2 = vpop.xlane.xlu0 %4630 }
0x1f4a   : > { %7463 = vrcp.f32 %v4631_v2 }
0x1f4d   : > { %v4634_v3 = vpop.xlane.xlu1 %4633  ;;  %v4811_v29 = vpop.permute.xlu0 %4810 }
0x1f4e   : > { %v4816_v60 = vsel %vm2680_vm15, %v4811_v29, 0 }
0x1f51   : > { %v4628_v50 = vpop.xlane.xlu1 %4627  ;;  %v4809_v9 = vpop.permute.xlu0 %4808 }
0x1f52   : > { %7465 = vrcp.f32 %v4628_v50 }
0x1f53   : > { %7467 = vrcp.f32 %v4634_v3 }
0x1f54   : > { %v7464_v22 = vpop.eup %7463 }
0x1f55   : > { %v4639_v32 = vmul.f32 %v7464_v22, %v7458_v19  ;;  %v4862_v4 = vpop.permute.xlu1 %4861  ;;  %v4860_v28 = vpop.permute.xlu0 %4859 }
0x1f56   : > { %v4867_v12 = vsel %vm2680_vm15, %v4862_v4, 0 }
0x1f57   : > { %v4642_v20 = vpack.c.bf16 %v4639_v32, %v4639_v32 }
0x1f59   : > { %7119 = vmatmul.mubr.msk.bf16.vlgmr.msra.gmra.mrb[136].mxu1 %vm384_vm2, %v4642_v20  ;;  %v4913_v48 = vpop.permute.xlu1 %4912 }
0x1f5a   : > { %7129 = vmatpush3.bf16.xpose.msra.mxu1 %v4816_v60  ;;  %7130 = vmatprep.mubr.msk.bf16.mxu1 %vm7530_vm1, %v7529_v5  ;;  %v4918_v44 = vsel %vm2680_vm15, %v4913_v48, 0 }
0x1f5b   : > { %7140 = vmatprep.subr.bf16.mxu1 %v7529_v5 }
0x1f5c   : > { %v7466_v59 = vpop.eup %7465 }
0x1f5d   : > { %v4638_v14 = vmul.f32 %v7466_v59, %v7462_v46  ;;  %v7468_v17 = vpop.eup %7467  ;;  %v4911_v7 = vpop.permute.xlu1 %4910 }
0x1f5e   : > { %v4640_v23 = vmul.f32 %v7468_v17, %v7460_v0 }
0x1f5f   : > { %v4641_v16 = vpack.c.bf16 %v4638_v14, %v4638_v14 }
0x1f60   : > { %v4643_v26 = vpack.c.bf16 %v4640_v23, %v4640_v23 }
0x1f61   : > { %7113 = vmatmul.mubr.msk.bf16.vlgmr.msra.gmra.mrb[140].mxu0 %vm384_vm2, %v4641_v16  ;;  %7131 = vmatmul.mubr.msk.bf16.vlgmr.msra.gmra.mrb[140].mxu1 %vm2680_vm15, %v4809_v9 }
0x1f62   : > { %7123 = vmatpush3.bf16.msra.mxu0 %v4749_v41  ;;  %7141 = vmatpush3.bf16.xpose.msra.mxu1 %v4918_v44 }
0x1f63   : > { %7124 = vmatprep.mubr.msk.bf16.mxu0 %vm7530_vm1, %v7529_v5  ;;  %7142 = vmatprep.mubr.msk.bf16.mxu1 %vm7530_vm1, %v7529_v5 }
0x1f64   : > { %7134 = vmatprep.subr.bf16.mxu0 %v7529_v5  ;;  %7152 = vmatprep.subr.bf16.mxu1 %v7529_v5 }
0x1f69   : > { %7125 = vmatmul.mubr.msk.bf16.vlgmr.msra.gmra.mrb[144].mxu0 %vm384_vm2, %v4643_v26  ;;  %7143 = vmatmul.mubr.msk.bf16.vlgmr.msra.gmra.mrb[144].mxu1 %vm2680_vm15, %v4911_v7 }
0x1f6a   : > { %7136 = vmatprep.mubr.msk.bf16.mxu0 %vm7530_vm1, %v7529_v5  ;;  %7154 = vmatprep.mubr.msk.bf16.mxu1 %vm7530_vm1, %v7529_v5 }
0x1f6b   : > { %7135 = vmatpush3.bf16.xpose.msra.mxu0 %v4867_v12 }
0x1f6c   : > { %7146 = vmatprep.subr.bf16.mxu0 %v7529_v5 }
0x1f72   : > { %7137 = vmatmul.mubr.msk.bf16.vlgmr.msra.gmra.mrb[148].mxu0 %vm2680_vm15, %v4860_v28 }
0x1f73   : > { %7148 = vmatprep.mubr.msk.bf16.mxu0 %vm7530_vm1, %v7529_v5 }
0x202c   : > { %v4736_v27 = vpop.f32.mrb[136].mxu1 }
0x202d   : > { %v6468_v36 = vpack.c.bf16 %v4736_v27, %v4736_v27  ;;  %v7120_v30 = vpop.f32.mrb[137].mxu1 }
0x202e   : > { %v4739_v31 = vpop.f32.mrb[138].mxu1 }
0x202f   : > { %4805 = vst.msk [vmem:[#allocation4 + $0x4] sm:$0xf] %vm3015_vm5, %v6468_v36  ;;  %v7121_v33 = vpop.f32.mrb[139].mxu1 }
0x2034   : > { %v4687_v34 = vpop.f32.mrb[140].mxu0  ;;  %v4852_v35 = vpop.f32.mrb[140].mxu1 }
0x2035   : > { %v6467_v37 = vpack.c.bf16 %v4687_v34, %v4687_v34  ;;  %v7114_v38 = vpop.f32.mrb[141].mxu0  ;;  %v7132_v39 = vpop.f32.mrb[141].mxu1  ;;  %v4960_v40 = vsel %vm384_vm2, %v4852_v35, -inf }
0x2036   : > { %4961 = vmax.xlane.f32.xlu0 %v4960_v40  ;;  %v4690_v42 = vpop.f32.mrb[142].mxu0  ;;  %v4855_v43 = vpop.f32.mrb[142].mxu1 }
0x2037   : > { %4804 = vst.msk [vmem:[#allocation4] sm:$0xf] %vm3015_vm5, %v6467_v37  ;;  %v7115_v47 = vpop.f32.mrb[143].mxu0  ;;  %v7133_v51 = vpop.f32.mrb[143].mxu1 }
0x203c   : > { %v4785_v54 = vpop.f32.mrb[144].mxu0  ;;  %v4954_v25 = vpop.f32.mrb[144].mxu1 }
0x203d   : > { %v6469_v57 = vpack.c.bf16 %v4785_v54, %v4785_v54  ;;  %v7126_v58 = vpop.f32.mrb[145].mxu0  ;;  %v7144_v61 = vpop.f32.mrb[145].mxu1  ;;  %v4966_v63 = vsel %vm384_vm2, %v4954_v25, -inf }
0x203e   : > { %4967 = vmax.xlane.f32.xlu0 %v4966_v63  ;;  %v4788_v52 = vpop.f32.mrb[146].mxu0  ;;  %v4957_v15 = vpop.f32.mrb[146].mxu1 }
0x203f   : > { %4806 = vst.msk [vmem:[#allocation4 + $0x8] sm:$0xf] %vm3015_vm5, %v6469_v57  ;;  %v7127_v49 = vpop.f32.mrb[147].mxu0  ;;  %v7145_v19 = vpop.f32.mrb[147].mxu1 }
0x2045   : > { %v4903_v24 = vpop.f32.mrb[148].mxu0 }
0x2046   : > { %v7138_v0 = vpop.f32.mrb[149].mxu0  ;;  %v4963_v45 = vsel %vm384_vm2, %v4903_v24, -inf }
0x2047   : > { %4964 = vmax.xlane.f32.xlu1 %v4963_v45  ;;  %v4906_v46 = vpop.f32.mrb[150].mxu0 }
0x2048   : > { %v7139_v53 = vpop.f32.mrb[151].mxu0 }
0x2058   : > { %4996 = vrot.lane.b32.xlu1 %v8388_v62, %s7538_s14 }
0x205c   : > { %5092 = vrot.lane.b32.xlu1 %v8419_v13, %s7538_s14 }
0x2060   : > { %5164 = vrot.lane.b32.xlu1 %v8388_v62, %s7531_s7 }
0x20c3   : > { %v4962_v1 = vpop.xlane.xlu0 %4961 }
0x20c4   : > { %v4969_v2 = vsub.f32 %v4852_v35, %v4962_v1 }
0x20c6   : > { %v4972_v3 = vmul.f32 1.442695, %v4969_v2 }
0x20c8   : > { %7469 = vpow2.f32 %v4972_v3 }
0x20cb   : > { %v4968_v48 = vpop.xlane.xlu0 %4967 }
0x20cc   : > { %v4971_v16 = vsub.f32 %v4954_v25, %v4968_v48 }
0x20ce   : > { %v4976_v17 = vmul.f32 1.442695, %v4971_v16 }
0x20d2   : > { %v7470_v50 = vpop.eup %7469 }
0x20d3   : > { %v4978_v22 = vsel %vm384_vm2, %v7470_v50, 0.0 }
0x20d4   : > { %v4965_v32 = vpop.xlane.xlu1 %4964  ;;  %4979 = vadd.xlane.f32.xlu0 %v4978_v22 }
0x20d5   : > { %v4970_v29 = vsub.f32 %v4903_v24, %v4965_v32 }
0x20d7   : > { %v4974_v20 = vmul.f32 1.442695, %v4970_v29 }
0x20d8   : > { %v4997_v4 = vpop.permute.xlu1 %4996 }
0x20d9   : > { %7471 = vpow2.f32 %v4974_v20  ;;  %v5002_v60 = vsel %vm570_vm3, %v4997_v4, 0 }
0x20da   : > { %7147 = vmatpush3.bf16.msra.mxu0 %v5002_v60  ;;  %7473 = vpow2.f32 %v4976_v17 }
0x20db   : > { %7158 = vmatprep.subr.bf16.mxu0 %v7529_v5 }
0x20dc   : > { %v5093_v7 = vpop.permute.xlu1 %5092 }
0x20dd   : > { %v5098_v30 = vsel %vm570_vm3, %v5093_v7, 0 }
0x20e0   : > { %v5165_v27 = vpop.permute.xlu1 %5164 }
0x20e1   : > { %v5170_v37 = vsel %vm2680_vm15, %v5165_v27, 0 }
0x20e3   : > { %v7472_v59 = vpop.eup %7471 }
0x20e4   : > { %v4981_v14 = vsel %vm384_vm2, %v7472_v59, 0.0  ;;  %v7474_v9 = vpop.eup %7473 }
0x20e5   : > { %4982 = vadd.xlane.f32.xlu1 %v4981_v14  ;;  %v4984_v41 = vsel %vm384_vm2, %v7474_v9, 0.0 }
0x20ea   : > { %5044 = vrot.lane.b32.xlu0 %v8432_v18, %s7538_s14 }
0x20f6   : > { %5162 = vrot.lane.b32.xlu1 %v8436_v21, %s7531_s7 }
0x20fa   : > { %5212 = vrot.lane.b32.xlu1 %v8449_v8, %s7531_s7 }
0x2109   : > { %4985 = vadd.xlane.f32.xlu0 %v4984_v41 }
0x211f   : > { %5214 = vrot.lane.b32.xlu0 %v8432_v18, %s7531_s7 }
0x2123   : > { %5264 = vrot.lane.b32.xlu0 %v8419_v13, %s7531_s7 }
0x2127   : > { %5262 = vrot.lane.b32.xlu0 %v8434_v56, %s7531_s7 }
0x2161   : > { %v4980_v44 = vpop.xlane.xlu0 %4979 }
0x2162   : > { %7475 = vrcp.f32 %v4980_v44 }
0x2165   : > { %v5045_v23 = vpop.permute.xlu0 %5044 }
0x2166   : > { %v5050_v26 = vsel %vm570_vm3, %v5045_v23, 0 }
0x2167   : > { %7153 = vmatpush3.bf16.msra.mxu1 %v5050_v26 }
0x2168   : > { %7164 = vmatprep.subr.bf16.mxu1 %v7529_v5 }
0x216c   : > { %v7476_v12 = vpop.eup %7475 }
0x216d   : > { %v4990_v28 = vmul.f32 %v7476_v12, %v7470_v50 }
0x216f   : > { %v4993_v36 = vpack.c.bf16 %v4990_v28, %v4990_v28 }
0x2171   : > { %7149 = vmatmul.mubr.msk.bf16.vlgmr.msra.gmra.mrb[152].mxu0 %vm384_vm2, %v4993_v36 }
0x2172   : > { %7159 = vmatpush3.bf16.msra.mxu0 %v5098_v30  ;;  %v4983_v31 = vpop.xlane.xlu1 %4982  ;;  %7160 = vmatprep.mubr.msk.bf16.mxu0 %vm7530_vm1, %v7529_v5 }
0x2173   : > { %7477 = vrcp.f32 %v4983_v31  ;;  %7170 = vmatprep.subr.bf16.mxu0 %v7529_v5 }
0x2176   : > { %v5163_v38 = vpop.permute.xlu1 %5162 }
0x217a   : > { %v5213_v58 = vpop.permute.xlu1 %5212 }
0x217d   : > { %v7478_v33 = vpop.eup %7477 }
0x217e   : > { %v4991_v34 = vmul.f32 %v7478_v33, %v7472_v59 }
0x2180   : > { %v4994_v35 = vpack.c.bf16 %v4991_v34, %v4991_v34 }
0x2182   : > { %7155 = vmatmul.mubr.msk.bf16.vlgmr.msra.gmra.mrb[148].mxu1 %vm384_vm2, %v4994_v35 }
0x2183   : > { %7165 = vmatpush3.bf16.xpose.msra.mxu1 %v5170_v37  ;;  %7166 = vmatprep.mubr.msk.bf16.mxu1 %vm7530_vm1, %v7529_v5 }
0x2184   : > { %7176 = vmatprep.subr.bf16.mxu1 %v7529_v5 }
0x218a   : > { %7167 = vmatmul.mubr.msk.bf16.vlgmr.msra.gmra.mrb[152].mxu1 %vm2680_vm15, %v5163_v38 }
0x218b   : > { %7178 = vmatprep.mubr.msk.bf16.mxu1 %vm7530_vm1, %v7529_v5 }
0x2196   : > { %v4986_v39 = vpop.xlane.xlu0 %4985 }
0x2197   : > { %7479 = vrcp.f32 %v4986_v39 }
0x219a   : > { %v5215_v40 = vpop.permute.xlu0 %5214 }
0x219b   : > { %v5220_v25 = vsel %vm2680_vm15, %v5215_v40, 0 }
0x219e   : > { %v5265_v42 = vpop.permute.xlu0 %5264 }
0x219f   : > { %v5270_v43 = vsel %vm2680_vm15, %v5265_v42, 0 }
0x21a0   : > { %7177 = vmatpush3.bf16.xpose.msra.mxu1 %v5270_v43 }
0x21a1   : > { %v7480_v47 = vpop.eup %7479  ;;  %7188 = vmatprep.subr.bf16.mxu1 %v7529_v5 }
0x21a2   : > { %v4992_v51 = vmul.f32 %v7480_v47, %v7474_v9  ;;  %v5263_v57 = vpop.permute.xlu0 %5262 }
0x21a4   : > { %v4995_v54 = vpack.c.bf16 %v4992_v51, %v4992_v51 }
0x21a6   : > { %7161 = vmatmul.mubr.msk.bf16.vlgmr.msra.gmra.mrb[156].mxu0 %vm384_vm2, %v4995_v54 }
0x21a7   : > { %7171 = vmatpush3.bf16.xpose.msra.mxu0 %v5220_v25  ;;  %7179 = vmatmul.mubr.msk.bf16.vlgmr.msra.gmra.mrb[156].mxu1 %vm2680_vm15, %v5263_v57 }
0x21a8   : > { %7172 = vmatprep.mubr.msk.bf16.mxu0 %vm7530_vm1, %v7529_v5  ;;  %7182 = vmatprep.subr.bf16.mxu0 %v7529_v5 }
0x21a9   : > { %7190 = vmatprep.mubr.msk.bf16.mxu1 %vm7530_vm1, %v7529_v5 }
0x21ae   : > { %7173 = vmatmul.mubr.msk.bf16.vlgmr.msra.gmra.mrb[160].mxu0 %vm2680_vm15, %v5213_v58 }
0x21af   : > { %7184 = vmatprep.mubr.msk.bf16.mxu0 %vm7530_vm1, %v7529_v5 }
0x2244   : > { %v8566_v61 = vpop.f32.mrb[152].mxu0 }
0x2245   : > { %v7150_v63 = vpop.f32.mrb[153].mxu0 }
0x2246   : > { %v5041_v52 = vpop.f32.mrb[154].mxu0 }
0x2247   : > { %v7151_v15 = vpop.f32.mrb[155].mxu0 }
0x2255   : > { %v8568_v49 = vpop.f32.mrb[148].mxu1 }
0x2256   : > { %v7156_v19 = vpop.f32.mrb[149].mxu1 }
0x2257   : > { %v5089_v24 = vpop.f32.mrb[150].mxu1 }
0x2258   : > { %v7157_v0 = vpop.f32.mrb[151].mxu1 }
0x225d   : > { %v5206_v45 = vpop.f32.mrb[152].mxu1 }
0x225e   : > { %v7168_v46 = vpop.f32.mrb[153].mxu1  ;;  %v5312_v53 = vsel %vm384_vm2, %v5206_v45, -inf }
0x225f   : > { %5313 = vmax.xlane.f32.xlu1 %v5312_v53  ;;  %v5209_v1 = vpop.f32.mrb[154].mxu1 }
0x2260   : > { %v7169_v2 = vpop.f32.mrb[155].mxu1 }
0x2270   : > { %5348 = vrot.lane.b32.xlu1 %v8388_v62, %s7545_s25 }
0x2274   : > { %5444 = vrot.lane.b32.xlu1 %v8419_v13, %s7545_s25 }
0x2279   : > { %v8575_v3 = vpop.f32.mrb[156].mxu0 }
0x227a   : > { %v7162_v50 = vpop.f32.mrb[157].mxu0  ;;  %v5306_v22 = vpop.f32.mrb[156].mxu1 }
0x227b   : > { %v5137_v32 = vpop.f32.mrb[158].mxu0  ;;  %v7180_v29 = vpop.f32.mrb[157].mxu1  ;;  %v5318_v9 = vsel %vm384_vm2, %v5306_v22, -inf }
0x227c   : > { %v7163_v20 = vpop.f32.mrb[159].mxu0  ;;  %v5309_v4 = vpop.f32.mrb[158].mxu1 }
0x227d   : > { %v7181_v60 = vpop.f32.mrb[159].mxu1 }
0x2281   : > { %v5256_v59 = vpop.f32.mrb[160].mxu0 }
0x2282   : > { %v7174_v14 = vpop.f32.mrb[161].mxu0  ;;  %v5315_v48 = vsel %vm384_vm2, %v5256_v59, -inf }
0x2283   : > { %5316 = vmax.xlane.f32.xlu0 %v5315_v48  ;;  %v5259_v16 = vpop.f32.mrb[162].mxu0 }
0x2284   : > { %v7175_v17 = vpop.f32.mrb[163].mxu0 }
0x2287   : > { %5319 = vmax.xlane.f32.xlu0 %v5318_v9 }
0x229d   : > { %5396 = vrot.lane.b32.xlu0 %v8432_v18, %s7545_s25 }
0x22ec   : > { %v5314_v41 = vpop.xlane.xlu1 %5313 }
0x22ed   : > { %v5321_v44 = vsub.f32 %v5206_v45, %v5314_v41 }
0x22ef   : > { %v5324_v23 = vmul.f32 1.442695, %v5321_v44 }
0x22f0   : > { %v5349_v26 = vpop.permute.xlu1 %5348 }
0x22f1   : > { %7481 = vpow2.f32 %v5324_v23  ;;  %v5354_v7 = vsel %vm570_vm3, %v5349_v26, 0 }
0x22f2   : > { %7183 = vmatpush3.bf16.msra.mxu0 %v5354_v7 }
0x22f3   : > { %7194 = vmatprep.subr.bf16.mxu0 %v7529_v5 }
0x22f4   : > { %v5445_v43 = vpop.permute.xlu1 %5444 }
0x22f5   : > { %v5450_v57 = vsel %vm570_vm3, %v5445_v43, 0 }
0x22fb   : > { %v7482_v12 = vpop.eup %7481 }
0x22fc   : > { %v5330_v28 = vsel %vm384_vm2, %v7482_v12, 0.0 }
0x22fd   : > { %5331 = vadd.xlane.f32.xlu1 %v5330_v28 }
0x230e   : > { %5566 = vrot.lane.b32.xlu1 %v8432_v18, %s7536_s12 }
0x2310   : > { %v5317_v27 = vpop.xlane.xlu0 %5316 }
0x2311   : > { %v5322_v36 = vsub.f32 %v5256_v59, %v5317_v27 }
0x2313   : > { %v5326_v30 = vmul.f32 1.442695, %v5322_v36 }
0x2314   : > { %v5320_v31 = vpop.xlane.xlu0 %5319 }
0x2315   : > { %7483 = vpow2.f32 %v5326_v30  ;;  %v5323_v35 = vsub.f32 %v5306_v22, %v5320_v31 }
0x2317   : > { %v5328_v38 = vmul.f32 1.442695, %v5323_v35 }
0x2318   : > { %v5397_v33 = vpop.permute.xlu0 %5396 }
0x2319   : > { %v5402_v34 = vsel %vm570_vm3, %v5397_v33, 0  ;;  %7485 = vpow2.f32 %v5328_v38 }
0x231a   : > { %7189 = vmatpush3.bf16.msra.mxu1 %v5402_v34 }
0x231b   : > { %7200 = vmatprep.subr.bf16.mxu1 %v7529_v5 }
0x231f   : > { %v7484_v37 = vpop.eup %7483 }
0x2320   : > { %v5333_v39 = vsel %vm384_vm2, %v7484_v37, 0.0 }
0x2321   : > { %5334 = vadd.xlane.f32.xlu0 %v5333_v39 }
0x2323   : > { %v7486_v40 = vpop.eup %7485 }
0x2324   : > { %v5336_v42 = vsel %vm384_vm2, %v7486_v40, 0.0 }
0x2332   : > { %5337 = vadd.xlane.f32.xlu1 %v5336_v42 }
0x2337   : > { %5516 = vrot.lane.b32.xlu0 %v8388_v62, %s7536_s12 }
0x233b   : > { %5514 = vrot.lane.b32.xlu0 %v8436_v21, %s7536_s12 }
0x233f   : > { %5564 = vrot.lane.b32.xlu0 %v8449_v8, %s7536_s12 }
0x2343   : > { %5616 = vrot.lane.b32.xlu1 %v8419_v13, %s7536_s12 }
0x2347   : > { %5614 = vrot.lane.b32.xlu1 %v8434_v56, %s7536_s12 }
0x238a   : > { %v5332_v47 = vpop.xlane.xlu1 %5331 }
0x238b   : > { %7487 = vrcp.f32 %v5332_v47 }
0x238e   : > { %v5567_v58 = vpop.permute.xlu1 %5566 }
0x238f   : > { %v5572_v50 = vsel %vm2680_vm15, %v5567_v58, 0 }
0x2395   : > { %v7488_v51 = vpop.eup %7487 }
0x2396   : > { %v5342_v54 = vmul.f32 %v7488_v51, %v7482_v12 }
0x2398   : > { %v5345_v25 = vpack.c.bf16 %v5342_v54, %v5342_v54 }
0x239a   : > { %7185 = vmatmul.mubr.msk.bf16.vlgmr.msra.gmra.mrb[164].mxu0 %vm384_vm2, %v5345_v25 }
0x239b   : > { %7195 = vmatpush3.bf16.msra.mxu0 %v5450_v57  ;;  %7196 = vmatprep.mubr.msk.bf16.mxu0 %vm7530_vm1, %v7529_v5 }
0x239c   : > { %7206 = vmatprep.subr.bf16.mxu0 %v7529_v5 }
0x23ae   : > { %v5335_v21 = vpop.xlane.xlu0 %5334 }
0x23af   : > { %7489 = vrcp.f32 %v5335_v21 }
0x23b2   : > { %v5517_v63 = vpop.permute.xlu0 %5516 }
0x23b3   : > { %v5522_v15 = vsel %vm2680_vm15, %v5517_v63, 0 }
0x23b6   : > { %v5515_v0 = vpop.permute.xlu0 %5514 }
0x23b9   : > { %v7490_v8 = vpop.eup %7489 }
0x23ba   : > { %v5343_v56 = vmul.f32 %v7490_v8, %v7484_v37  ;;  %v5565_v22 = vpop.permute.xlu0 %5564 }
0x23bc   : > { %v5346_v52 = vpack.c.bf16 %v5343_v56, %v5343_v56 }
0x23be   : > { %7191 = vmatmul.mubr.msk.bf16.vlgmr.msra.gmra.mrb[160].mxu1 %vm384_vm2, %v5346_v52 }
0x23bf   : > { %v5338_v19 = vpop.xlane.xlu1 %5337  ;;  %7201 = vmatpush3.bf16.xpose.msra.mxu1 %v5522_v15  ;;  %7202 = vmatprep.mubr.msk.bf16.mxu1 %vm7530_vm1, %v7529_v5 }
0x23c0   : > { %7491 = vrcp.f32 %v5338_v19  ;;  %7212 = vmatprep.subr.bf16.mxu1 %v7529_v5  ;;  %v6470_v19 = vpack.c.bf16 %v8566_v61, %v8566_v61 }
0x23c3   : > { %v5617_v24 = vpop.permute.xlu1 %5616 }
0x23c4   : > { %v5622_v45 = vsel %vm2680_vm15, %v5617_v24, 0  ;;  %v7333_v24 = vld [vmem:[%s8770_s4 + $0x8] ss:$16 sps:$4 sm:$0xff]  }
0x23c6   : > { %7203 = vmatmul.mubr.msk.bf16.vlgmr.msra.gmra.mrb[164].mxu1 %vm2680_vm15, %v5515_v0  ;;  %v6472_v0 = vpack.c.bf16 %v8575_v3, %v8575_v3  ;;  %v7334_v3 = vld [vmem:[%s8770_s4 + $0x28] ss:$16 sps:$4 sm:$0xff]  }
0x23c7   : > { %7213 = vmatpush3.bf16.xpose.msra.mxu1 %v5622_v45  ;;  %7214 = vmatprep.mubr.msk.bf16.mxu1 %vm7530_vm1, %v7529_v5  ;;  %v5615_v1 = vpop.permute.xlu1 %5614 }
0x23c8   : > { %7224 = vmatprep.subr.bf16.mxu1 %v7529_v5 }
0x23ca   : > { %v7492_v46 = vpop.eup %7491 }
0x23cb   : > { %v5344_v53 = vmul.f32 %v7492_v46, %v7486_v40 }
0x23cd   : > { %v5347_v2 = vpack.c.bf16 %v5344_v53, %v5344_v53 }
0x23ce   : > { %7215 = vmatmul.mubr.msk.bf16.vlgmr.msra.gmra.mrb[168].mxu1 %vm2680_vm15, %v5615_v1 }
0x23cf   : > { %7197 = vmatmul.mubr.msk.bf16.vlgmr.msra.gmra.mrb[168].mxu0 %vm384_vm2, %v5347_v2  ;;  %7226 = vmatprep.mubr.msk.bf16.mxu1 %vm7530_vm1, %v7529_v5 }
0x23d0   : > { %7207 = vmatpush3.bf16.xpose.msra.mxu0 %v5572_v50  ;;  %7208 = vmatprep.mubr.msk.bf16.mxu0 %vm7530_vm1, %v7529_v5 }
0x23d1   : > { %7218 = vmatprep.subr.bf16.mxu0 %v7529_v5 }
0x23d7   : > { %7209 = vmatmul.mubr.msk.bf16.vlgmr.msra.gmra.mrb[172].mxu0 %vm2680_vm15, %v5565_v22  ;;  %vm6164_vm15 = vcmp.eq.s32.totalorder %v8105_v55, 17 }
0x23d8   : > { %7220 = vmatprep.mubr.msk.bf16.mxu0 %vm7530_vm1, %v7529_v5 }
0x246d   : > { %v8626_v32 = vpop.f32.mrb[164].mxu0 }
0x246e   : > { %v7186_v29 = vpop.f32.mrb[165].mxu0 }
0x246f   : > { %v5393_v20 = vpop.f32.mrb[166].mxu0 }
0x2470   : > { %v7187_v4 = vpop.f32.mrb[167].mxu0 }
0x2491   : > { %v8628_v60 = vpop.f32.mrb[160].mxu1 }
0x2492   : > { %v7192_v59 = vpop.f32.mrb[161].mxu1  ;;  %v6474_v61 = vpack.c.bf16 %v8628_v60, %v8628_v60 }
0x2493   : > { %v5441_v14 = vpop.f32.mrb[162].mxu1 }
0x2494   : > { %v7193_v48 = vpop.f32.mrb[163].mxu1 }
0x2499   : > { %v5558_v16 = vpop.f32.mrb[164].mxu1 }
0x249a   : > { %v7204_v17 = vpop.f32.mrb[165].mxu1  ;;  %v5664_v9 = vsel %vm384_vm2, %v5558_v16, -inf }
0x249b   : > { %5665 = vmax.xlane.f32.xlu0 %v5664_v9  ;;  %v5561_v41 = vpop.f32.mrb[166].mxu1 }
0x249c   : > { %v7205_v44 = vpop.f32.mrb[167].mxu1 }
0x24a1   : > { %v5658_v23 = vpop.f32.mrb[168].mxu1 }
0x24a2   : > { %v5486_v26 = vpop.f32.mrb[168].mxu0  ;;  %v7216_v7 = vpop.f32.mrb[169].mxu1  ;;  %v5670_v12 = vsel %vm384_vm2, %v5658_v23, -inf }
0x24a3   : > { %v7198_v28 = vpop.f32.mrb[169].mxu0  ;;  %5671 = vmax.xlane.f32.xlu0 %v5670_v12  ;;  %v5661_v27 = vpop.f32.mrb[170].mxu1  ;;  %v6475_v45 = vpack.c.bf16 %v5486_v26, %v5486_v26 }
0x24a4   : > { %v5489_v36 = vpop.f32.mrb[170].mxu0  ;;  %v7217_v30 = vpop.f32.mrb[171].mxu1 }
0x24a5   : > { %v7199_v31 = vpop.f32.mrb[171].mxu0 }
0x24aa   : > { %v5608_v33 = vpop.f32.mrb[172].mxu0 }
0x24ab   : > { %v7210_v34 = vpop.f32.mrb[173].mxu0  ;;  %v5667_v35 = vsel %vm384_vm2, %v5608_v33, -inf }
0x24ac   : > { %5668 = vmax.xlane.f32.xlu1 %v5667_v35  ;;  %v5611_v37 = vpop.f32.mrb[174].mxu0 }
0x24ad   : > { %v7211_v38 = vpop.f32.mrb[175].mxu0 }
0x24ae   : > { %v7336_v38 = vld [vmem:[%s8770_s4 + $0x68] ss:$16 sps:$4 sm:$0xff]  }
0x24bd   : > { %5700 = vrot.lane.b32.xlu1 %v8388_v62, %s7543_s19 }
0x2528   : > { %v5666_v39 = vpop.xlane.xlu0 %5665 }
0x2529   : > { %v5673_v40 = vsub.f32 %v5558_v16, %v5666_v39 }
0x252b   : > { %v5676_v42 = vmul.f32 1.442695, %v5673_v40 }
0x252d   : > { %7493 = vpow2.f32 %v5676_v42 }
0x2530   : > { %v5672_v43 = vpop.xlane.xlu0 %5671 }
0x2531   : > { %v5675_v47 = vsub.f32 %v5658_v23, %v5672_v43 }
0x2533   : > { %v5680_v51 = vmul.f32 1.442695, %v5675_v47  ;;  %v7339_v47 = vld [vmem:[%s8770_s4 + $0xc] ss:$16 sps:$4 sm:$0xff]  }
0x2535   : > { %7495 = vpow2.f32 %v5680_v51  ;;  %v7340_v51 = vld [vmem:[%s8770_s4 + $0x2c] ss:$16 sps:$4 sm:$0xff]  }
0x2537   : > { %v7494_v54 = vpop.eup %7493 }
0x2538   : > { %v5682_v25 = vsel %vm384_vm2, %v7494_v54, 0.0 }
0x2539   : > { %v5669_v57 = vpop.xlane.xlu1 %5668  ;;  %5683 = vadd.xlane.f32.xlu0 %v5682_v25  ;;  %v7335_v25 = vld [vmem:[%s8770_s4 + $0x48] ss:$16 sps:$4 sm:$0xff]  }
0x253a   : > { %v5674_v21 = vsub.f32 %v5608_v33, %v5669_v57 }
0x253c   : > { %v5678_v8 = vmul.f32 1.442695, %v5674_v21 }
0x253d   : > { %v5701_v56 = vpop.permute.xlu1 %5700 }
0x253e   : > { %7497 = vpow2.f32 %v5678_v8  ;;  %v5706_v58 = vsel %vm570_vm3, %v5701_v56, 0 }
0x253f   : > { %v7496_v62 = vpop.eup %7495  ;;  %7219 = vmatpush3.bf16.msra.mxu0 %v5706_v58 }
0x2540   : > { %v5688_v63 = vsel %vm384_vm2, %v7496_v62, 0.0  ;;  %7230 = vmatprep.subr.bf16.mxu0 %v7529_v5 }
0x2541   : > { %5689 = vadd.xlane.f32.xlu0 %v5688_v63 }
0x2548   : > { %v7498_v52 = vpop.eup %7497 }
0x2549   : > { %v5685_v15 = vsel %vm384_vm2, %v7498_v52, 0.0 }
0x254a   : > { %5686 = vadd.xlane.f32.xlu1 %v5685_v15  ;;  %v7342_v15 = vld [vmem:[%s8770_s4 + $0x6c] ss:$16 sps:$4 sm:$0xff]  }
0x2557   : > { %5748 = vrot.lane.b32.xlu0 %v8432_v18, %s7543_s19  ;;  %v6471_v18 = vpack.c.bf16 %v8568_v49, %v8568_v49 }
0x255b   : > { %5796 = vrot.lane.b32.xlu1 %v8419_v13, %s7543_s19  ;;  %5150 = vrot.lane.b32.xlu0 %v6470_v19, %s7543_s19  ;;  %v6473_v13 = vpack.c.bf16 %v8626_v32, %v8626_v32  ;;  %v8715_v19 = vld [vmem:[%s286_s15 + $0x8] sm:$0xff] }
0x255c   : > { %vm6124_vm11 = vcmp.ne.s32.totalorder %v8715_v19, 0 }
0x255f   : > { %5905 = vrot.lane.b32.xlu1 %v7333_v24, %s7532_s8  ;;  %5154 = vrot.lane.b32.xlu0 %v6472_v0, %s7543_s19 }
0x2563   : > { %5152 = vrot.lane.b32.xlu1 %v6471_v18, %s7543_s19  ;;  %5504 = vrot.lane.b32.xlu0 %v6474_v61, %s7545_s25 }
0x2567   : > { %5502 = vrot.lane.b32.xlu1 %v6473_v13, %s7545_s25  ;;  %5506 = vrot.lane.b32.xlu0 %v6475_v45, %s7545_s25 }
0x256b   : > { %5907 = vrot.lane.b32.xlu1 %v7334_v3, %s7532_s8 }
0x25c6   : > { %v5684_v49 = vpop.xlane.xlu0 %5683 }
0x25c7   : > { %7499 = vrcp.f32 %v5684_v49 }
0x25ce   : > { %v5690_v46 = vpop.xlane.xlu0 %5689 }
0x25cf   : > { %7501 = vrcp.f32 %v5690_v46 }
0x25d1   : > { %v7500_v53 = vpop.eup %7499 }
0x25d2   : > { %v5694_v1 = vmul.f32 %v7500_v53, %v7494_v54  ;;  %v5749_v2 = vpop.permute.xlu0 %5748  ;;  %v6434_v53 = vld [vmem:[%s8771_s5] ss:$0 sm:$0xff] }
0x25d3   : > { %v5754_v50 = vsel %vm570_vm3, %v5749_v2, 0 }
0x25d4   : > { %7225 = vmatpush3.bf16.msra.mxu1 %v5754_v50  ;;  %v5697_v22 = vpack.c.bf16 %v5694_v1, %v5694_v1 }
0x25d6   : > { %v5151_v32 = vpop.permute.xlu0 %5150  ;;  %7221 = vmatmul.mubr.msk.bf16.vlgmr.msra.gmra.mrb[176].mxu0 %vm384_vm2, %v5697_v22 }
0x25d7   : > { %5159 = vst.msk [vmem:[#allocation4] sm:$0xf] %vm3371_vm6, %v5151_v32  ;;  %v5687_v29 = vpop.xlane.xlu1 %5686  ;;  %7232 = vmatprep.mubr.msk.bf16.mxu0 %vm7530_vm1, %v7529_v5 }
0x25d8   : > { %7503 = vrcp.f32 %v5687_v29  ;;  %v6069_v29 = vld [vmem:[%s286_s15] sm:$0xff] }
0x25d9   : > { %v7502_v20 = vpop.eup %7501  ;;  %vm6123_vm10 = vcmp.ne.s32.totalorder %v6069_v29, 0 }
0x25da   : > { %v5696_v4 = vmul.f32 %v7502_v20, %v7496_v62  ;;  %v5155_v60 = vpop.permute.xlu0 %5154 }
0x25db   : > { %5161 = vst.msk [vmem:[#allocation4 + $0x8] sm:$0xf] %vm3371_vm6, %v5155_v60  ;;  %v5797_v59 = vpop.permute.xlu1 %5796 }
0x25dc   : > { %v5802_v14 = vsel %vm570_vm3, %v5797_v59, 0  ;;  %v5699_v48 = vpack.c.bf16 %v5696_v4, %v5696_v4 }
0x25dd   : > { %7231 = vmatpush3.bf16.msra.mxu0 %v5802_v14 }
0x25de   : > { %v5505_v16 = vpop.permute.xlu0 %5504  ;;  %7248 = vmatprep.subr.bf16.mxu0 %v7339_v47 }
0x25df   : > { %v5906_v17 = vpop.permute.xlu1 %5905 }
0x25e0   : > { %7233 = vmatmul.mubr.msk.bf16.vlgmr.msra.gmra.mrb[180].mxu0 %vm384_vm2, %v5699_v48  ;;  %7236 = vmatprep.subr.bf16.mxu1 %v5906_v17 }
0x25e1   : > { %7249 = vmatpush3.bf16.msra.mxu0 %v7339_v47 }
0x25e2   : > { %v7504_v9 = vpop.eup %7503  ;;  %v5507_v41 = vpop.permute.xlu0 %5506  ;;  %7250 = vmatprep.subr.bf16.mxu0 %v7340_v51 }
0x25e3   : > { %v5695_v44 = vmul.f32 %v7504_v9, %v7498_v52  ;;  %5513 = vst.msk [vmem:[#allocation4 + $0x8] sm:$0xf] %vm3724_vm7, %v5507_v41  ;;  %v5153_v5 = vpop.permute.xlu1 %5152  ;;  %v7341_v52 = vld [vmem:[%s8770_s4 + $0x4c] ss:$16 sps:$4 sm:$0xff]  }
0x25e4   : > { %5160 = vst.msk [vmem:[#allocation4 + $0x4] sm:$0xf] %vm3371_vm6, %v5153_v5 }
0x25e5   : > { %5512 = vst.msk [vmem:[#allocation4 + $0x4] sm:$0xf] %vm3724_vm7, %v5505_v16  ;;  %v5698_v23 = vpack.c.bf16 %v5695_v44, %v5695_v44  ;;  %7251 = vmatpush3.bf16.msra.mxu0 %v7340_v51 }
0x25e6   : > { %7252 = vmatprep.subr.bf16.mxu0 %v7341_v52 }
0x25e7   : > { %7227 = vmatmul.mubr.msk.bf16.vlgmr.msra.gmra.mrb[172].mxu1 %vm384_vm2, %v5698_v23  ;;  %v5503_v26 = vpop.permute.xlu1 %5502 }
0x25e8   : > { %5511 = vst.msk [vmem:[#allocation4] sm:$0xf] %vm3724_vm7, %v5503_v26  ;;  %7237 = vmatpush3.bf16.msra.mxu1 %v5906_v17 }
0x25e9   : > { %7253 = vmatpush3.bf16.msra.mxu0 %v7341_v52 }
0x25ea   : > { %7254 = vmatprep.subr.bf16.mxu0 %v7342_v15 }
0x25eb   : > { %v5908_v7 = vpop.permute.xlu1 %5907 }
0x25ec   : > { %7238 = vmatprep.subr.bf16.mxu1 %v5908_v7 }
0x25ed   : > { %7239 = vmatpush3.bf16.msra.mxu1 %v5908_v7  ;;  %7255 = vmatpush3.bf16.msra.mxu0 %v7342_v15  ;;  %v6135_v7 = vcvt.s32.f32 %v8105_v55 }
0x26a9   : > { %v5742_v12 = vpop.f32.mrb[176].mxu0 }
0x26aa   : > { %v6476_v28 = vpack.c.bf16 %v5742_v12, %v5742_v12  ;;  %v7222_v27 = vpop.f32.mrb[177].mxu0 }
0x26ab   : > { %v5745_v36 = vpop.f32.mrb[178].mxu0 }
0x26ac   : > { %5854 = vrot.lane.b32.xlu1 %v6476_v28, %s7538_s14  ;;  %v7223_v30 = vpop.f32.mrb[179].mxu0 }
0x26b3   : > { %v5838_v31 = vpop.f32.mrb[180].mxu0 }
0x26b4   : > { %v6478_v33 = vpack.c.bf16 %v5838_v31, %v5838_v31  ;;  %v7234_v34 = vpop.f32.mrb[181].mxu0 }
0x26b5   : > { %v5841_v35 = vpop.f32.mrb[182].mxu0 }
0x26b6   : > { %5858 = vrot.lane.b32.xlu1 %v6478_v33, %s7538_s14  ;;  %v7235_v37 = vpop.f32.mrb[183].mxu0 }
0x26ba   : > { %v5790_v39 = vpop.f32.mrb[172].mxu1  ;;  %5911 = vrot.lane.b32.xlu1 %v7336_v38, %s7532_s8 }
0x26bb   : > { %v6477_v40 = vpack.c.bf16 %v5790_v39, %v5790_v39  ;;  %v7228_v42 = vpop.f32.mrb[173].mxu1 }
0x26bc   : > { %v5793_v43 = vpop.f32.mrb[174].mxu1 }
0x26bd   : > { %5856 = vrot.lane.b32.xlu0 %v6477_v40, %s7538_s14  ;;  %v7229_v54 = vpop.f32.mrb[175].mxu1 }
0x26be   : > { %6106 = vperm.xlu1 %7293, %v8715_v19  }
0x26c1   : > { %5909 = vrot.lane.b32.xlu0 %v7335_v25, %s7532_s8 }
0x271e   : > { %v5855_v57 = vpop.permute.xlu1 %5854 }
0x271f   : > { %5863 = vst.msk [vmem:[#allocation4] sm:$0xf] %vm4077_vm0, %v5855_v57 }
0x2728   : > { %v5859_v21 = vpop.permute.xlu1 %5858 }
0x2729   : > { %5865 = vst.msk [vmem:[#allocation4 + $0x8] sm:$0xf] %vm4077_vm0, %v5859_v21 }
0x272c   : > { %v5912_v58 = vpop.permute.xlu1 %5911 }
0x272f   : > { %v5857_v8 = vpop.permute.xlu0 %5856 }
0x2730   : > { %5864 = vst.msk [vmem:[#allocation4 + $0x4] sm:$0xf] %vm4077_vm0, %v5857_v8  ;;  %v7338_v63 = vld [vmem:[#allocation4 + $0x8] ss:$0 sps:$4 sm:$0xff]  }
0x2733   : > { %v5910_v56 = vpop.permute.xlu0 %5909 }
0x2734   : > { %7240 = vmatprep.subr.bf16.mxu1 %v5910_v56 }
0x2735   : > { %7241 = vmatpush3.bf16.msra.mxu1 %v5910_v56 }
0x2736   : > { %7242 = vmatprep.subr.bf16.mxu1 %v5912_v58 }
0x2737   : > { %v7337_v62 = vld [vmem:[#allocation4] sm:$0xff]  }
0x2738   : > { %7244 = vmatprep.mubr.msk.bf16.mxu1 %vm2616_vm14, %v7337_v62 }
0x2739   : > { %7243 = vmatpush3.bf16.msra.mxu1 %v5912_v58 }
0x273c   : > { %7245 = vmatmul.mubr.msk.bf16.vlgmr.msra.gmra.mrb[176].mxu1 %vm2616_vm14, %v7338_v63 }
0x273d   : > { %v6107_v20 = vpop.permute.xlu1 %6106 }
0x273e   : > { %vm6112_vm3 = vcmp.eq.s32.totalorder %v8105_v55, %v6107_v20 }
0x280f   : > { %v7246_v24 = vpop.f32.mrb[176].mxu1 }
0x2810   : > { %v5957_v0 = vpop.f32.mrb[177].mxu1  ;;  %v5973_v61 = vadd.f32 %v7246_v24, %v8413_v6 }
0x2811   : > { %v7247_v18 = vpop.f32.mrb[178].mxu1  ;;  %v5971_v45 = vadd.f32 %v5957_v0, %v8415_v10 }
0x2812   : > { %v5960_v13 = vpop.f32.mrb[179].mxu1  ;;  %v5983_v46 = vpack.c.bf16 %v5973_v61, %v5973_v61 }
0x2813   : > { %v5972_v3 = vadd.f32 %v5960_v13, %v8417_v11  ;;  %v8735_v11 = vld [vmem:[%s286_s15 + $0x10] sm:$0xff] }
0x2814   : > { %vm6125_vm12 = vcmp.ne.s32.totalorder %v8735_v11, 0 }
0x2815   : > { %v5982_v49 = vpack.c.bf16 %v5972_v3, %v5971_v45 }
0x2817   : > { %7256 = vmatprep.mubr.msk.bf16.mxu0 %vm2616_vm14, %v5982_v49 }
0x2818   : > { %7257 = vmatmul.mubr.msk.bf16.vlgmr.msra.gmra.mrb[184].mxu0 %vm2616_vm14, %v5983_v46 }
0x28eb   : > { %v7258_v1 = vpop.f32.mrb[184].mxu0 }
0x28ec   : > { %v6055_v2 = vpop.f32.mrb[185].mxu0  ;;  %v8731_v10 = vadd.f32 %v7258_v1, %v6434_v53 }
0x28ed   : > { %v8726_v50 = vadd.f32 %v6434_v53, %v6055_v2  ;;  %v7259_v6 = vpop.f32.mrb[186].mxu0 }
0x28ee   : > { %v6058_v22 = vpop.f32.mrb[187].mxu0 }
0x28ef   : > { %v8728_v32 = vadd.f32 %v6434_v53, %v6058_v22  ;;  %6072 = vmax.xlane.f32.xlu0 %v8726_v50 }
0x28f1   : > { %6074 = vmax.xlane.f32.xlu1 %v8728_v32  ;;  %v6115_v36 = vsel %vm6112_vm3, %v8728_v32, 0.0 }
0x28f3   : > { %6076 = vmax.xlane.f32.xlu0 %v8731_v10 }
0x2902   : > { %6109 = vperm.xlu1 %7293, %v8735_v11  }
0x2909   : > { %6103 = vperm.xlu0 %7292, %v6069_v29  }
0x297c   : > { %v6073_v4 = vpop.xlane.xlu0 %6072 }
0x297d   : > { %v6078_v60 = vsub.f32 %v8726_v50, %v6073_v4  ;;  %vm6132_vm9 = vcmp.ge.f32.partialorder %v8726_v50, %v6073_v4 }
0x297e   : > { %v6075_v59 = vpop.xlane.xlu1 %6074  ;;  %v6136_v31 = vsel %vm6132_vm9, %v6135_v7, 128.0 }
0x297f   : > { %v6081_v14 = vmul.f32 1.442695, %v6078_v60  ;;  %v6079_v48 = vsub.f32 %v8728_v32, %v6075_v59  ;;  %vm6133_vm1 = vcmp.ge.f32.partialorder %v8728_v32, %v6075_v59 }
0x2980   : > { %v6077_v16 = vpop.xlane.xlu0 %6076  ;;  %v6137_v12 = vsel %vm6133_vm1, %v6135_v7, 128.0 }
0x2981   : > { %7505 = vpow2.f32 %v6081_v14  ;;  %v6083_v17 = vmul.f32 1.442695, %v6079_v48  ;;  %v6080_v9 = vsub.f32 %v8731_v10, %v6077_v16  ;;  %vm6134_vm14 = vcmp.ge.f32.partialorder %v8731_v10, %v6077_v16 }
0x2982   : > { %v6110_v27 = vpop.permute.xlu1 %6109  ;;  %v6138_v33 = vsel %vm6134_vm14, %v6135_v7, 128.0 }
0x2983   : > { %7507 = vpow2.f32 %v6083_v17  ;;  %v6085_v41 = vmul.f32 1.442695, %v6080_v9  ;;  %vm6113_vm8 = vcmp.eq.s32.totalorder %v8105_v55, %v6110_v27 }
0x2984   : > { %v6116_v30 = vsel %vm6113_vm8, %v8731_v10, 0.0 }
0x2985   : > { %7509 = vpow2.f32 %v6085_v41 }
0x2988   : > { %v6104_v23 = vpop.permute.xlu0 %6103 }
0x2989   : > { %vm6111_vm2 = vcmp.eq.s32.totalorder %v8105_v55, %v6104_v23 }
0x298a   : > { %v6114_v28 = vsel %vm6111_vm2, %v8726_v50, 0.0 }
0x298b   : > { %v7506_v44 = vpop.eup %7505 }
0x298c   : > { %6087 = vadd.xlane.f32.xlu1 %v7506_v44 }
0x298d   : > { %v7508_v5 = vpop.eup %7507 }
0x298e   : > { %6089 = vadd.xlane.f32.xlu0 %v7508_v5 }
0x298f   : > { %v7510_v26 = vpop.eup %7509 }
0x2990   : > { %6091 = vadd.xlane.f32.xlu1 %v7510_v26 }
0x2992   : > { %6141 = vmin.xlane.f32.xlu0 %v6137_v12 }
0x2994   : > { %6117 = vadd.xlane.f32.xlu1 %v6114_v28 }
0x2998   : > { %6119 = vadd.xlane.f32.xlu1 %v6115_v36 }
0x299c   : > { %6121 = vadd.xlane.f32.xlu1 %v6116_v30 }
0x29a0   : > { %6139 = vmin.xlane.f32.xlu1 %v6136_v31 }
0x29a4   : > { %6143 = vmin.xlane.f32.xlu1 %v6138_v33 }
0x2a19   : > { %v6088_v34 = vpop.xlane.xlu1 %6087 }
0x2a1a   : > { %7511 = vlog2.f32 %v6088_v34 }
0x2a1b   : > { %v6090_v35 = vpop.xlane.xlu0 %6089 }
0x2a1c   : > { %7513 = vlog2.f32 %v6090_v35 }
0x2a1d   : > { %v6092_v37 = vpop.xlane.xlu1 %6091 }
0x2a1e   : > { %7515 = vlog2.f32 %v6092_v37 }
0x2a1f   : > { %v6142_v0 = vpop.xlane.xlu0 %6141 }
0x2a21   : > { %v6118_v38 = vpop.xlane.xlu1 %6117 }
0x2a24   : > { %v7512_v39 = vpop.eup %7511 }
0x2a25   : > { %v6094_v40 = vmul.f32 0.6931472, %v7512_v39  ;;  %v6120_v43 = vpop.xlane.xlu1 %6119 }
0x2a26   : > { %v7514_v42 = vpop.eup %7513 }
0x2a27   : > { %v6096_v47 = vmul.f32 0.6931472, %v7514_v42  ;;  %v6099_v51 = vadd.f32 %v6094_v40, %v6073_v4 }
0x2a28   : > { %v7516_v54 = vpop.eup %7515 }
0x2a29   : > { %v6098_v25 = vmul.f32 0.6931472, %v7516_v54  ;;  %v6126_v57 = vsub.f32 %v6099_v51, %v6118_v38  ;;  %v6100_v21 = vadd.f32 %v6096_v47, %v6075_v59  ;;  %v6122_v62 = vpop.xlane.xlu1 %6121 }
0x2a2b   : > { %v6129_v8 = vsel %vm6123_vm10, %v6126_v57, 0.0  ;;  %v6127_v56 = vsub.f32 %v6100_v21, %v6120_v43  ;;  %v6101_v58 = vadd.f32 %v6098_v25, %v6077_v16 }
0x2a2c   : > { %6148 = vperm.xlu0 %7292, %v6129_v8  }
0x2a2d   : > { %v6130_v63 = vsel %vm6124_vm11, %v6127_v56, 0.0  ;;  %v6128_v52 = vsub.f32 %v6101_v58, %v6122_v62  ;;  %v6140_v24 = vpop.xlane.xlu1 %6139 }
0x2a2e   : > { %6153 = vperm.xlu1 %7293, %v6130_v63  }
0x2a2f   : > { %v6131_v15 = vsel %vm6125_vm12, %v6128_v52, 0.0 }
0x2a31   : > { %v6144_v18 = vpop.xlane.xlu1 %6143 }
0x2a32   : > { %6158 = vperm.xlu1 %7293, %v6131_v15  }
0x2aab   : > { %v6149_v19 = vpop.permute.xlu0 %6148 }
0x2aac   : > { %v6161_v61 = vsel %vm6145_vm13, %v6149_v19, %v8726_v50 }
0x2aad   : > { %v6165_v13 = vsel %vm6164_vm15, %v6140_v24, %v6161_v61  ;;  %v6154_v45 = vpop.permute.xlu1 %6153 }
0x2aae   : > { %6168 = vst [vmem:[%s291_s13] sm:$0xff] %v6165_v13  ;;  %v6162_v3 = vsel %vm6145_vm13, %v6154_v45, %v8728_v32 }
0x2aaf   : > { %v6166_v49 = vsel %vm6164_vm15, %v6142_v0, %v6162_v3 }
0x2ab0   : > { %6169 = vst [vmem:[%s291_s13 + $0x8] sm:$0xff] %v6166_v49 }
0x2ab1   : > { %v6159_v46 = vpop.permute.xlu1 %6158 }
0x2ab2   : > { %v6163_v53 = vsel %vm6145_vm13, %v6159_v46, %v8731_v10 }
0x2ab3   : > { %v6167_v1 = vsel %vm6164_vm15, %v6144_v18, %v6163_v53 }
0x2ab4   : > { %6170 = vst [vmem:[%s291_s13 + $0x10] sm:$0xff] %v6167_v1 }
0x2ab5 PF: > { %s16_s21 = sadd.s32 1, %s7527_s21  }
0x2ab6   : > { %p13_p4 = scmp.ge.s32.totalorder %s16_s21, 4  }
0x2ab8   :  { %15 = sbr.rel (!%p13_p4) target bundleno = 1 (0x1), region = 80 }

</bundles_post_ra>
